<compile_context>
chip_gen: v5e
topology: v5e:2x2
jax: 0.10.0
libtpu: 0.0.40
codegen_flags: <defaults>
</compile_context>

<pallas_src>
import functools
import math

import jax
import jax.numpy as jnp
from jax import lax
from jax.experimental import pallas as pl
from jax.experimental.pallas import tpu as pltpu

LN_EPS = 1e-5  # PyTorch nn.LayerNorm default


def _pick_tile(m, target=512):
    """Largest multiple-of-8 divisor of m that is <= target (prefer >=2 tiles)."""
    cap = min(target, m)
    if m >= 16:
        cap = min(cap, m // 2)          # at least two tiles when possible
    for tm in range(cap, 7, -1):
        if m % tm == 0 and tm % 8 == 0:
            return tm
    return m


# ----------------------------------------------------------------------------
# Kernel 1: depthwise 3x3x3 conv (groups=dim, padding=1) fused with residual
#           out = x + depthwise_conv3d(x) + bias      (halo built in VMEM)
# ----------------------------------------------------------------------------
def _dwconv3d_residual_kernel(x_ref, w_ref, b_ref, o_ref, xpad_ref, *, T, H, W):
    # x_ref: (T, H, W, C)   w_ref: (27, C)   b_ref: (1, C)
    # xpad_ref (scratch): (T+2, H+2, W+2, C) fp32
    x = x_ref[...].astype(jnp.float32)
    xpad_ref[...] = jnp.zeros_like(xpad_ref)                  # zero halo
    xpad_ref[1:T + 1, 1:H + 1, 1:W + 1, :] = x                # interior

    acc = x + b_ref[...]                                      # residual + conv bias
    k = 0
    for dt in range(3):
        for dh in range(3):
            for dw in range(3):
                tap = xpad_ref[dt:dt + T, dh:dh + H, dw:dw + W, :]
                acc = acc + tap * w_ref[k:k + 1, :]
                k += 1
    o_ref[...] = acc.astype(o_ref.dtype)


def dwconv3d_residual(x_cl, w27, bias):
    # TODO(synk): for large T/H/W, tile the grid over T (with a 2-element halo)
    # instead of one full volume per batch element.
    B, T, H, W, C = x_cl.shape
    kern = functools.partial(_dwconv3d_residual_kernel, T=T, H=H, W=W)
    return pl.pallas_call(
        kern,
        out_shape=jax.ShapeDtypeStruct((B, T, H, W, C), x_cl.dtype),
        grid=(B,),
        in_specs=[
            pl.BlockSpec((None, T, H, W, C), lambda b: (b, 0, 0, 0, 0)),
            pl.BlockSpec((27, C), lambda b: (0, 0)),
            pl.BlockSpec((1, C), lambda b: (0, 0)),
        ],
        out_specs=pl.BlockSpec((None, T, H, W, C), lambda b: (b, 0, 0, 0, 0)),
        scratch_shapes=[pltpu.VMEM((T + 2, H + 2, W + 2, C), jnp.float32)],
        compiler_params=pltpu.CompilerParams(dimension_semantics=("parallel",)),
    )(x_cl, w27, bias)


# ----------------------------------------------------------------------------
# Kernel 2: fused  x + MHSA(LayerNorm1(x)).
#   grid = (batch, heads); heads is an "arbitrary" reduction axis with an fp32
#   accumulator; LN output is computed once per batch into a bf16 VMEM scratch.
# ----------------------------------------------------------------------------
def _attn_block_kernel(x_ref, g_ref, beta_ref, wq_ref, wk_ref, wv_ref, wp_ref,
                       bproj_ref, o_ref, xn_ref, acc_ref, *, scale):
    h = pl.program_id(1)

    @pl.when(h == 0)
    def _():
        x = x_ref[...].astype(jnp.float32)                    # (N, C)
        mu = jnp.mean(x, axis=-1, keepdims=True)
        var = jnp.mean(jnp.square(x - mu), axis=-1, keepdims=True)
        xn = (x - mu) * lax.rsqrt(var + LN_EPS)
        xn = xn * g_ref[...] + beta_ref[...]
        xn_ref[...] = xn.astype(jnp.bfloat16)
        acc_ref[...] = x + bproj_ref[...]                     # residual + proj bias

    xn = xn_ref[...]                                          # (N, C) bf16
    # Per-head projections: K = C contraction (full MXU K), bf16 operands.
    q = jnp.dot(xn, wq_ref[...], preferred_element_type=jnp.float32)   # (N, hd)
    k = jnp.dot(xn, wk_ref[...], preferred_element_type=jnp.float32)
    v = jnp.dot(xn, wv_ref[...], preferred_element_type=jnp.float32)

    # TODO(synk): flash-style KV tiling (online softmax) for long sequences.
    s = jnp.einsum('nd,md->nm', q.astype(jnp.bfloat16), k.astype(jnp.bfloat16),
                   preferred_element_type=jnp.float32) * scale
    s = s - jnp.max(s, axis=-1, keepdims=True)
    p = jnp.exp(s)
    p = p / jnp.sum(p, axis=-1, keepdims=True)

    o_h = jnp.dot(p.astype(jnp.bfloat16), v.astype(jnp.bfloat16),
                  preferred_element_type=jnp.float32)                  # (N, hd)
    acc_ref[...] += jnp.dot(o_h.astype(jnp.bfloat16), wp_ref[...],
                            preferred_element_type=jnp.float32)        # (N, C)

    @pl.when(h == pl.num_programs(1) - 1)
    def _():
        o_ref[...] = acc_ref[...].astype(o_ref.dtype)


def attn_block(x, ln_g, ln_b, wq_h, wk_h, wv_h, wp_h, bproj, num_heads):
    B, N, C = x.shape
    hd = C // num_heads
    kern = functools.partial(_attn_block_kernel, scale=hd ** -0.5)
    return pl.pallas_call(
        kern,
        out_shape=jax.ShapeDtypeStruct((B, N, C), x.dtype),
        grid=(B, num_heads),
        in_specs=[
            pl.BlockSpec((None, N, C), lambda b, h: (b, 0, 0)),
            pl.BlockSpec((1, C), lambda b, h: (0, 0)),
            pl.BlockSpec((1, C), lambda b, h: (0, 0)),
            pl.BlockSpec((None, C, hd), lambda b, h: (h, 0, 0)),
            pl.BlockSpec((None, C, hd), lambda b, h: (h, 0, 0)),
            pl.BlockSpec((None, C, hd), lambda b, h: (h, 0, 0)),
            pl.BlockSpec((None, hd, C), lambda b, h: (h, 0, 0)),
            pl.BlockSpec((1, C), lambda b, h: (0, 0)),
        ],
        out_specs=pl.BlockSpec((None, N, C), lambda b, h: (b, 0, 0)),
        scratch_shapes=[
            pltpu.VMEM((N, C), jnp.bfloat16),   # cached LayerNorm1 output
            pltpu.VMEM((N, C), jnp.float32),    # per-batch head accumulator
        ],
        compiler_params=pltpu.CompilerParams(
            dimension_semantics=("parallel", "arbitrary")),
    )(x, ln_g, ln_b, wq_h, wk_h, wv_h, wp_h, bproj)


# ----------------------------------------------------------------------------
# Kernel 3: fused token mixer, tiled over token rows:
#   x = x + LN1(x) @ W_eff + bproj            (the N==1 attention, exact)
#   x = x + Mlp(LN2(x))
# ----------------------------------------------------------------------------
def _token_mix_kernel(x_ref, g1_ref, be1_ref, weff_ref, bproj_ref,
                      g2_ref, be2_ref, w1_ref, b1_ref, w2_ref, b2_ref, o_ref):
    x = x_ref[...].astype(jnp.float32)                        # (TM, C)

    # --- length-1 attention: softmax over a single key is identically 1 ---
    mu = jnp.mean(x, axis=-1, keepdims=True)
    var = jnp.mean(jnp.square(x - mu), axis=-1, keepdims=True)
    xn1 = ((x - mu) * lax.rsqrt(var + LN_EPS)) * g1_ref[...] + be1_ref[...]
    x = x + jnp.dot(xn1.astype(jnp.bfloat16), weff_ref[...],
                    preferred_element_type=jnp.float32) + bproj_ref[...]

    # --- LayerNorm2 + MLP ---
    mu = jnp.mean(x, axis=-1, keepdims=True)
    var = jnp.mean(jnp.square(x - mu), axis=-1, keepdims=True)
    xn2 = ((x - mu) * lax.rsqrt(var + LN_EPS)) * g2_ref[...] + be2_ref[...]
    h = jnp.dot(xn2.astype(jnp.bfloat16), w1_ref[...],
                preferred_element_type=jnp.float32) + b1_ref[...]
    h = 0.5 * h * (1.0 + lax.erf(h * (1.0 / math.sqrt(2.0))))   # exact GELU
    y = jnp.dot(h.astype(jnp.bfloat16), w2_ref[...],
                preferred_element_type=jnp.float32) + b2_ref[...]
    o_ref[...] = (x + y).astype(o_ref.dtype)


def token_mix_block(x2d, params, w_eff_bf16):
    M, C = x2d.shape
    hidden = params['w1'].shape[1]
    TM = _pick_tile(M)
    bf16 = jnp.bfloat16
    return pl.pallas_call(
        _token_mix_kernel,
        out_shape=jax.ShapeDtypeStruct((M, C), x2d.dtype),
        grid=(M // TM,),
        in_specs=[
            pl.BlockSpec((TM, C), lambda i: (i, 0)),
            pl.BlockSpec((1, C), lambda i: (0, 0)),        # ln1 gamma
            pl.BlockSpec((1, C), lambda i: (0, 0)),        # ln1 beta
            pl.BlockSpec((C, C), lambda i: (0, 0)),        # W_eff = Wv @ Wproj
            pl.BlockSpec((1, C), lambda i: (0, 0)),        # proj bias
            pl.BlockSpec((1, C), lambda i: (0, 0)),        # ln2 gamma
            pl.BlockSpec((1, C), lambda i: (0, 0)),        # ln2 beta
            pl.BlockSpec((C, hidden), lambda i: (0, 0)),   # mlp W1
            pl.BlockSpec((1, hidden), lambda i: (0, 0)),   # mlp b1
            pl.BlockSpec((hidden, C), lambda i: (0, 0)),   # mlp W2
            pl.BlockSpec((1, C), lambda i: (0, 0)),        # mlp b2
        ],
        out_specs=pl.BlockSpec((TM, C), lambda i: (i, 0)),
        compiler_params=pltpu.CompilerParams(dimension_semantics=("parallel",)),
    )(x2d, params['ln1_g'], params['ln1_b'], w_eff_bf16, params['bproj'],
      params['ln2_g'], params['ln2_b'],
      params['w1'].astype(bf16), params['b1'],
      params['w2'].astype(bf16), params['b2'])


# ----------------------------------------------------------------------------
# Full forward pass (mirrors SpatioTempTransformer.forward step by step)
# ----------------------------------------------------------------------------
def spatio_temp_transformer_forward(x, params, num_heads):
    B, C, T, H, W = x.shape
    assert C % num_heads == 0, "dim must be divisible by num_heads"
    assert params['conv_w'].shape == (27, C), "conv weight must be (27, dim), tap order dt*9+dh*3+dw"
    hd = C // num_heads
    bf16 = jnp.bfloat16

    # 1) x = x + pos_embed(x): one NCDHW -> channels-last transpose feeds both the
    #    conv layout and the (B, T*H*W, C) token layout of flatten(2).transpose(1,2).
    x_cl = jnp.transpose(x, (0, 2, 3, 4, 1))                  # NCDHW -> NDHWC
    x_cl = dwconv3d_residual(x_cl, params['conv_w'], params['conv_b'])

    # 2) tokens (B, T*H*W, C)
    x1 = x_cl.reshape(B, T * H * W, C)

    # Pre-split attention weights per head (head-major columns, like the PyTorch
    # (N, heads, hd) reshape) and precompute W_eff for the length-1 attention.
    wqkv, wproj = params['wqkv'], params['wproj']
    wq_h = wqkv[:, 0 * C:1 * C].reshape(C, num_heads, hd).transpose(1, 0, 2)
    wk_h = wqkv[:, 1 * C:2 * C].reshape(C, num_heads, hd).transpose(1, 0, 2)
    wv_h = wqkv[:, 2 * C:3 * C].reshape(C, num_heads, hd).transpose(1, 0, 2)
    wp_h = wproj.reshape(num_heads, hd, C)
    w_eff = wqkv[:, 2 * C:3 * C] @ wproj                      # (C, C), fp32

    # 3) x = x + attn(norm1(x))
    x2 = attn_block(x1, params['ln1_g'], params['ln1_b'],
                    wq_h.astype(bf16), wk_h.astype(bf16), wv_h.astype(bf16),
                    wp_h.astype(bf16), params['bproj'], num_heads)

    # 4-9) chunk/[None]/cat/transpose/flatten -> (B*T*H*W, 1, C); the seq-len-1
    #      attention is exactly x + LN1(x) @ (Wv Wproj) + bproj, fused with the MLP.
    x2d = x2.reshape(B * T * H * W, C)
    y2d = token_mix_block(x2d, params, w_eff.astype(bf16))

    # 10) x.transpose(1,2).reshape(B, C, T, H, W) on a (M, 1, C) tensor is a plain
    #     row-major reshape of the (M, C) slab (verbatim PyTorch semantics).
    return y2d.reshape(B, C, T, H, W)


def init_params(key, dim, mlp_ratio=4):
    hidden = int(dim * mlp_ratio)
    ks = jax.random.split(key, 6)
    return {
        # depthwise conv: 27 taps (dt*9+dh*3+dw) per channel + bias
        'conv_w': jax.random.normal(ks[0], (27, dim), jnp.float32) * 0.1,
        'conv_b': jax.random.normal(ks[1], (1, dim), jnp.float32) * 0.02,
        # norm1 / norm2 (PyTorch LayerNorm default init)
        'ln1_g': jnp.ones((1, dim), jnp.float32),
        'ln1_b': jnp.zeros((1, dim), jnp.float32),
        'ln2_g': jnp.ones((1, dim), jnp.float32),
        'ln2_b': jnp.zeros((1, dim), jnp.float32),
        # attention (shared between both attn calls, like self.attn)
        'wqkv': jax.random.normal(ks[2], (dim, 3 * dim), jnp.float32) * 0.02,
        'wproj': jax.random.normal(ks[3], (dim, dim), jnp.float32) * 0.02,
        'bproj': jnp.zeros((1, dim), jnp.float32),
        # mlp
        'w1': jax.random.normal(ks[4], (dim, hidden), jnp.float32) * 0.02,
        'b1': jnp.zeros((1, hidden), jnp.float32),
        'w2': jax.random.normal(ks[5], (hidden, dim), jnp.float32) * 0.02,
        'b2': jnp.zeros((1, dim), jnp.float32),
    }


if __name__ == "__main__":
    # Small shapes consistent with the module: dim=32, heads=4, B=2, T=2, H=W=4
    B, C, T, H, W = 2, 32, 2, 4, 4
    num_heads = 4

    key = jax.random.PRNGKey(0)
    kx, kp = jax.random.split(key)
    x = jax.random.normal(kx, (B, C, T, H, W), jnp.float32)
    params = init_params(kp, C)

    fwd = jax.jit(functools.partial(spatio_temp_transformer_forward,
                                    num_heads=num_heads))
    out = fwd(x, params)
    jax.block_until_ready(out)
    assert out.shape == (B, C, T, H, W) and out.dtype == jnp.float32
    print("KERNEL_OK")
</pallas_src>

<mosaic_0001>
module attributes {stable_mosaic.version = 11 : i64} {
  func.func @_dwconv3d_residual_kernel(%arg0: i32, %arg1: memref<1x2x4x4x32xf32, #tpu.memory_space<vmem>>, %arg2: memref<27x32xf32, #tpu.memory_space<vmem>>, %arg3: memref<1x32xf32, #tpu.memory_space<vmem>>, %arg4: memref<1x2x4x4x32xf32, #tpu.memory_space<vmem>>, %arg5: memref<4x6x6x32xf32, #tpu.memory_space<vmem>>) attributes {dimension_semantics = [#tpu.dimension_semantics<parallel>], iteration_bounds = array<i64: 2>, scalar_prefetch = 0 : i64, scratch_operands = 1 : i64, tpu.core_type = #tpu.core_type<tc>, window_params = [{transform_indices = @transform_0, window_bounds = array<i64: 1, 2, 4, 4, 32>}, {pipeline_mode = #tpu.pipeline_mode<synchronous>, transform_indices = @transform_1, window_bounds = array<i64: 27, 32>}, {pipeline_mode = #tpu.pipeline_mode<synchronous>, transform_indices = @transform_2, window_bounds = array<i64: 1, 32>}, {transform_indices = @transform_3, window_bounds = array<i64: 1, 2, 4, 4, 32>}]} {
    %c0 = arith.constant 0 : index
    %c0_0 = arith.constant 0 : index
    %c0_1 = arith.constant 0 : index
    %c0_2 = arith.constant 0 : index
    %c0_3 = arith.constant 0 : index
    %0 = vector.load %arg1[%c0, %c0_0, %c0_1, %c0_2, %c0_3] : memref<1x2x4x4x32xf32, #tpu.memory_space<vmem>>, vector<1x2x4x4x32xf32>
    %1 = vector.shape_cast %0 : vector<1x2x4x4x32xf32> to vector<2x4x4x32xf32>
    %cst = arith.constant 0.000000e+00 : f32
    %2 = vector.broadcast %cst : f32 to vector<4x6x6x32xf32>
    %c0_4 = arith.constant 0 : index
    %c0_5 = arith.constant 0 : index
    %c0_6 = arith.constant 0 : index
    %c0_7 = arith.constant 0 : index
    %3 = vector.load %arg5[%c0_4, %c0_5, %c0_6, %c0_7] : memref<4x6x6x32xf32, #tpu.memory_space<vmem>>, vector<4x6x6x32xf32>
    tpu.vector_store %arg5[%c0_4, %c0_5, %c0_6, %c0_7], %2 {strides = array<i32>} : memref<4x6x6x32xf32, #tpu.memory_space<vmem>>, vector<4x6x6x32xf32>,
    %c1 = arith.constant 1 : index
    %c1_8 = arith.constant 1 : index
    %c1_9 = arith.constant 1 : index
    %c0_10 = arith.constant 0 : index
    %4 = vector.load %arg5[%c1, %c1_8, %c1_9, %c0_10] : memref<4x6x6x32xf32, #tpu.memory_space<vmem>>, vector<2x4x4x32xf32>
    tpu.vector_store %arg5[%c1, %c1_8, %c1_9, %c0_10], %1 {strides = array<i32>} : memref<4x6x6x32xf32, #tpu.memory_space<vmem>>, vector<2x4x4x32xf32>,
    %c0_11 = arith.constant 0 : index
    %c0_12 = arith.constant 0 : index
    %5 = vector.load %arg3[%c0_11, %c0_12] : memref<1x32xf32, #tpu.memory_space<vmem>>, vector<1x32xf32>
    %6 = vector.shape_cast %5 : vector<1x32xf32> to vector<1x1x1x32xf32>
    %7 = vector.broadcast %6 : vector<1x1x1x32xf32> to vector<2x4x4x32xf32>
    %8 = arith.addf %1, %7 : vector<2x4x4x32xf32>
    %c0_13 = arith.constant 0 : index
    %c0_14 = arith.constant 0 : index
    %c0_15 = arith.constant 0 : index
    %c0_16 = arith.constant 0 : index
    %9 = vector.load %arg5[%c0_13, %c0_14, %c0_15, %c0_16] : memref<4x6x6x32xf32, #tpu.memory_space<vmem>>, vector<2x4x4x32xf32>
    %c0_17 = arith.constant 0 : index
    %c0_18 = arith.constant 0 : index
    %10 = vector.load %arg2[%c0_17, %c0_18] : memref<27x32xf32, #tpu.memory_space<vmem>>, vector<1x32xf32>
    %11 = vector.shape_cast %10 : vector<1x32xf32> to vector<1x1x1x32xf32>
    %12 = vector.broadcast %11 : vector<1x1x1x32xf32> to vector<2x4x4x32xf32>
    %13 = arith.mulf %9, %12 : vector<2x4x4x32xf32>
    %14 = arith.addf %8, %13 : vector<2x4x4x32xf32>
    %c0_19 = arith.constant 0 : index
    %c0_20 = arith.constant 0 : index
    %c1_21 = arith.constant 1 : index
    %c0_22 = arith.constant 0 : index
    %15 = vector.load %arg5[%c0_19, %c0_20, %c1_21, %c0_22] : memref<4x6x6x32xf32, #tpu.memory_space<vmem>>, vector<2x4x4x32xf32>
    %c1_23 = arith.constant 1 : index
    %c0_24 = arith.constant 0 : index
    %16 = vector.load %arg2[%c1_23, %c0_24] : memref<27x32xf32, #tpu.memory_space<vmem>>, vector<1x32xf32>
    %17 = vector.shape_cast %16 : vector<1x32xf32> to vector<1x1x1x32xf32>
    %18 = vector.broadcast %17 : vector<1x1x1x32xf32> to vector<2x4x4x32xf32>
    %19 = arith.mulf %15, %18 : vector<2x4x4x32xf32>
    %20 = arith.addf %14, %19 : vector<2x4x4x32xf32>
    %c0_25 = arith.constant 0 : index
    %c0_26 = arith.constant 0 : index
    %c2 = arith.constant 2 : index
    %c0_27 = arith.constant 0 : index
    %21 = vector.load %arg5[%c0_25, %c0_26, %c2, %c0_27] : memref<4x6x6x32xf32, #tpu.memory_space<vmem>>, vector<2x4x4x32xf32>
    %c2_28 = arith.constant 2 : index
    %c0_29 = arith.constant 0 : index
    %22 = vector.load %arg2[%c2_28, %c0_29] : memref<27x32xf32, #tpu.memory_space<vmem>>, vector<1x32xf32>
    %23 = vector.shape_cast %22 : vector<1x32xf32> to vector<1x1x1x32xf32>
    %24 = vector.broadcast %23 : vector<1x1x1x32xf32> to vector<2x4x4x32xf32>
    %25 = arith.mulf %21, %24 : vector<2x4x4x32xf32>
    %26 = arith.addf %20, %25 : vector<2x4x4x32xf32>
    %c0_30 = arith.constant 0 : index
    %c1_31 = arith.constant 1 : index
    %c0_32 = arith.constant 0 : index
    %c0_33 = arith.constant 0 : index
    %27 = vector.load %arg5[%c0_30, %c1_31, %c0_32, %c0_33] : memref<4x6x6x32xf32, #tpu.memory_space<vmem>>, vector<2x4x4x32xf32>
    %c3 = arith.constant 3 : index
    %c0_34 = arith.constant 0 : index
    %28 = vector.load %arg2[%c3, %c0_34] : memref<27x32xf32, #tpu.memory_space<vmem>>, vector<1x32xf32>
    %29 = vector.shape_cast %28 : vector<1x32xf32> to vector<1x1x1x32xf32>
    %30 = vector.broadcast %29 : vector<1x1x1x32xf32> to vector<2x4x4x32xf32>
    %31 = arith.mulf %27, %30 : vector<2x4x4x32xf32>
    %32 = arith.addf %26, %31 : vector<2x4x4x32xf32>
    %c0_35 = arith.constant 0 : index
    %c1_36 = arith.constant 1 : index
    %c1_37 = arith.constant 1 : index
    %c0_38 = arith.constant 0 : index
    %33 = vector.load %arg5[%c0_35, %c1_36, %c1_37, %c0_38] : memref<4x6x6x32xf32, #tpu.memory_space<vmem>>, vector<2x4x4x32xf32>
    %c4 = arith.constant 4 : index
    %c0_39 = arith.constant 0 : index
    %34 = vector.load %arg2[%c4, %c0_39] : memref<27x32xf32, #tpu.memory_space<vmem>>, vector<1x32xf32>
    %35 = vector.shape_cast %34 : vector<1x32xf32> to vector<1x1x1x32xf32>
    %36 = vector.broadcast %35 : vector<1x1x1x32xf32> to vector<2x4x4x32xf32>
    %37 = arith.mulf %33, %36 : vector<2x4x4x32xf32>
    %38 = arith.addf %32, %37 : vector<2x4x4x32xf32>
    %c0_40 = arith.constant 0 : index
    %c1_41 = arith.constant 1 : index
    %c2_42 = arith.constant 2 : index
    %c0_43 = arith.constant 0 : index
    %39 = vector.load %arg5[%c0_40, %c1_41, %c2_42, %c0_43] : memref<4x6x6x32xf32, #tpu.memory_space<vmem>>, vector<2x4x4x32xf32>
    %c5 = arith.constant 5 : index
    %c0_44 = arith.constant 0 : index
    %40 = vector.load %arg2[%c5, %c0_44] : memref<27x32xf32, #tpu.memory_space<vmem>>, vector<1x32xf32>
    %41 = vector.shape_cast %40 : vector<1x32xf32> to vector<1x1x1x32xf32>
    %42 = vector.broadcast %41 : vector<1x1x1x32xf32> to vector<2x4x4x32xf32>
    %43 = arith.mulf %39, %42 : vector<2x4x4x32xf32>
    %44 = arith.addf %38, %43 : vector<2x4x4x32xf32>
    %c0_45 = arith.constant 0 : index
    %c2_46 = arith.constant 2 : index
    %c0_47 = arith.constant 0 : index
    %c0_48 = arith.constant 0 : index
    %45 = vector.load %arg5[%c0_45, %c2_46, %c0_47, %c0_48] : memref<4x6x6x32xf32, #tpu.memory_space<vmem>>, vector<2x4x4x32xf32>
    %c6 = arith.constant 6 : index
    %c0_49 = arith.constant 0 : index
    %46 = vector.load %arg2[%c6, %c0_49] : memref<27x32xf32, #tpu.memory_space<vmem>>, vector<1x32xf32>
    %47 = vector.shape_cast %46 : vector<1x32xf32> to vector<1x1x1x32xf32>
    %48 = vector.broadcast %47 : vector<1x1x1x32xf32> to vector<2x4x4x32xf32>
    %49 = arith.mulf %45, %48 : vector<2x4x4x32xf32>
    %50 = arith.addf %44, %49 : vector<2x4x4x32xf32>
    %c0_50 = arith.constant 0 : index
    %c2_51 = arith.constant 2 : index
    %c1_52 = arith.constant 1 : index
    %c0_53 = arith.constant 0 : index
    %51 = vector.load %arg5[%c0_50, %c2_51, %c1_52, %c0_53] : memref<4x6x6x32xf32, #tpu.memory_space<vmem>>, vector<2x4x4x32xf32>
    %c7 = arith.constant 7 : index
    %c0_54 = arith.constant 0 : index
    %52 = vector.load %arg2[%c7, %c0_54] : memref<27x32xf32, #tpu.memory_space<vmem>>, vector<1x32xf32>
    %53 = vector.shape_cast %52 : vector<1x32xf32> to vector<1x1x1x32xf32>
    %54 = vector.broadcast %53 : vector<1x1x1x32xf32> to vector<2x4x4x32xf32>
    %55 = arith.mulf %51, %54 : vector<2x4x4x32xf32>
    %56 = arith.addf %50, %55 : vector<2x4x4x32xf32>
    %c0_55 = arith.constant 0 : index
    %c2_56 = arith.constant 2 : index
    %c2_57 = arith.constant 2 : index
    %c0_58 = arith.constant 0 : index
    %57 = vector.load %arg5[%c0_55, %c2_56, %c2_57, %c0_58] : memref<4x6x6x32xf32, #tpu.memory_space<vmem>>, vector<2x4x4x32xf32>
    %c8 = arith.constant 8 : index
    %c0_59 = arith.constant 0 : index
    %58 = vector.load %arg2[%c8, %c0_59] : memref<27x32xf32, #tpu.memory_space<vmem>>, vector<1x32xf32>
    %59 = vector.shape_cast %58 : vector<1x32xf32> to vector<1x1x1x32xf32>
    %60 = vector.broadcast %59 : vector<1x1x1x32xf32> to vector<2x4x4x32xf32>
    %61 = arith.mulf %57, %60 : vector<2x4x4x32xf32>
    %62 = arith.addf %56, %61 : vector<2x4x4x32xf32>
    %c1_60 = arith.constant 1 : index
    %c0_61 = arith.constant 0 : index
    %c0_62 = arith.constant 0 : index
    %c0_63 = arith.constant 0 : index
    %63 = vector.load %arg5[%c1_60, %c0_61, %c0_62, %c0_63] : memref<4x6x6x32xf32, #tpu.memory_space<vmem>>, vector<2x4x4x32xf32>
    %c9 = arith.constant 9 : index
    %c0_64 = arith.constant 0 : index
    %64 = vector.load %arg2[%c9, %c0_64] : memref<27x32xf32, #tpu.memory_space<vmem>>, vector<1x32xf32>
    %65 = vector.shape_cast %64 : vector<1x32xf32> to vector<1x1x1x32xf32>
    %66 = vector.broadcast %65 : vector<1x1x1x32xf32> to vector<2x4x4x32xf32>
    %67 = arith.mulf %63, %66 : vector<2x4x4x32xf32>
    %68 = arith.addf %62, %67 : vector<2x4x4x32xf32>
    %c1_65 = arith.constant 1 : index
    %c0_66 = arith.constant 0 : index
    %c1_67 = arith.constant 1 : index
    %c0_68 = arith.constant 0 : index
    %69 = vector.load %arg5[%c1_65, %c0_66, %c1_67, %c0_68] : memref<4x6x6x32xf32, #tpu.memory_space<vmem>>, vector<2x4x4x32xf32>
    %c10 = arith.constant 10 : index
    %c0_69 = arith.constant 0 : index
    %70 = vector.load %arg2[%c10, %c0_69] : memref<27x32xf32, #tpu.memory_space<vmem>>, vector<1x32xf32>
    %71 = vector.shape_cast %70 : vector<1x32xf32> to vector<1x1x1x32xf32>
    %72 = vector.broadcast %71 : vector<1x1x1x32xf32> to vector<2x4x4x32xf32>
    %73 = arith.mulf %69, %72 : vector<2x4x4x32xf32>
    %74 = arith.addf %68, %73 : vector<2x4x4x32xf32>
    %c1_70 = arith.constant 1 : index
    %c0_71 = arith.constant 0 : index
    %c2_72 = arith.constant 2 : index
    %c0_73 = arith.constant 0 : index
    %75 = vector.load %arg5[%c1_70, %c0_71, %c2_72, %c0_73] : memref<4x6x6x32xf32, #tpu.memory_space<vmem>>, vector<2x4x4x32xf32>
    %c11 = arith.constant 11 : index
    %c0_74 = arith.constant 0 : index
    %76 = vector.load %arg2[%c11, %c0_74] : memref<27x32xf32, #tpu.memory_space<vmem>>, vector<1x32xf32>
    %77 = vector.shape_cast %76 : vector<1x32xf32> to vector<1x1x1x32xf32>
    %78 = vector.broadcast %77 : vector<1x1x1x32xf32> to vector<2x4x4x32xf32>
    %79 = arith.mulf %75, %78 : vector<2x4x4x32xf32>
    %80 = arith.addf %74, %79 : vector<2x4x4x32xf32>
    %c1_75 = arith.constant 1 : index
    %c1_76 = arith.constant 1 : index
    %c0_77 = arith.constant 0 : index
    %c0_78 = arith.constant 0 : index
    %81 = vector.load %arg5[%c1_75, %c1_76, %c0_77, %c0_78] : memref<4x6x6x32xf32, #tpu.memory_space<vmem>>, vector<2x4x4x32xf32>
    %c12 = arith.constant 12 : index
    %c0_79 = arith.constant 0 : index
    %82 = vector.load %arg2[%c12, %c0_79] : memref<27x32xf32, #tpu.memory_space<vmem>>, vector<1x32xf32>
    %83 = vector.shape_cast %82 : vector<1x32xf32> to vector<1x1x1x32xf32>
    %84 = vector.broadcast %83 : vector<1x1x1x32xf32> to vector<2x4x4x32xf32>
    %85 = arith.mulf %81, %84 : vector<2x4x4x32xf32>
    %86 = arith.addf %80, %85 : vector<2x4x4x32xf32>
    %c1_80 = arith.constant 1 : index
    %c1_81 = arith.constant 1 : index
    %c1_82 = arith.constant 1 : index
    %c0_83 = arith.constant 0 : index
    %87 = vector.load %arg5[%c1_80, %c1_81, %c1_82, %c0_83] : memref<4x6x6x32xf32, #tpu.memory_space<vmem>>, vector<2x4x4x32xf32>
    %c13 = arith.constant 13 : index
    %c0_84 = arith.constant 0 : index
    %88 = vector.load %arg2[%c13, %c0_84] : memref<27x32xf32, #tpu.memory_space<vmem>>, vector<1x32xf32>
    %89 = vector.shape_cast %88 : vector<1x32xf32> to vector<1x1x1x32xf32>
    %90 = vector.broadcast %89 : vector<1x1x1x32xf32> to vector<2x4x4x32xf32>
    %91 = arith.mulf %87, %90 : vector<2x4x4x32xf32>
    %92 = arith.addf %86, %91 : vector<2x4x4x32xf32>
    %c1_85 = arith.constant 1 : index
    %c1_86 = arith.constant 1 : index
    %c2_87 = arith.constant 2 : index
    %c0_88 = arith.constant 0 : index
    %93 = vector.load %arg5[%c1_85, %c1_86, %c2_87, %c0_88] : memref<4x6x6x32xf32, #tpu.memory_space<vmem>>, vector<2x4x4x32xf32>
    %c14 = arith.constant 14 : index
    %c0_89 = arith.constant 0 : index
    %94 = vector.load %arg2[%c14, %c0_89] : memref<27x32xf32, #tpu.memory_space<vmem>>, vector<1x32xf32>
    %95 = vector.shape_cast %94 : vector<1x32xf32> to vector<1x1x1x32xf32>
    %96 = vector.broadcast %95 : vector<1x1x1x32xf32> to vector<2x4x4x32xf32>
    %97 = arith.mulf %93, %96 : vector<2x4x4x32xf32>
    %98 = arith.addf %92, %97 : vector<2x4x4x32xf32>
    %c1_90 = arith.constant 1 : index
    %c2_91 = arith.constant 2 : index
    %c0_92 = arith.constant 0 : index
    %c0_93 = arith.constant 0 : index
    %99 = vector.load %arg5[%c1_90, %c2_91, %c0_92, %c0_93] : memref<4x6x6x32xf32, #tpu.memory_space<vmem>>, vector<2x4x4x32xf32>
    %c15 = arith.constant 15 : index
    %c0_94 = arith.constant 0 : index
    %100 = vector.load %arg2[%c15, %c0_94] : memref<27x32xf32, #tpu.memory_space<vmem>>, vector<1x32xf32>
    %101 = vector.shape_cast %100 : vector<1x32xf32> to vector<1x1x1x32xf32>
    %102 = vector.broadcast %101 : vector<1x1x1x32xf32> to vector<2x4x4x32xf32>
    %103 = arith.mulf %99, %102 : vector<2x4x4x32xf32>
    %104 = arith.addf %98, %103 : vector<2x4x4x32xf32>
    %c1_95 = arith.constant 1 : index
    %c2_96 = arith.constant 2 : index
    %c1_97 = arith.constant 1 : index
    %c0_98 = arith.constant 0 : index
    %105 = vector.load %arg5[%c1_95, %c2_96, %c1_97, %c0_98] : memref<4x6x6x32xf32, #tpu.memory_space<vmem>>, vector<2x4x4x32xf32>
    %c16 = arith.constant 16 : index
    %c0_99 = arith.constant 0 : index
    %106 = vector.load %arg2[%c16, %c0_99] : memref<27x32xf32, #tpu.memory_space<vmem>>, vector<1x32xf32>
    %107 = vector.shape_cast %106 : vector<1x32xf32> to vector<1x1x1x32xf32>
    %108 = vector.broadcast %107 : vector<1x1x1x32xf32> to vector<2x4x4x32xf32>
    %109 = arith.mulf %105, %108 : vector<2x4x4x32xf32>
    %110 = arith.addf %104, %109 : vector<2x4x4x32xf32>
    %c1_100 = arith.constant 1 : index
    %c2_101 = arith.constant 2 : index
    %c2_102 = arith.constant 2 : index
    %c0_103 = arith.constant 0 : index
    %111 = vector.load %arg5[%c1_100, %c2_101, %c2_102, %c0_103] : memref<4x6x6x32xf32, #tpu.memory_space<vmem>>, vector<2x4x4x32xf32>
    %c17 = arith.constant 17 : index
    %c0_104 = arith.constant 0 : index
    %112 = vector.load %arg2[%c17, %c0_104] : memref<27x32xf32, #tpu.memory_space<vmem>>, vector<1x32xf32>
    %113 = vector.shape_cast %112 : vector<1x32xf32> to vector<1x1x1x32xf32>
    %114 = vector.broadcast %113 : vector<1x1x1x32xf32> to vector<2x4x4x32xf32>
    %115 = arith.mulf %111, %114 : vector<2x4x4x32xf32>
    %116 = arith.addf %110, %115 : vector<2x4x4x32xf32>
    %c2_105 = arith.constant 2 : index
    %c0_106 = arith.constant 0 : index
    %c0_107 = arith.constant 0 : index
    %c0_108 = arith.constant 0 : index
    %117 = vector.load %arg5[%c2_105, %c0_106, %c0_107, %c0_108] : memref<4x6x6x32xf32, #tpu.memory_space<vmem>>, vector<2x4x4x32xf32>
    %c18 = arith.constant 18 : index
    %c0_109 = arith.constant 0 : index
    %118 = vector.load %arg2[%c18, %c0_109] : memref<27x32xf32, #tpu.memory_space<vmem>>, vector<1x32xf32>
    %119 = vector.shape_cast %118 : vector<1x32xf32> to vector<1x1x1x32xf32>
    %120 = vector.broadcast %119 : vector<1x1x1x32xf32> to vector<2x4x4x32xf32>
    %121 = arith.mulf %117, %120 : vector<2x4x4x32xf32>
    %122 = arith.addf %116, %121 : vector<2x4x4x32xf32>
    %c2_110 = arith.constant 2 : index
    %c0_111 = arith.constant 0 : index
    %c1_112 = arith.constant 1 : index
    %c0_113 = arith.constant 0 : index
    %123 = vector.load %arg5[%c2_110, %c0_111, %c1_112, %c0_113] : memref<4x6x6x32xf32, #tpu.memory_space<vmem>>, vector<2x4x4x32xf32>
    %c19 = arith.constant 19 : index
    %c0_114 = arith.constant 0 : index
    %124 = vector.load %arg2[%c19, %c0_114] : memref<27x32xf32, #tpu.memory_space<vmem>>, vector<1x32xf32>
    %125 = vector.shape_cast %124 : vector<1x32xf32> to vector<1x1x1x32xf32>
    %126 = vector.broadcast %125 : vector<1x1x1x32xf32> to vector<2x4x4x32xf32>
    %127 = arith.mulf %123, %126 : vector<2x4x4x32xf32>
    %128 = arith.addf %122, %127 : vector<2x4x4x32xf32>
    %c2_115 = arith.constant 2 : index
    %c0_116 = arith.constant 0 : index
    %c2_117 = arith.constant 2 : index
    %c0_118 = arith.constant 0 : index
    %129 = vector.load %arg5[%c2_115, %c0_116, %c2_117, %c0_118] : memref<4x6x6x32xf32, #tpu.memory_space<vmem>>, vector<2x4x4x32xf32>
    %c20 = arith.constant 20 : index
    %c0_119 = arith.constant 0 : index
    %130 = vector.load %arg2[%c20, %c0_119] : memref<27x32xf32, #tpu.memory_space<vmem>>, vector<1x32xf32>
    %131 = vector.shape_cast %130 : vector<1x32xf32> to vector<1x1x1x32xf32>
    %132 = vector.broadcast %131 : vector<1x1x1x32xf32> to vector<2x4x4x32xf32>
    %133 = arith.mulf %129, %132 : vector<2x4x4x32xf32>
    %134 = arith.addf %128, %133 : vector<2x4x4x32xf32>
    %c2_120 = arith.constant 2 : index
    %c1_121 = arith.constant 1 : index
    %c0_122 = arith.constant 0 : index
    %c0_123 = arith.constant 0 : index
    %135 = vector.load %arg5[%c2_120, %c1_121, %c0_122, %c0_123] : memref<4x6x6x32xf32, #tpu.memory_space<vmem>>, vector<2x4x4x32xf32>
    %c21 = arith.constant 21 : index
    %c0_124 = arith.constant 0 : index
    %136 = vector.load %arg2[%c21, %c0_124] : memref<27x32xf32, #tpu.memory_space<vmem>>, vector<1x32xf32>
    %137 = vector.shape_cast %136 : vector<1x32xf32> to vector<1x1x1x32xf32>
    %138 = vector.broadcast %137 : vector<1x1x1x32xf32> to vector<2x4x4x32xf32>
    %139 = arith.mulf %135, %138 : vector<2x4x4x32xf32>
    %140 = arith.addf %134, %139 : vector<2x4x4x32xf32>
    %c2_125 = arith.constant 2 : index
    %c1_126 = arith.constant 1 : index
    %c1_127 = arith.constant 1 : index
    %c0_128 = arith.constant 0 : index
    %141 = vector.load %arg5[%c2_125, %c1_126, %c1_127, %c0_128] : memref<4x6x6x32xf32, #tpu.memory_space<vmem>>, vector<2x4x4x32xf32>
    %c22 = arith.constant 22 : index
    %c0_129 = arith.constant 0 : index
    %142 = vector.load %arg2[%c22, %c0_129] : memref<27x32xf32, #tpu.memory_space<vmem>>, vector<1x32xf32>
    %143 = vector.shape_cast %142 : vector<1x32xf32> to vector<1x1x1x32xf32>
    %144 = vector.broadcast %143 : vector<1x1x1x32xf32> to vector<2x4x4x32xf32>
    %145 = arith.mulf %141, %144 : vector<2x4x4x32xf32>
    %146 = arith.addf %140, %145 : vector<2x4x4x32xf32>
    %c2_130 = arith.constant 2 : index
    %c1_131 = arith.constant 1 : index
    %c2_132 = arith.constant 2 : index
    %c0_133 = arith.constant 0 : index
    %147 = vector.load %arg5[%c2_130, %c1_131, %c2_132, %c0_133] : memref<4x6x6x32xf32, #tpu.memory_space<vmem>>, vector<2x4x4x32xf32>
    %c23 = arith.constant 23 : index
    %c0_134 = arith.constant 0 : index
    %148 = vector.load %arg2[%c23, %c0_134] : memref<27x32xf32, #tpu.memory_space<vmem>>, vector<1x32xf32>
    %149 = vector.shape_cast %148 : vector<1x32xf32> to vector<1x1x1x32xf32>
    %150 = vector.broadcast %149 : vector<1x1x1x32xf32> to vector<2x4x4x32xf32>
    %151 = arith.mulf %147, %150 : vector<2x4x4x32xf32>
    %152 = arith.addf %146, %151 : vector<2x4x4x32xf32>
    %c2_135 = arith.constant 2 : index
    %c2_136 = arith.constant 2 : index
    %c0_137 = arith.constant 0 : index
    %c0_138 = arith.constant 0 : index
    %153 = vector.load %arg5[%c2_135, %c2_136, %c0_137, %c0_138] : memref<4x6x6x32xf32, #tpu.memory_space<vmem>>, vector<2x4x4x32xf32>
    %c24 = arith.constant 24 : index
    %c0_139 = arith.constant 0 : index
    %154 = vector.load %arg2[%c24, %c0_139] : memref<27x32xf32, #tpu.memory_space<vmem>>, vector<1x32xf32>
    %155 = vector.shape_cast %154 : vector<1x32xf32> to vector<1x1x1x32xf32>
    %156 = vector.broadcast %155 : vector<1x1x1x32xf32> to vector<2x4x4x32xf32>
    %157 = arith.mulf %153, %156 : vector<2x4x4x32xf32>
    %158 = arith.addf %152, %157 : vector<2x4x4x32xf32>
    %c2_140 = arith.constant 2 : index
    %c2_141 = arith.constant 2 : index
    %c1_142 = arith.constant 1 : index
    %c0_143 = arith.constant 0 : index
    %159 = vector.load %arg5[%c2_140, %c2_141, %c1_142, %c0_143] : memref<4x6x6x32xf32, #tpu.memory_space<vmem>>, vector<2x4x4x32xf32>
    %c25 = arith.constant 25 : index
    %c0_144 = arith.constant 0 : index
    %160 = vector.load %arg2[%c25, %c0_144] : memref<27x32xf32, #tpu.memory_space<vmem>>, vector<1x32xf32>
    %161 = vector.shape_cast %160 : vector<1x32xf32> to vector<1x1x1x32xf32>
    %162 = vector.broadcast %161 : vector<1x1x1x32xf32> to vector<2x4x4x32xf32>
    %163 = arith.mulf %159, %162 : vector<2x4x4x32xf32>
    %164 = arith.addf %158, %163 : vector<2x4x4x32xf32>
    %c2_145 = arith.constant 2 : index
    %c2_146 = arith.constant 2 : index
    %c2_147 = arith.constant 2 : index
    %c0_148 = arith.constant 0 : index
    %165 = vector.load %arg5[%c2_145, %c2_146, %c2_147, %c0_148] : memref<4x6x6x32xf32, #tpu.memory_space<vmem>>, vector<2x4x4x32xf32>
    %c26 = arith.constant 26 : index
    %c0_149 = arith.constant 0 : index
    %166 = vector.load %arg2[%c26, %c0_149] : memref<27x32xf32, #tpu.memory_space<vmem>>, vector<1x32xf32>
    %167 = vector.shape_cast %166 : vector<1x32xf32> to vector<1x1x1x32xf32>
    %168 = vector.broadcast %167 : vector<1x1x1x32xf32> to vector<2x4x4x32xf32>
    %169 = arith.mulf %165, %168 : vector<2x4x4x32xf32>
    %170 = arith.addf %164, %169 : vector<2x4x4x32xf32>
    %c0_150 = arith.constant 0 : index
    %c0_151 = arith.constant 0 : index
    %c0_152 = arith.constant 0 : index
    %c0_153 = arith.constant 0 : index
    %c0_154 = arith.constant 0 : index
    %171 = vector.load %arg4[%c0_150, %c0_151, %c0_152, %c0_153, %c0_154] : memref<1x2x4x4x32xf32, #tpu.memory_space<vmem>>, vector<1x2x4x4x32xf32>
    %172 = vector.shape_cast %171 : vector<1x2x4x4x32xf32> to vector<2x4x4x32xf32>
    %173 = vector.shape_cast %170 : vector<2x4x4x32xf32> to vector<1x2x4x4x32xf32>
    tpu.vector_store %arg4[%c0_150, %c0_151, %c0_152, %c0_153, %c0_154], %173 {strides = array<i32>} : memref<1x2x4x4x32xf32, #tpu.memory_space<vmem>>, vector<1x2x4x4x32xf32>,
    return
  }
  func.func @transform_0(%arg0: i32) -> (i32, i32, i32, i32, i32) {
    %c0_i32 = arith.constant 0 : i32
    %c0_i32_0 = arith.constant 0 : i32
    %c0_i32_1 = arith.constant 0 : i32
    %c0_i32_2 = arith.constant 0 : i32
    %c0_i32_3 = arith.constant 0 : i32
    return %arg0, %c0_i32, %c0_i32_0, %c0_i32_1, %c0_i32_2 : i32, i32, i32, i32, i32
  }
  func.func @transform_1(%arg0: i32) -> (i32, i32) {
    %c0_i32 = arith.constant 0 : i32
    %c0_i32_0 = arith.constant 0 : i32
    %c0_i32_1 = arith.constant 0 : i32
    return %c0_i32, %c0_i32_0 : i32, i32
  }
  func.func @transform_2(%arg0: i32) -> (i32, i32) {
    %c0_i32 = arith.constant 0 : i32
    %c0_i32_0 = arith.constant 0 : i32
    %c0_i32_1 = arith.constant 0 : i32
    return %c0_i32, %c0_i32_0 : i32, i32
  }
  func.func @transform_3(%arg0: i32) -> (i32, i32, i32, i32, i32) {
    %c0_i32 = arith.constant 0 : i32
    %c0_i32_0 = arith.constant 0 : i32
    %c0_i32_1 = arith.constant 0 : i32
    %c0_i32_2 = arith.constant 0 : i32
    %c0_i32_3 = arith.constant 0 : i32
    return %arg0, %c0_i32, %c0_i32_0, %c0_i32_1, %c0_i32_2 : i32, i32, i32, i32, i32
  }
}

module attributes {stable_mosaic.version = 11 : i64} {
  func.func @_attn_block_kernel(%arg0: i32, %arg1: i32, %arg2: memref<1x32x32xf32, #tpu.memory_space<vmem>>, %arg3: memref<1x32xf32, #tpu.memory_space<vmem>>, %arg4: memref<1x32xf32, #tpu.memory_space<vmem>>, %arg5: memref<1x32x8xbf16, #tpu.memory_space<vmem>>, %arg6: memref<1x32x8xbf16, #tpu.memory_space<vmem>>, %arg7: memref<1x32x8xbf16, #tpu.memory_space<vmem>>, %arg8: memref<1x8x32xbf16, #tpu.memory_space<vmem>>, %arg9: memref<1x32xf32, #tpu.memory_space<vmem>>, %arg10: memref<1x32x32xf32, #tpu.memory_space<vmem>>, %arg11: memref<32x32xbf16, #tpu.memory_space<vmem>>, %arg12: memref<32x32xf32, #tpu.memory_space<vmem>>) attributes {dimension_semantics = [#tpu.dimension_semantics<parallel>, #tpu.dimension_semantics<arbitrary>], iteration_bounds = array<i64: 2, 4>, scalar_prefetch = 0 : i64, scratch_operands = 2 : i64, tpu.core_type = #tpu.core_type<tc>, window_params = [{transform_indices = @transform_0, window_bounds = array<i64: 1, 32, 32>}, {pipeline_mode = #tpu.pipeline_mode<synchronous>, transform_indices = @transform_1, window_bounds = array<i64: 1, 32>}, {pipeline_mode = #tpu.pipeline_mode<synchronous>, transform_indices = @transform_2, window_bounds = array<i64: 1, 32>}, {transform_indices = @transform_3, window_bounds = array<i64: 1, 32, 8>}, {transform_indices = @transform_4, window_bounds = array<i64: 1, 32, 8>}, {transform_indices = @transform_5, window_bounds = array<i64: 1, 32, 8>}, {transform_indices = @transform_6, window_bounds = array<i64: 1, 8, 32>}, {pipeline_mode = #tpu.pipeline_mode<synchronous>, transform_indices = @transform_7, window_bounds = array<i64: 1, 32>}, {transform_indices = @transform_8, window_bounds = array<i64: 1, 32, 32>}]} {
    %c0_i32 = arith.constant 0 : i32
    %0 = arith.cmpi eq, %arg1, %c0_i32 : i32
    %1 = arith.extui %0 : i1 to i32
    %c0_i32_0 = arith.constant 0 : i32
    %2 = arith.cmpi ne, %1, %c0_i32_0 : i32
    scf.if %2 {
      %c0_27 = arith.constant 0 : index
      %c0_28 = arith.constant 0 : index
      %c0_29 = arith.constant 0 : index
      %40 = vector.load %arg2[%c0_27, %c0_28, %c0_29] : memref<1x32x32xf32, #tpu.memory_space<vmem>>, vector<1x32x32xf32>
      %41 = vector.shape_cast %40 : vector<1x32x32xf32> to vector<32x32xf32>
      %cst_30 = arith.constant dense<0.000000e+00> : vector<32xf32>
      %42 = vector.multi_reduction <add>, %41, %cst_30 [1] : vector<32x32xf32> to vector<32xf32>
      %43 = vector.shape_cast %42 : vector<32xf32> to vector<32x1xf32>
      %cst_31 = arith.constant 3.200000e+01 : f32
      %44 = vector.broadcast %cst_31 : f32 to vector<32x1xf32>
      %45 = arith.divf %43, %44 : vector<32x1xf32>
      %46 = vector.broadcast %45 : vector<32x1xf32> to vector<32x32xf32>
      %47 = arith.subf %41, %46 : vector<32x32xf32>
      %48 = arith.mulf %47, %47 : vector<32x32xf32>
      %cst_32 = arith.constant dense<0.000000e+00> : vector<32xf32>
      %49 = vector.multi_reduction <add>, %48, %cst_32 [1] : vector<32x32xf32> to vector<32xf32>
      %50 = vector.shape_cast %49 : vector<32xf32> to vector<32x1xf32>
      %cst_33 = arith.constant 3.200000e+01 : f32
      %51 = vector.broadcast %cst_33 : f32 to vector<32x1xf32>
      %52 = arith.divf %50, %51 : vector<32x1xf32>
      %53 = vector.broadcast %45 : vector<32x1xf32> to vector<32x32xf32>
      %54 = arith.subf %41, %53 : vector<32x32xf32>
      %cst_34 = arith.constant 9.99999974E-6 : f32
      %55 = vector.broadcast %cst_34 : f32 to vector<32x1xf32>
      %56 = arith.addf %52, %55 : vector<32x1xf32>
      %57 = math.rsqrt %56 : vector<32x1xf32>
      %58 = vector.broadcast %57 : vector<32x1xf32> to vector<32x32xf32>
      %59 = arith.mulf %54, %58 : vector<32x32xf32>
      %c0_35 = arith.constant 0 : index
      %c0_36 = arith.constant 0 : index
      %60 = vector.load %arg3[%c0_35, %c0_36] : memref<1x32xf32, #tpu.memory_space<vmem>>, vector<1x32xf32>
      %61 = vector.broadcast %60 : vector<1x32xf32> to vector<32x32xf32>
      %62 = arith.mulf %59, %61 : vector<32x32xf32>
      %c0_37 = arith.constant 0 : index
      %c0_38 = arith.constant 0 : index
      %63 = vector.load %arg4[%c0_37, %c0_38] : memref<1x32xf32, #tpu.memory_space<vmem>>, vector<1x32xf32>
      %64 = vector.broadcast %63 : vector<1x32xf32> to vector<32x32xf32>
      %65 = arith.addf %62, %64 : vector<32x32xf32>
      %66 = arith.truncf %65 : vector<32x32xf32> to vector<32x32xbf16>
      %c0_39 = arith.constant 0 : index
      %c0_40 = arith.constant 0 : index
      %67 = vector.load %arg11[%c0_39, %c0_40] : memref<32x32xbf16, #tpu.memory_space<vmem>>, vector<32x32xbf16>
      tpu.vector_store %arg11[%c0_39, %c0_40], %66 {strides = array<i32>} : memref<32x32xbf16, #tpu.memory_space<vmem>>, vector<32x32xbf16>,
      %c0_41 = arith.constant 0 : index
      %c0_42 = arith.constant 0 : index
      %68 = vector.load %arg9[%c0_41, %c0_42] : memref<1x32xf32, #tpu.memory_space<vmem>>, vector<1x32xf32>
      %69 = vector.broadcast %68 : vector<1x32xf32> to vector<32x32xf32>
      %70 = arith.addf %41, %69 : vector<32x32xf32>
      %c0_43 = arith.constant 0 : index
      %c0_44 = arith.constant 0 : index
      %71 = vector.load %arg12[%c0_43, %c0_44] : memref<32x32xf32, #tpu.memory_space<vmem>>, vector<32x32xf32>
      tpu.vector_store %arg12[%c0_43, %c0_44], %70 {strides = array<i32>} : memref<32x32xf32, #tpu.memory_space<vmem>>, vector<32x32xf32>,
    } else {
    }
    %c0 = arith.constant 0 : index
    %c0_1 = arith.constant 0 : index
    %3 = vector.load %arg11[%c0, %c0_1] : memref<32x32xbf16, #tpu.memory_space<vmem>>, vector<32x32xbf16>
    %c0_2 = arith.constant 0 : index
    %c0_3 = arith.constant 0 : index
    %c0_4 = arith.constant 0 : index
    %4 = vector.load %arg5[%c0_2, %c0_3, %c0_4] : memref<1x32x8xbf16, #tpu.memory_space<vmem>>, vector<1x32x8xbf16>
    %5 = vector.shape_cast %4 : vector<1x32x8xbf16> to vector<32x8xbf16>
    %cst = arith.constant dense<0.000000e+00> : vector<32x8xf32>
    %6 = tpu.matmul %3, %5, %cst {dimension_numbers = #tpu.dot_dimension_numbers<[1], [0], [0], [1], [0, 0, 1, 1], [], []>} : vector<32x32xbf16>, vector<32x8xbf16>, vector<32x8xf32> -> vector<32x8xf32>
    %c0_5 = arith.constant 0 : index
    %c0_6 = arith.constant 0 : index
    %c0_7 = arith.constant 0 : index
    %7 = vector.load %arg6[%c0_5, %c0_6, %c0_7] : memref<1x32x8xbf16, #tpu.memory_space<vmem>>, vector<1x32x8xbf16>
    %8 = vector.shape_cast %7 : vector<1x32x8xbf16> to vector<32x8xbf16>
    %cst_8 = arith.constant dense<0.000000e+00> : vector<32x8xf32>
    %9 = tpu.matmul %3, %8, %cst_8 {dimension_numbers = #tpu.dot_dimension_numbers<[1], [0], [0], [1], [0, 0, 1, 1], [], []>} : vector<32x32xbf16>, vector<32x8xbf16>, vector<32x8xf32> -> vector<32x8xf32>
    %c0_9 = arith.constant 0 : index
    %c0_10 = arith.constant 0 : index
    %c0_11 = arith.constant 0 : index
    %10 = vector.load %arg7[%c0_9, %c0_10, %c0_11] : memref<1x32x8xbf16, #tpu.memory_space<vmem>>, vector<1x32x8xbf16>
    %11 = vector.shape_cast %10 : vector<1x32x8xbf16> to vector<32x8xbf16>
    %cst_12 = arith.constant dense<0.000000e+00> : vector<32x8xf32>
    %12 = tpu.matmul %3, %11, %cst_12 {dimension_numbers = #tpu.dot_dimension_numbers<[1], [0], [0], [1], [0, 0, 1, 1], [], []>} : vector<32x32xbf16>, vector<32x8xbf16>, vector<32x8xf32> -> vector<32x8xf32>
    %13 = arith.truncf %6 : vector<32x8xf32> to vector<32x8xbf16>
    %14 = arith.truncf %9 : vector<32x8xf32> to vector<32x8xbf16>
    "tpu.trace_start"() <{level = 10 : i32, message = "nd,md->nm"}> : () -> ()
    %cst_13 = arith.constant dense<0.000000e+00> : vector<32x32xf32>
    %15 = tpu.matmul %13, %14, %cst_13 {dimension_numbers = #tpu.dot_dimension_numbers<[1], [1], [0], [0], [0, 0, 1, 0], [], []>} : vector<32x8xbf16>, vector<32x8xbf16>, vector<32x32xf32> -> vector<32x32xf32>
    "tpu.trace_stop"() : () -> ()
    %cst_14 = arith.constant 0.353553385 : f32
    %16 = vector.broadcast %cst_14 : f32 to vector<32x32xf32>
    %17 = arith.mulf %15, %16 : vector<32x32xf32>
    %cst_15 = arith.constant dense<0xFF800000> : vector<32xf32>
    %18 = vector.multi_reduction <maximumf>, %17, %cst_15 [1] : vector<32x32xf32> to vector<32xf32>
    %19 = vector.shape_cast %18 : vector<32xf32> to vector<32x1xf32>
    %20 = vector.broadcast %19 : vector<32x1xf32> to vector<32x32xf32>
    %21 = arith.subf %17, %20 : vector<32x32xf32>
    %22 = math.exp %21 : vector<32x32xf32>
    %cst_16 = arith.constant dense<0.000000e+00> : vector<32xf32>
    %23 = vector.multi_reduction <add>, %22, %cst_16 [1] : vector<32x32xf32> to vector<32xf32>
    %24 = vector.shape_cast %23 : vector<32xf32> to vector<32x1xf32>
    %25 = vector.broadcast %24 : vector<32x1xf32> to vector<32x32xf32>
    %26 = arith.divf %22, %25 : vector<32x32xf32>
    %27 = arith.truncf %26 : vector<32x32xf32> to vector<32x32xbf16>
    %28 = arith.truncf %12 : vector<32x8xf32> to vector<32x8xbf16>
    %cst_17 = arith.constant dense<0.000000e+00> : vector<32x8xf32>
    %29 = tpu.matmul %27, %28, %cst_17 {dimension_numbers = #tpu.dot_dimension_numbers<[1], [0], [0], [1], [0, 0, 1, 1], [], []>} : vector<32x32xbf16>, vector<32x8xbf16>, vector<32x8xf32> -> vector<32x8xf32>
    %c0_18 = arith.constant 0 : index
    %c0_19 = arith.constant 0 : index
    %30 = vector.load %arg12[%c0_18, %c0_19] : memref<32x32xf32, #tpu.memory_space<vmem>>, vector<32x32xf32>
    %31 = arith.truncf %29 : vector<32x8xf32> to vector<32x8xbf16>
    %c0_20 = arith.constant 0 : index
    %c0_21 = arith.constant 0 : index
    %c0_22 = arith.constant 0 : index
    %32 = vector.load %arg8[%c0_20, %c0_21, %c0_22] : memref<1x8x32xbf16, #tpu.memory_space<vmem>>, vector<1x8x32xbf16>
    %33 = vector.shape_cast %32 : vector<1x8x32xbf16> to vector<8x32xbf16>
    %cst_23 = arith.constant dense<0.000000e+00> : vector<32x32xf32>
    %34 = tpu.matmul %31, %33, %cst_23 {dimension_numbers = #tpu.dot_dimension_numbers<[1], [0], [0], [1], [0, 0, 1, 1], [], []>} : vector<32x8xbf16>, vector<8x32xbf16>, vector<32x32xf32> -> vector<32x32xf32>
    %35 = arith.addf %30, %34 : vector<32x32xf32>
    %c0_24 = arith.constant 0 : index
    %c0_25 = arith.constant 0 : index
    %36 = vector.load %arg12[%c0_24, %c0_25] : memref<32x32xf32, #tpu.memory_space<vmem>>, vector<32x32xf32>
    tpu.vector_store %arg12[%c0_24, %c0_25], %35 {strides = array<i32>} : memref<32x32xf32, #tpu.memory_space<vmem>>, vector<32x32xf32>,
    %c3_i32 = arith.constant 3 : i32
    %37 = arith.cmpi eq, %arg1, %c3_i32 : i32
    %38 = arith.extui %37 : i1 to i32
    %c0_i32_26 = arith.constant 0 : i32
    %39 = arith.cmpi ne, %38, %c0_i32_26 : i32
    scf.if %39 {
      %c0_27 = arith.constant 0 : index
      %c0_28 = arith.constant 0 : index
      %40 = vector.load %arg12[%c0_27, %c0_28] : memref<32x32xf32, #tpu.memory_space<vmem>>, vector<32x32xf32>
      %c0_29 = arith.constant 0 : index
      %c0_30 = arith.constant 0 : index
      %c0_31 = arith.constant 0 : index
      %41 = vector.load %arg10[%c0_29, %c0_30, %c0_31] : memref<1x32x32xf32, #tpu.memory_space<vmem>>, vector<1x32x32xf32>
      %42 = vector.shape_cast %41 : vector<1x32x32xf32> to vector<32x32xf32>
      %43 = vector.shape_cast %40 : vector<32x32xf32> to vector<1x32x32xf32>
      tpu.vector_store %arg10[%c0_29, %c0_30, %c0_31], %43 {strides = array<i32>} : memref<1x32x32xf32, #tpu.memory_space<vmem>>, vector<1x32x32xf32>,
    } else {
    }
    return
  }
  func.func @transform_0(%arg0: i32, %arg1: i32) -> (i32, i32, i32) {
    %c0_i32 = arith.constant 0 : i32
    %c0_i32_0 = arith.constant 0 : i32
    %c0_i32_1 = arith.constant 0 : i32
    return %arg0, %c0_i32, %c0_i32_0 : i32, i32, i32
  }
  func.func @transform_1(%arg0: i32, %arg1: i32) -> (i32, i32) {
    %c0_i32 = arith.constant 0 : i32
    %c0_i32_0 = arith.constant 0 : i32
    %c0_i32_1 = arith.constant 0 : i32
    return %c0_i32, %c0_i32_0 : i32, i32
  }
  func.func @transform_2(%arg0: i32, %arg1: i32) -> (i32, i32) {
    %c0_i32 = arith.constant 0 : i32
    %c0_i32_0 = arith.constant 0 : i32
    %c0_i32_1 = arith.constant 0 : i32
    return %c0_i32, %c0_i32_0 : i32, i32
  }
  func.func @transform_3(%arg0: i32, %arg1: i32) -> (i32, i32, i32) {
    %c0_i32 = arith.constant 0 : i32
    %c0_i32_0 = arith.constant 0 : i32
    %c0_i32_1 = arith.constant 0 : i32
    return %arg1, %c0_i32, %c0_i32_0 : i32, i32, i32
  }
  func.func @transform_4(%arg0: i32, %arg1: i32) -> (i32, i32, i32) {
    %c0_i32 = arith.constant 0 : i32
    %c0_i32_0 = arith.constant 0 : i32
    %c0_i32_1 = arith.constant 0 : i32
    return %arg1, %c0_i32, %c0_i32_0 : i32, i32, i32
  }
  func.func @transform_5(%arg0: i32, %arg1: i32) -> (i32, i32, i32) {
    %c0_i32 = arith.constant 0 : i32
    %c0_i32_0 = arith.constant 0 : i32
    %c0_i32_1 = arith.constant 0 : i32
    return %arg1, %c0_i32, %c0_i32_0 : i32, i32, i32
  }
  func.func @transform_6(%arg0: i32, %arg1: i32) -> (i32, i32, i32) {
    %c0_i32 = arith.constant 0 : i32
    %c0_i32_0 = arith.constant 0 : i32
    %c0_i32_1 = arith.constant 0 : i32
    return %arg1, %c0_i32, %c0_i32_0 : i32, i32, i32
  }
  func.func @transform_7(%arg0: i32, %arg1: i32) -> (i32, i32) {
    %c0_i32 = arith.constant 0 : i32
    %c0_i32_0 = arith.constant 0 : i32
    %c0_i32_1 = arith.constant 0 : i32
    return %c0_i32, %c0_i32_0 : i32, i32
  }
  func.func @transform_8(%arg0: i32, %arg1: i32) -> (i32, i32, i32) {
    %c0_i32 = arith.constant 0 : i32
    %c0_i32_0 = arith.constant 0 : i32
    %c0_i32_1 = arith.constant 0 : i32
    return %arg0, %c0_i32, %c0_i32_0 : i32, i32, i32
  }
}

module attributes {stable_mosaic.version = 11 : i64} {
  func.func @_token_mix_kernel(%arg0: i32, %arg1: memref<32x32xf32, #tpu.memory_space<vmem>>, %arg2: memref<1x32xf32, #tpu.memory_space<vmem>>, %arg3: memref<1x32xf32, #tpu.memory_space<vmem>>, %arg4: memref<32x32xbf16, #tpu.memory_space<vmem>>, %arg5: memref<1x32xf32, #tpu.memory_space<vmem>>, %arg6: memref<1x32xf32, #tpu.memory_space<vmem>>, %arg7: memref<1x32xf32, #tpu.memory_space<vmem>>, %arg8: memref<32x128xbf16, #tpu.memory_space<vmem>>, %arg9: memref<1x128xf32, #tpu.memory_space<vmem>>, %arg10: memref<128x32xbf16, #tpu.memory_space<vmem>>, %arg11: memref<1x32xf32, #tpu.memory_space<vmem>>, %arg12: memref<32x32xf32, #tpu.memory_space<vmem>>) attributes {dimension_semantics = [#tpu.dimension_semantics<parallel>], iteration_bounds = array<i64: 2>, scalar_prefetch = 0 : i64, scratch_operands = 0 : i64, tpu.core_type = #tpu.core_type<tc>, window_params = [{transform_indices = @transform_0, window_bounds = array<i64: 32, 32>}, {pipeline_mode = #tpu.pipeline_mode<synchronous>, transform_indices = @transform_1, window_bounds = array<i64: 1, 32>}, {pipeline_mode = #tpu.pipeline_mode<synchronous>, transform_indices = @transform_2, window_bounds = array<i64: 1, 32>}, {pipeline_mode = #tpu.pipeline_mode<synchronous>, transform_indices = @transform_3, window_bounds = array<i64: 32, 32>}, {pipeline_mode = #tpu.pipeline_mode<synchronous>, transform_indices = @transform_4, window_bounds = array<i64: 1, 32>}, {pipeline_mode = #tpu.pipeline_mode<synchronous>, transform_indices = @transform_5, window_bounds = array<i64: 1, 32>}, {pipeline_mode = #tpu.pipeline_mode<synchronous>, transform_indices = @transform_6, window_bounds = array<i64: 1, 32>}, {pipeline_mode = #tpu.pipeline_mode<synchronous>, transform_indices = @transform_7, window_bounds = array<i64: 32, 128>}, {pipeline_mode = #tpu.pipeline_mode<synchronous>, transform_indices = @transform_8, window_bounds = array<i64: 1, 128>}, {pipeline_mode = #tpu.pipeline_mode<synchronous>, transform_indices = @transform_9, window_bounds = array<i64: 128, 32>}, {pipeline_mode = #tpu.pipeline_mode<synchronous>, transform_indices = @transform_10, window_bounds = array<i64: 1, 32>}, {transform_indices = @transform_11, window_bounds = array<i64: 32, 32>}]} {
    %c0 = arith.constant 0 : index
    %c0_0 = arith.constant 0 : index
    %0 = vector.load %arg1[%c0, %c0_0] : memref<32x32xf32, #tpu.memory_space<vmem>>, vector<32x32xf32>
    %cst = arith.constant dense<0.000000e+00> : vector<32xf32>
    %1 = vector.multi_reduction <add>, %0, %cst [1] : vector<32x32xf32> to vector<32xf32>
    %2 = vector.shape_cast %1 : vector<32xf32> to vector<32x1xf32>
    %cst_1 = arith.constant 3.200000e+01 : f32
    %3 = vector.broadcast %cst_1 : f32 to vector<32x1xf32>
    %4 = arith.divf %2, %3 : vector<32x1xf32>
    %5 = vector.broadcast %4 : vector<32x1xf32> to vector<32x32xf32>
    %6 = arith.subf %0, %5 : vector<32x32xf32>
    %7 = arith.mulf %6, %6 : vector<32x32xf32>
    %cst_2 = arith.constant dense<0.000000e+00> : vector<32xf32>
    %8 = vector.multi_reduction <add>, %7, %cst_2 [1] : vector<32x32xf32> to vector<32xf32>
    %9 = vector.shape_cast %8 : vector<32xf32> to vector<32x1xf32>
    %cst_3 = arith.constant 3.200000e+01 : f32
    %10 = vector.broadcast %cst_3 : f32 to vector<32x1xf32>
    %11 = arith.divf %9, %10 : vector<32x1xf32>
    %12 = vector.broadcast %4 : vector<32x1xf32> to vector<32x32xf32>
    %13 = arith.subf %0, %12 : vector<32x32xf32>
    %cst_4 = arith.constant 9.99999974E-6 : f32
    %14 = vector.broadcast %cst_4 : f32 to vector<32x1xf32>
    %15 = arith.addf %11, %14 : vector<32x1xf32>
    %16 = math.rsqrt %15 : vector<32x1xf32>
    %17 = vector.broadcast %16 : vector<32x1xf32> to vector<32x32xf32>
    %18 = arith.mulf %13, %17 : vector<32x32xf32>
    %c0_5 = arith.constant 0 : index
    %c0_6 = arith.constant 0 : index
    %19 = vector.load %arg2[%c0_5, %c0_6] : memref<1x32xf32, #tpu.memory_space<vmem>>, vector<1x32xf32>
    %20 = vector.broadcast %19 : vector<1x32xf32> to vector<32x32xf32>
    %21 = arith.mulf %18, %20 : vector<32x32xf32>
    %c0_7 = arith.constant 0 : index
    %c0_8 = arith.constant 0 : index
    %22 = vector.load %arg3[%c0_7, %c0_8] : memref<1x32xf32, #tpu.memory_space<vmem>>, vector<1x32xf32>
    %23 = vector.broadcast %22 : vector<1x32xf32> to vector<32x32xf32>
    %24 = arith.addf %21, %23 : vector<32x32xf32>
    %25 = arith.truncf %24 : vector<32x32xf32> to vector<32x32xbf16>
    %c0_9 = arith.constant 0 : index
    %c0_10 = arith.constant 0 : index
    %26 = vector.load %arg4[%c0_9, %c0_10] : memref<32x32xbf16, #tpu.memory_space<vmem>>, vector<32x32xbf16>
    %cst_11 = arith.constant dense<0.000000e+00> : vector<32x32xf32>
    %27 = tpu.matmul %25, %26, %cst_11 {dimension_numbers = #tpu.dot_dimension_numbers<[1], [0], [0], [1], [0, 0, 1, 1], [], []>} : vector<32x32xbf16>, vector<32x32xbf16>, vector<32x32xf32> -> vector<32x32xf32>
    %28 = arith.addf %0, %27 : vector<32x32xf32>
    %c0_12 = arith.constant 0 : index
    %c0_13 = arith.constant 0 : index
    %29 = vector.load %arg5[%c0_12, %c0_13] : memref<1x32xf32, #tpu.memory_space<vmem>>, vector<1x32xf32>
    %30 = vector.broadcast %29 : vector<1x32xf32> to vector<32x32xf32>
    %31 = arith.addf %28, %30 : vector<32x32xf32>
    %cst_14 = arith.constant dense<0.000000e+00> : vector<32xf32>
    %32 = vector.multi_reduction <add>, %31, %cst_14 [1] : vector<32x32xf32> to vector<32xf32>
    %33 = vector.shape_cast %32 : vector<32xf32> to vector<32x1xf32>
    %cst_15 = arith.constant 3.200000e+01 : f32
    %34 = vector.broadcast %cst_15 : f32 to vector<32x1xf32>
    %35 = arith.divf %33, %34 : vector<32x1xf32>
    %36 = vector.broadcast %35 : vector<32x1xf32> to vector<32x32xf32>
    %37 = arith.subf %31, %36 : vector<32x32xf32>
    %38 = arith.mulf %37, %37 : vector<32x32xf32>
    %cst_16 = arith.constant dense<0.000000e+00> : vector<32xf32>
    %39 = vector.multi_reduction <add>, %38, %cst_16 [1] : vector<32x32xf32> to vector<32xf32>
    %40 = vector.shape_cast %39 : vector<32xf32> to vector<32x1xf32>
    %cst_17 = arith.constant 3.200000e+01 : f32
    %41 = vector.broadcast %cst_17 : f32 to vector<32x1xf32>
    %42 = arith.divf %40, %41 : vector<32x1xf32>
    %43 = vector.broadcast %35 : vector<32x1xf32> to vector<32x32xf32>
    %44 = arith.subf %31, %43 : vector<32x32xf32>
    %cst_18 = arith.constant 9.99999974E-6 : f32
    %45 = vector.broadcast %cst_18 : f32 to vector<32x1xf32>
    %46 = arith.addf %42, %45 : vector<32x1xf32>
    %47 = math.rsqrt %46 : vector<32x1xf32>
    %48 = vector.broadcast %47 : vector<32x1xf32> to vector<32x32xf32>
    %49 = arith.mulf %44, %48 : vector<32x32xf32>
    %c0_19 = arith.constant 0 : index
    %c0_20 = arith.constant 0 : index
    %50 = vector.load %arg6[%c0_19, %c0_20] : memref<1x32xf32, #tpu.memory_space<vmem>>, vector<1x32xf32>
    %51 = vector.broadcast %50 : vector<1x32xf32> to vector<32x32xf32>
    %52 = arith.mulf %49, %51 : vector<32x32xf32>
    %c0_21 = arith.constant 0 : index
    %c0_22 = arith.constant 0 : index
    %53 = vector.load %arg7[%c0_21, %c0_22] : memref<1x32xf32, #tpu.memory_space<vmem>>, vector<1x32xf32>
    %54 = vector.broadcast %53 : vector<1x32xf32> to vector<32x32xf32>
    %55 = arith.addf %52, %54 : vector<32x32xf32>
    %56 = arith.truncf %55 : vector<32x32xf32> to vector<32x32xbf16>
    %c0_23 = arith.constant 0 : index
    %c0_24 = arith.constant 0 : index
    %57 = vector.load %arg8[%c0_23, %c0_24] : memref<32x128xbf16, #tpu.memory_space<vmem>>, vector<32x128xbf16>
    %cst_25 = arith.constant dense<0.000000e+00> : vector<32x128xf32>
    %58 = tpu.matmul %56, %57, %cst_25 {dimension_numbers = #tpu.dot_dimension_numbers<[1], [0], [0], [1], [0, 0, 1, 1], [], []>} : vector<32x32xbf16>, vector<32x128xbf16>, vector<32x128xf32> -> vector<32x128xf32>
    %c0_26 = arith.constant 0 : index
    %c0_27 = arith.constant 0 : index
    %59 = vector.load %arg9[%c0_26, %c0_27] : memref<1x128xf32, #tpu.memory_space<vmem>>, vector<1x128xf32>
    %60 = vector.broadcast %59 : vector<1x128xf32> to vector<32x128xf32>
    %61 = arith.addf %58, %60 : vector<32x128xf32>
    %cst_28 = arith.constant 5.000000e-01 : f32
    %62 = vector.broadcast %cst_28 : f32 to vector<32x128xf32>
    %63 = arith.mulf %62, %61 : vector<32x128xf32>
    %cst_29 = arith.constant 0.707106769 : f32
    %64 = vector.broadcast %cst_29 : f32 to vector<32x128xf32>
    %65 = arith.mulf %61, %64 : vector<32x128xf32>
    %66 = math.erf %65 : vector<32x128xf32>
    %cst_30 = arith.constant 1.000000e+00 : f32
    %67 = vector.broadcast %cst_30 : f32 to vector<32x128xf32>
    %68 = arith.addf %67, %66 : vector<32x128xf32>
    %69 = arith.mulf %63, %68 : vector<32x128xf32>
    %70 = arith.truncf %69 : vector<32x128xf32> to vector<32x128xbf16>
    %c0_31 = arith.constant 0 : index
    %c0_32 = arith.constant 0 : index
    %71 = vector.load %arg10[%c0_31, %c0_32] : memref<128x32xbf16, #tpu.memory_space<vmem>>, vector<128x32xbf16>
    %cst_33 = arith.constant dense<0.000000e+00> : vector<32x32xf32>
    %72 = tpu.matmul %70, %71, %cst_33 {dimension_numbers = #tpu.dot_dimension_numbers<[1], [0], [0], [1], [0, 0, 1, 1], [], []>} : vector<32x128xbf16>, vector<128x32xbf16>, vector<32x32xf32> -> vector<32x32xf32>
    %c0_34 = arith.constant 0 : index
    %c0_35 = arith.constant 0 : index
    %73 = vector.load %arg11[%c0_34, %c0_35] : memref<1x32xf32, #tpu.memory_space<vmem>>, vector<1x32xf32>
    %74 = vector.broadcast %73 : vector<1x32xf32> to vector<32x32xf32>
    %75 = arith.addf %72, %74 : vector<32x32xf32>
    %76 = arith.addf %31, %75 : vector<32x32xf32>
    %c0_36 = arith.constant 0 : index
    %c0_37 = arith.constant 0 : index
    %77 = vector.load %arg12[%c0_36, %c0_37] : memref<32x32xf32, #tpu.memory_space<vmem>>, vector<32x32xf32>
    tpu.vector_store %arg12[%c0_36, %c0_37], %76 {strides = array<i32>} : memref<32x32xf32, #tpu.memory_space<vmem>>, vector<32x32xf32>,
    return
  }
  func.func @transform_0(%arg0: i32) -> (i32, i32) {
    %c0_i32 = arith.constant 0 : i32
    %c0_i32_0 = arith.constant 0 : i32
    return %arg0, %c0_i32 : i32, i32
  }
  func.func @transform_1(%arg0: i32) -> (i32, i32) {
    %c0_i32 = arith.constant 0 : i32
    %c0_i32_0 = arith.constant 0 : i32
    %c0_i32_1 = arith.constant 0 : i32
    return %c0_i32, %c0_i32_0 : i32, i32
  }
  func.func @transform_2(%arg0: i32) -> (i32, i32) {
    %c0_i32 = arith.constant 0 : i32
    %c0_i32_0 = arith.constant 0 : i32
    %c0_i32_1 = arith.constant 0 : i32
    return %c0_i32, %c0_i32_0 : i32, i32
  }
  func.func @transform_3(%arg0: i32) -> (i32, i32) {
    %c0_i32 = arith.constant 0 : i32
    %c0_i32_0 = arith.constant 0 : i32
    %c0_i32_1 = arith.constant 0 : i32
    return %c0_i32, %c0_i32_0 : i32, i32
  }
  func.func @transform_4(%arg0: i32) -> (i32, i32) {
    %c0_i32 = arith.constant 0 : i32
    %c0_i32_0 = arith.constant 0 : i32
    %c0_i32_1 = arith.constant 0 : i32
    return %c0_i32, %c0_i32_0 : i32, i32
  }
  func.func @transform_5(%arg0: i32) -> (i32, i32) {
    %c0_i32 = arith.constant 0 : i32
    %c0_i32_0 = arith.constant 0 : i32
    %c0_i32_1 = arith.constant 0 : i32
    return %c0_i32, %c0_i32_0 : i32, i32
  }
  func.func @transform_6(%arg0: i32) -> (i32, i32) {
    %c0_i32 = arith.constant 0 : i32
    %c0_i32_0 = arith.constant 0 : i32
    %c0_i32_1 = arith.constant 0 : i32
    return %c0_i32, %c0_i32_0 : i32, i32
  }
  func.func @transform_7(%arg0: i32) -> (i32, i32) {
    %c0_i32 = arith.constant 0 : i32
    %c0_i32_0 = arith.constant 0 : i32
    %c0_i32_1 = arith.constant 0 : i32
    return %c0_i32, %c0_i32_0 : i32, i32
  }
  func.func @transform_8(%arg0: i32) -> (i32, i32) {
    %c0_i32 = arith.constant 0 : i32
    %c0_i32_0 = arith.constant 0 : i32
    %c0_i32_1 = arith.constant 0 : i32
    return %c0_i32, %c0_i32_0 : i32, i32
  }
  func.func @transform_9(%arg0: i32) -> (i32, i32) {
    %c0_i32 = arith.constant 0 : i32
    %c0_i32_0 = arith.constant 0 : i32
    %c0_i32_1 = arith.constant 0 : i32
    return %c0_i32, %c0_i32_0 : i32, i32
  }
  func.func @transform_10(%arg0: i32) -> (i32, i32) {
    %c0_i32 = arith.constant 0 : i32
    %c0_i32_0 = arith.constant 0 : i32
    %c0_i32_1 = arith.constant 0 : i32
    return %c0_i32, %c0_i32_0 : i32, i32
  }
  func.func @transform_11(%arg0: i32) -> (i32, i32) {
    %c0_i32 = arith.constant 0 : i32
    %c0_i32_0 = arith.constant 0 : i32
    return %arg0, %c0_i32 : i32, i32
  }
}

</mosaic_0001>

<bundles_post_ra>
// kernel: spatio_temp_transformer_forward.4
= control target key start
LH: loop header
LB: loop body
LE: loop exit
PB: predicated region body
PF: predicated region fallthrough
CT: control target
= control target key end

     0   :  { %s1235_s27 = smov 0   ;;  %s1237_s28 = smov 0   ;;  %s1416_s0 = inlined_call_operand.vmem [shape: f32[2,32,32], index: 0, kind: input, shape index: {}]   ;;  %s1417_s1 = inlined_call_operand.vmem [shape: f32[1,32], index: 1, kind: input, shape index: {}]   ;;  %s1418_s2 = inlined_call_operand.vmem [shape: f32[1,32], index: 2, kind: input, shape index: {}]   ;;  %s1419_s3 = inlined_call_operand.vmem [shape: bf16[4,32,8], index: 3, kind: input, shape index: {}]   ;;  %s1420_s4 = inlined_call_operand.vmem [shape: bf16[4,32,8], index: 4, kind: input, shape index: {}]   ;;  %s1421_s5 = inlined_call_operand.vmem [shape: bf16[4,32,8], index: 5, kind: input, shape index: {}]   ;;  %s1422_s6 = inlined_call_operand.vmem [shape: bf16[4,8,32], index: 6, kind: input, shape index: {}]   ;;  %s1423_s7 = inlined_call_operand.vmem [shape: f32[1,32], index: 7, kind: input, shape index: {}]   ;;  %s1424_s8 = inlined_call_operand.vmem [shape: f32[2,32,32], index: 8, kind: output, shape index: {}]  }
   0x1   :  { %1425 = sst [smem:[#allocation5_spill]] %s1416_s0  ;;  %s1239_s29 = smov 0  }
   0x2   :  { %s1241_s30 = smov 0   ;;  %s1243_s9 = smov 0  }
   0x3 LB: > { %s27_s10 = sadd.s32 1, %s1179_s29  ;;  %s30_s11 = sadd.s32 1, %s1183_s30  ;;  %s1187_s9 = sphi %s1243_s9, %s18_s9   ;;  %s1183_s30 = sphi %s1241_s30, %s1432_s30   ;;  %s1179_s29 = sphi %s1239_s29, %s1431_s29   ;;  %s1175_s28 = sphi %s1237_s28, %s1430_s28   ;;  %s1171_s27 = sphi %s1235_s27, %s1429_s27  }
   0x4   : > { %p28_p0 = scmp.ge.s32.totalorder %s27_s10, 4  ;;  %p1002_p1 = scmp.ge.s32.totalorder %s1187_s9, 1 }
   0x5   : > { %p313_p2 = scmp.lt.s32.totalorder %s1187_s9, 9 }
   0x6   : > { %s1434_s10 = smov (%p28_p0, %s27_s10), 0  ;;  %s1436_s11 = smov (!%p28_p0, %s30_s11), %s1183_s30 }
   0x7   : > { %p314_p3 = pnand %p1002_p1, %p313_p2  ;;  %p32_p4 = scmp.ge.s32.totalorder %s1436_s11, 2 }
   0x8   : > { %p366_p5 = scmp.lt.s32.totalorder (!%p314_p3), %s1175_s28, 1  ;;  %p371_p6 = scmp.lt.s32.totalorder (!%p314_p3), %s1171_s27, 3 }
   0x9   : > { %s1438_s11 = smov (%p32_p4, %s1436_s11), 0  ;;  %317 = sbr.rel (%p314_p3) target bundleno = 1173 (0x495), region = 52 }
   0xa   : > { %1426 = sst [smem:[#allocation4_spill]] %s1438_s11  ;;  %p1014_p7 = scmp.ne.s32.totalorder (!%p314_p3), %s1171_s27, 0 }
   0xb   : > { %s1427_s0 = sld [smem:[#allocation5_spill]] (!%p314_p3) }
   0xe   : > { %s1440_s28 = smov (!%p366_p5, %s1175_s28), 1 }
   0xf   : > { %s372_s12 = scalar_select %p371_p6, %s1171_s27, 3 }
  0x10   : > { %s1062_s13 = sshll.u32 %s1440_s28, 5  ;;  %399 = sbr.rel (%p1014_p7) target bundleno = 302 (0x12e), region = 56 }
  0x11   : > { %s370_s16 = scalar_lea.vmem %s1427_s0, %s1062_s13  ;;  %s1063_s17 = sshll.u32 %s372_s12, 4 }
  0x12   : > { %s1275_s20 = scalar_lea.vmem %s1419_s3, %s1063_s17  ;;  %s1280_s23 = scalar_lea.vmem %s1420_s4, %s1063_s17 }
  0x13   : > { %s1285_s26 = scalar_lea.vmem %s1421_s5, %s1063_s17  ;;  %s1011_s28 = sshll.u32 %s372_s12, 2 }
  0x14   : > { %s1290_s15 = scalar_lea.vmem %s1422_s6, %s1011_s28  ;;  %s1295_s19 = scalar_lea.vmem %s1424_s8, %s1062_s13 }
  0x15   : > { %v402_v0 = vld [vmem:[%s370_s16 + $0x10] sm:$0xff]  ;;  %vm404_vm0 = vcmask 261120   ;;  %v1120_v1 = vld [vmem:[%s1423_s7] ss:$0 sm:$0xff]  ;;  %v403_v4 = vld [vmem:[%s370_s16 + $0x18] sm:$0xff]  ;;  %v1189_v13 = vmov 32.0  }
  0x16   : > { %v411_v2 = vsel %vm404_vm0, %v402_v0, 0.0  ;;  %v400_v3 = vld [vmem:[%s370_s16] sm:$0xff]  ;;  %v531_v5 = vadd.f32 %v1120_v1, %v402_v0  ;;  %v401_v8 = vld [vmem:[%s370_s16 + $0x8] sm:$0xff]  ;;  %v532_v9 = vadd.f32 %v1120_v1, %v403_v4  ;;  %v414_v11 = vsel %vm404_vm0, %v403_v4, 0.0 }
  0x17   : > { %412 = vadd.xlane.f32.xlu1 %v411_v2  ;;  %v405_v6 = vsel %vm404_vm0, %v400_v3, 0.0  ;;  %v529_v7 = vadd.f32 %v1120_v1, %v400_v3  ;;  %v530_v10 = vadd.f32 %v1120_v1, %v401_v8  ;;  %v408_v12 = vsel %vm404_vm0, %v401_v8, 0.0  ;;  %v1121_v2 = vld [vmem:[%s1417_s1] ss:$0 sm:$0xff] }
  0x18   : > { %406 = vadd.xlane.f32.xlu0 %v405_v6  ;;  %535 = vst.msk [vmem:[#allocation3 + $0x10] sm:$0xff] %vm404_vm0, %v531_v5  ;;  %1123 = vrcp.f32 %v1189_v13  ;;  %vm520_vm10 = vcmask 257024  }
  0x19   : > { %533 = vst.msk [vmem:[#allocation3] sm:$0xff] %vm404_vm0, %v529_v7  ;;  %v1122_v7 = vld [vmem:[%s1418_s2] ss:$0 sm:$0xff] }
  0x1a   : > { %536 = vst.msk [vmem:[#allocation3 + $0x18] sm:$0xff] %vm404_vm0, %v532_v9 }
  0x1b   : > { %534 = vst.msk [vmem:[#allocation3 + $0x8] sm:$0xff] %vm404_vm0, %v530_v10 }
  0x1e   : > { %v1124_v14 = vpop.eup %1123 }
  0x1f   : > { %415 = vadd.xlane.f32.xlu1 %v414_v11  ;;  %v418_v15 = vmul.f32 32.0, %v1124_v14  ;;  %vm422_vm1 = vweird.f32 %v1124_v14 }
  0x20   : > { %409 = vadd.xlane.f32.xlu0 %v408_v12 }
  0x21   : > { %v419_v16 = vsub.f32 1.0, %v418_v15 }
  0x23   : > { %v420_v17 = vmul.f32 %v1124_v14, %v419_v16 }
  0x25   : > { %v421_v18 = vadd.f32 %v1124_v14, %v420_v17 }
  0x27   : > { %v423_v19 = vsel %vm422_vm1, %v1124_v14, %v421_v18 }
  0x8a   : > { %v413_v20 = vpop.xlane.xlu1 %412 }
  0x8b   : > { %v426_v21 = vmul.f32 %v423_v19, %v413_v20  ;;  %v407_v22 = vpop.xlane.xlu0 %406 }
  0x8c   : > { %v424_v23 = vmul.f32 %v423_v19, %v407_v22 }
  0x8d   : > { %v1309_v24 = vsub.f32 %v402_v0, %v426_v21 }
  0x8e   : > { %v1311_v25 = vsub.f32 %v400_v3, %v424_v23 }
  0x8f   : > { %v434_v26 = vmul.f32 %v1309_v24, %v1309_v24 }
  0x90   : > { %v432_v27 = vmul.f32 %v1311_v25, %v1311_v25 }
  0x91   : > { %v442_v28 = vsel %vm404_vm0, %v434_v26, 0.0 }
  0x92   : > { %v416_v29 = vpop.xlane.xlu1 %415  ;;  %443 = vadd.xlane.f32.xlu0 %v442_v28  ;;  %v436_v30 = vsel %vm404_vm0, %v432_v27, 0.0 }
  0x93   : > { %v427_v31 = vmul.f32 %v423_v19, %v416_v29  ;;  %437 = vadd.xlane.f32.xlu2 %v436_v30  ;;  %v410_v32 = vpop.xlane.xlu0 %409 }
  0x94   : > { %v425_v33 = vmul.f32 %v423_v19, %v410_v32 }
  0x95   : > { %v1319_v34 = vsub.f32 %v403_v4, %v427_v31 }
  0x96   : > { %v1321_v35 = vsub.f32 %v401_v8, %v425_v33 }
  0x97   : > { %v435_v36 = vmul.f32 %v1319_v34, %v1319_v34 }
  0x98   : > { %v433_v37 = vmul.f32 %v1321_v35, %v1321_v35 }
  0x99   : > { %v445_v38 = vsel %vm404_vm0, %v435_v36, 0.0 }
  0x9a   : > { %446 = vadd.xlane.f32.xlu1 %v445_v38  ;;  %v439_v39 = vsel %vm404_vm0, %v433_v37, 0.0 }
  0x9b   : > { %440 = vadd.xlane.f32.xlu2 %v439_v39 }
 0x105   : > { %v444_v40 = vpop.xlane.xlu0 %443 }
 0x106   : > { %v438_v41 = vpop.xlane.xlu2 %437  ;;  %v450_v42 = vmul.f32 %v444_v40, %v423_v19 }
 0x107   : > { %v448_v43 = vmul.f32 %v438_v41, %v423_v19 }
 0x108   : > { %v454_v44 = vadd.f32 1e-05, %v450_v42 }
 0x109   : > { %v452_v45 = vadd.f32 1e-05, %v448_v43 }
 0x10a   : > { %1125 = vrsqrt.f32 %v454_v44  ;;  %vm482_vm4 = vweird.f32 %v454_v44 }
 0x10b   : > { %1127 = vrsqrt.f32 %v452_v45  ;;  %vm462_vm5 = vweird.f32 %v452_v45 }
 0x10d   : > { %v447_v46 = vpop.xlane.xlu1 %446 }
 0x10e   : > { %v451_v47 = vmul.f32 %v447_v46, %v423_v19  ;;  %v441_v48 = vpop.xlane.xlu2 %440 }
 0x10f   : > { %v449_v49 = vmul.f32 %v441_v48, %v423_v19 }
 0x110   : > { %v1126_v50 = vpop.eup %1125  ;;  %v455_v51 = vadd.f32 1e-05, %v451_v47 }
 0x111   : > { %v1128_v52 = vpop.eup %1127  ;;  %v477_v53 = vmul.f32 %v1126_v50, %v454_v44  ;;  %v453_v54 = vadd.f32 1e-05, %v449_v49  ;;  %vm483_vm2 = vweird.f32 %v1126_v50 }
 0x112   : > { %v457_v55 = vmul.f32 %v1128_v52, %v452_v45  ;;  %1129 = vrsqrt.f32 %v455_v51  ;;  %vm463_vm3 = vweird.f32 %v1128_v52  ;;  %vm484_vm6 = vmor %vm482_vm4, %vm483_vm2  ;;  %vm492_vm11 = vweird.f32 %v455_v51 }
 0x113   : > { %v478_v56 = vmul.f32 %v1126_v50, %v477_v53  ;;  %1131 = vrsqrt.f32 %v453_v54  ;;  %vm464_vm7 = vmor %vm462_vm5, %vm463_vm3  ;;  %vm472_vm13 = vweird.f32 %v453_v54 }
 0x114   : > { %v458_v57 = vmul.f32 %v1128_v52, %v457_v55 }
 0x115   : > { %v479_v58 = vmul.f32 0.5, %v478_v56 }
 0x116   : > { %v459_v59 = vmul.f32 0.5, %v458_v57 }
 0x117   : > { %v480_v60 = vsub.f32 1.5, %v479_v58 }
 0x118   : > { %v1130_v61 = vpop.eup %1129  ;;  %v460_v62 = vsub.f32 1.5, %v459_v59 }
 0x119   : > { %v1132_v63 = vpop.eup %1131  ;;  %v481_v0 = vmul.f32 %v1126_v50, %v480_v60  ;;  %v487_v1 = vmul.f32 %v1130_v61, %v455_v51  ;;  %vm493_vm8 = vweird.f32 %v1130_v61 }
 0x11a   : > { %v461_v3 = vmul.f32 %v1128_v52, %v460_v62  ;;  %v467_v4 = vmul.f32 %v1132_v63, %v453_v54  ;;  %vm473_vm9 = vweird.f32 %v1132_v63  ;;  %vm494_vm12 = vmor %vm492_vm11, %vm493_vm8 }
 0x11b   : > { %v485_v5 = vsel %vm484_vm6, %v1126_v50, %v481_v0  ;;  %v488_v6 = vmul.f32 %v1130_v61, %v487_v1  ;;  %vm474_vm14 = vmor %vm472_vm13, %vm473_vm9 }
 0x11c   : > { %v465_v8 = vsel %vm464_vm7, %v1128_v52, %v461_v3  ;;  %v498_v9 = vmul.f32 %v485_v5, %v1309_v24  ;;  %v468_v10 = vmul.f32 %v1132_v63, %v467_v4 }
 0x11d   : > { %v496_v11 = vmul.f32 %v465_v8, %v1311_v25  ;;  %v489_v12 = vmul.f32 0.5, %v488_v6 }
 0x11e   : > { %v506_v13 = vmul.f32 %v1121_v2, %v498_v9  ;;  %v469_v14 = vmul.f32 0.5, %v468_v10 }
 0x11f   : > { %v504_v15 = vmul.f32 %v1121_v2, %v496_v11  ;;  %v490_v16 = vsub.f32 1.5, %v489_v12 }
 0x120   : > { %v514_v17 = vadd.f32 %v1122_v7, %v506_v13  ;;  %v470_v18 = vsub.f32 1.5, %v469_v14 }
 0x121   : > { %v512_v19 = vadd.f32 %v1122_v7, %v504_v15  ;;  %v491_v20 = vmul.f32 %v1130_v61, %v490_v16 }
 0x122   : > { %v518_v21 = vpack.c.bf16 %v514_v17, %v514_v17  ;;  %v471_v22 = vmul.f32 %v1132_v63, %v470_v18 }
 0x123   : > { %v516_v23 = vpack.c.bf16 %v512_v19, %v512_v19  ;;  %v495_v24 = vsel %vm494_vm12, %v1130_v61, %v491_v20 }
 0x124   : > { %523 = vst.msk [vmem:[#allocation2 + $0x8] sm:$0xf] %vm520_vm10, %v518_v21  ;;  %v499_v25 = vmul.f32 %v495_v24, %v1319_v34  ;;  %v475_v26 = vsel %vm474_vm14, %v1132_v63, %v471_v22 }
 0x125   : > { %521 = vst.msk [vmem:[#allocation2] sm:$0xf] %vm520_vm10, %v516_v23  ;;  %v497_v27 = vmul.f32 %v475_v26, %v1321_v35 }
 0x126   : > { %v507_v28 = vmul.f32 %v1121_v2, %v499_v25 }
 0x127   : > { %v505_v29 = vmul.f32 %v1121_v2, %v497_v27 }
 0x128   : > { %v515_v30 = vadd.f32 %v1122_v7, %v507_v28 }
 0x129   : > { %v513_v31 = vadd.f32 %v1122_v7, %v505_v29 }
 0x12a   : > { %v519_v32 = vpack.c.bf16 %v515_v30, %v515_v30 }
 0x12b   : > { %v517_v33 = vpack.c.bf16 %v513_v31, %v513_v31 }
 0x12c   : > { %524 = vst.msk [vmem:[#allocation2 + $0xc] sm:$0xf] %vm520_vm10, %v519_v32 }
 0x12d   : > { %522 = vst.msk [vmem:[#allocation2 + $0x4] sm:$0xf] %vm520_vm10, %v517_v33 }
 0x12e PF: > { %v1072_v34 = vld [vmem:[%s1280_s23 + $0x8] sm:$0xff]  ;;  %v1071_v37 = vld [vmem:[%s1280_s23] sm:$0xff]  ;;  %vm567_vm15 = vcmask 261120   ;;  %vm667_vm0 = vcmask 64512   ;;  %vm841_vm1 = vcmask 1043456   ;;  %p1059_p8 = scmp.ne.s32.totalorder %s1171_s27, 3 }
 0x12f   : > { %v1070_v36 = vld [vmem:[%s1275_s20 + $0x8] sm:$0xff]  ;;  %1077 = vmatpush.bf16.msra.mxu3 %v1072_v34  ;;  %615 = vmatpush.bf16.msra.mxu1 %v1072_v34  ;;  %v1069_v35 = vld [vmem:[%s1275_s20] sm:$0xff] }
 0x130   : > { %580 = vmatpush.bf16.msra.mxu0 %v1070_v36  ;;  %1075 = vmatpush.bf16.msra.mxu2 %v1070_v36  ;;  %v1074_v54 = vld [vmem:[%s1285_s26 + $0x8] sm:$0xff]  ;;  %v1073_v55 = vld [vmem:[%s1285_s26] sm:$0xff] }
 0x133   : > { %v1068_v38 = vld [vmem:[#allocation2 + $0x8] sm:$0xff]  ;;  %1078 = vmatpush.bf16.msra.mxu3 %v1071_v37  ;;  %616 = vmatpush.bf16.msra.mxu1 %v1071_v37  ;;  %v834_v37 = vld [vmem:[%s1290_s15] sm:$0xf] }
 0x134   : > { %v1067_v39 = vld [vmem:[#allocation2] sm:$0xff]  ;;  %581 = vmatpush.bf16.msra.mxu0 %v1069_v35  ;;  %1076 = vmatpush.bf16.msra.mxu2 %v1069_v35 }
 0x136   : > { %1042 = vmatmul.msk.bf16.vlgmr.msra.gmra.mxu3 %vm567_vm15, %v1068_v38  ;;  %1041 = vmatmul.msk.bf16.vlgmr.msra.gmra.mxu1 %vm567_vm15, %v1067_v39 }
 0x137   : > { %1031 = vmatmul.msk.bf16.vlgmr.msra.gmra.mxu0 %vm567_vm15, %v1067_v39  ;;  %1032 = vmatmul.msk.bf16.vlgmr.msra.gmra.mxu2 %vm567_vm15, %v1068_v38 }
 0x138   : > { %650 = vmatpush.bf16.msrb.mxu2 %v1074_v54 }
 0x13c   : > { %651 = vmatpush.bf16.msrb.mxu2 %v1073_v55 }
 0x147   : > { %1051 = vmatmul.msk.bf16.vlgmr.msrb.gmra.mxu2 %vm567_vm15, %v1067_v39 }
 0x157   : > { %1052 = vmatmul.msk.bf16.gmra.mxu2 %vm567_vm15, %v1068_v38  ;;  %v843_v38 = vsel %vm841_vm1, %v834_v37, 0 }
 0x158   : > { %852 = vmatpush.bf16.msrb.mxu1 %v843_v38 }
 0x1b3   : > { %v618_v41 = vpop.f32.mrf.mxu1 }
 0x1b4   : > { %v583_v46 = vpop.f32.mrf.mxu0 }
 0x1b9   : > { %v623_v40 = vpop.f32.mrf.mxu3 }
 0x1ba   : > { %v588_v51 = vpop.f32.mrf.mxu2 }
 0x1bb   : > { %v620_v45 = vpop.f32.mrf.mxu1 }
 0x1bc   : > { %v665_v47 = vpack.c.bf16 %v620_v45, %v618_v41  ;;  %v585_v49 = vpop.f32.mrf.mxu0 }
 0x1bd   : > { %v663_v50 = vpack.c.bf16 %v585_v49, %v583_v46 }
 0x1be   : > { %v675_v48 = vsel %vm667_vm0, %v665_v47, 0 }
 0x1c1   : > { %v625_v42 = vpop.f32.mrf.mxu3 }
 0x1c2   : > { %v666_v43 = vpack.c.bf16 %v625_v42, %v623_v40  ;;  %v590_v52 = vpop.f32.mrf.mxu2 }
 0x1c3   : > { %v664_v53 = vpack.c.bf16 %v590_v52, %v588_v51 }
 0x1c4   : > { %v678_v44 = vsel %vm667_vm0, %v666_v43, 0 }
 0x1c5   : > { %686 = vmatpush.bf16.xpose.msrb.mxu3 %v678_v44 }
 0x1ca   : > { %v653_v14 = vpop.f32.mrf.mxu2 }
 0x1cd   : > { %687 = vmatpush.bf16.xpose.msrb.mxu3 %v675_v48 }
 0x1d2   : > { %v655_v20 = vpop.f32.mrf.mxu2 }
 0x1d3   : > { %v801_v29 = vpack.c.bf16 %v655_v20, %v653_v14 }
 0x1d4   : > { %1053 = vmatmul.msk.bf16.vlgmr.msrb.gmra.mxu3 %vm667_vm0, %v663_v50 }
 0x1da   : > { %v658_v24 = vpop.f32.mrf.mxu2 }
 0x1e2   : > { %v660_v27 = vpop.f32.mrf.mxu2 }
 0x1e3   : > { %v802_v28 = vpack.c.bf16 %v660_v27, %v658_v24 }
 0x1e4   : > { %1054 = vmatmul.msk.bf16.gmra.mxu3 %vm667_vm0, %v664_v53 }
 0x1e5   : > { %815 = vmatpush.bf16.msrb.mxu0 %v802_v28 }
 0x1e9   : > { %816 = vmatpush.bf16.msrb.mxu0 %v801_v29 }
 0x257   : > { %v689_v56 = vpop.f32.mrf.mxu3 }
 0x258   : > { %v699_v57 = vmul.f32 0.35355338, %v689_v56 }
 0x25a   : > { %v703_v58 = vsel %vm567_vm15, %v699_v57, -inf }
 0x25b   : > { %704 = vmax.xlane.f32.xlu0 %v703_v58 }
 0x25f   : > { %v691_v59 = vpop.f32.mrf.mxu3 }
 0x260   : > { %v700_v60 = vmul.f32 0.35355338, %v691_v59 }
 0x262   : > { %v706_v61 = vsel %vm567_vm15, %v700_v60, -inf }
 0x263   : > { %707 = vmax.xlane.f32.xlu0 %v706_v61 }
 0x267   : > { %v694_v62 = vpop.f32.mrf.mxu3 }
 0x268   : > { %v701_v63 = vmul.f32 0.35355338, %v694_v62 }
 0x26a   : > { %v709_v0 = vsel %vm567_vm15, %v701_v63, -inf }
 0x26b   : > { %710 = vmax.xlane.f32.xlu1 %v709_v0 }
 0x26f   : > { %v696_v1 = vpop.f32.mrf.mxu3 }
 0x270   : > { %v702_v2 = vmul.f32 0.35355338, %v696_v1 }
 0x272   : > { %v712_v3 = vsel %vm567_vm15, %v702_v2, -inf }
 0x273   : > { %713 = vmax.xlane.f32.xlu1 %v712_v3 }
 0x2ce   : > { %v705_v4 = vpop.xlane.xlu0 %704 }
 0x2cf   : > { %v715_v5 = vsub.f32 %v699_v57, %v705_v4 }
 0x2d1   : > { %v719_v6 = vmul.f32 1.442695, %v715_v5 }
 0x2d3   : > { %1133 = vpow2.f32 %v719_v6 }
 0x2d6   : > { %v708_v7 = vpop.xlane.xlu0 %707 }
 0x2d7   : > { %v716_v8 = vsub.f32 %v700_v60, %v708_v7 }
 0x2d9   : > { %v1363_v9 = vpop.eup %1133  ;;  %v721_v10 = vmul.f32 1.442695, %v716_v8 }
 0x2da   : > { %v727_v11 = vsel %vm567_vm15, %v1363_v9, 0.0 }
 0x2db   : > { %1135 = vpow2.f32 %v721_v10  ;;  %728 = vadd.xlane.f32.xlu2 %v727_v11 }
 0x2de   : > { %v711_v12 = vpop.xlane.xlu1 %710 }
 0x2df   : > { %v717_v13 = vsub.f32 %v701_v63, %v711_v12 }
 0x2e1   : > { %v1367_v15 = vpop.eup %1135  ;;  %v723_v16 = vmul.f32 1.442695, %v717_v13 }
 0x2e2   : > { %v730_v17 = vsel %vm567_vm15, %v1367_v15, 0.0 }
 0x2e3   : > { %1137 = vpow2.f32 %v723_v16  ;;  %731 = vadd.xlane.f32.xlu2 %v730_v17 }
 0x2e6   : > { %v714_v18 = vpop.xlane.xlu1 %713 }
 0x2e7   : > { %v718_v19 = vsub.f32 %v702_v2, %v714_v18 }
 0x2e9   : > { %v1371_v21 = vpop.eup %1137  ;;  %v725_v22 = vmul.f32 1.442695, %v718_v19 }
 0x2ea   : > { %v733_v23 = vsel %vm567_vm15, %v1371_v21, 0.0 }
 0x2eb   : > { %1139 = vpow2.f32 %v725_v22  ;;  %734 = vadd.xlane.f32.xlu0 %v733_v23 }
 0x2f1   : > { %v1375_v25 = vpop.eup %1139 }
 0x2f2   : > { %v736_v26 = vsel %vm567_vm15, %v1375_v25, 0.0 }
 0x2f3   : > { %737 = vadd.xlane.f32.xlu1 %v736_v26  ;;  %v828_v26 = vld [vmem:[#allocation3] sm:$0xff] }
 0x34e   : > { %v729_v30 = vpop.xlane.xlu2 %728 }
 0x34f   : > { %1141 = vrcp.f32 %v729_v30  ;;  %v750_v42 = vand.u32 2147483648, %v729_v30  ;;  %vm744_vm3 = vweird.f32 %v729_v30  ;;  %v748_v43 = vand.u32 2147483647, %v729_v30 }
 0x351   : > { %v751_v49 = vor.u32 1.1754944e-38, %v750_v42  ;;  %vm749_vm6 = vcmp.eq.f32.partialorder %v748_v43, 8.507059e+37 }
 0x355   : > { %v1142_v31 = vpop.eup %1141 }
 0x356   : > { %v740_v32 = vmul.f32 %v1142_v31, %v729_v30  ;;  %v732_v33 = vpop.xlane.xlu2 %731  ;;  %vm745_vm2 = vweird.f32 %v1142_v31  ;;  %v830_v30 = vld [vmem:[#allocation3 + $0x10] sm:$0xff] }
 0x357   : > { %1143 = vrcp.f32 %v732_v33  ;;  %vm746_vm4 = vmor %vm744_vm3, %vm745_vm2  ;;  %v765_v45 = vand.u32 2147483648, %v732_v33  ;;  %v763_v48 = vand.u32 2147483647, %v732_v33  ;;  %vm759_vm7 = vweird.f32 %v732_v33 }
 0x358   : > { %v741_v34 = vsub.f32 1.0, %v740_v32 }
 0x359   : > { %v766_v52 = vor.u32 1.1754944e-38, %v765_v45  ;;  %vm764_vm9 = vcmp.eq.f32.partialorder %v763_v48, 8.507059e+37 }
 0x35a   : > { %v742_v36 = vmul.f32 %v1142_v31, %v741_v34 }
 0x35c   : > { %v743_v39 = vadd.f32 %v1142_v31, %v742_v36 }
 0x35d   : > { %v1144_v35 = vpop.eup %1143 }
 0x35e   : > { %v755_v40 = vmul.f32 %v1144_v35, %v732_v33  ;;  %v735_v41 = vpop.xlane.xlu0 %734  ;;  %v747_v46 = vsel %vm746_vm4, %v1142_v31, %v743_v39  ;;  %vm760_vm5 = vweird.f32 %v1144_v35  ;;  %v831_v33 = vld [vmem:[#allocation3 + $0x18] sm:$0xff] }
 0x35f   : > { %1145 = vrcp.f32 %v735_v41  ;;  %vm761_vm8 = vmor %vm759_vm7, %vm760_vm5  ;;  %v752_v53 = vsel %vm749_vm6, %v751_v49, %v747_v46  ;;  %v780_v2 = vand.u32 2147483648, %v735_v41  ;;  %vm774_vm11 = vweird.f32 %v735_v41 }
 0x360   : > { %v756_v44 = vsub.f32 1.0, %v755_v40  ;;  %v753_v59 = vmul.f32 %v1363_v9, %v752_v53  ;;  %v778_v3 = vand.u32 2147483647, %v735_v41 }
 0x361   : > { %v781_v9 = vor.u32 1.1754944e-38, %v780_v2 }
 0x362   : > { %v757_v47 = vmul.f32 %v1144_v35, %v756_v44  ;;  %vm779_vm14 = vcmp.eq.f32.partialorder %v778_v3, 8.507059e+37 }
 0x364   : > { %v758_v50 = vadd.f32 %v1144_v35, %v757_v47 }
 0x365   : > { %v1146_v51 = vpop.eup %1145 }
 0x366   : > { %v762_v54 = vsel %vm761_vm8, %v1144_v35, %v758_v50  ;;  %v770_v55 = vmul.f32 %v1146_v51, %v735_v41  ;;  %v738_v56 = vpop.xlane.xlu1 %737  ;;  %vm775_vm10 = vweird.f32 %v1146_v51 }
 0x367   : > { %v767_v57 = vsel %vm764_vm9, %v766_v52, %v762_v54  ;;  %1147 = vrcp.f32 %v738_v56  ;;  %vm776_vm12 = vmor %vm774_vm11, %vm775_vm10  ;;  %v795_v5 = vand.u32 2147483648, %v738_v56  ;;  %v793_v8 = vand.u32 2147483647, %v738_v56 }
 0x368   : > { %v771_v58 = vsub.f32 1.0, %v770_v55  ;;  %v768_v60 = vmul.f32 %v1367_v15, %v767_v57  ;;  %vm789_vm1 = vweird.f32 %v738_v56 }
 0x369   : > { %v796_v11 = vor.u32 1.1754944e-38, %v795_v5  ;;  %vm794_vm3 = vcmp.eq.f32.partialorder %v793_v8, 8.507059e+37 }
 0x36a   : > { %v772_v61 = vmul.f32 %v1146_v51, %v771_v58  ;;  %v799_v62 = vpack.c.bf16 %v768_v60, %v753_v59 }
 0x36c   : > { %1055 = vmatmul.msk.bf16.vlgmr.msrb.gmra.mxu0 %vm567_vm15, %v799_v62  ;;  %v773_v0 = vadd.f32 %v1146_v51, %v772_v61 }
 0x36d   : > { %v1148_v63 = vpop.eup %1147 }
 0x36e   : > { %v785_v1 = vmul.f32 %v1148_v63, %v738_v56  ;;  %v777_v6 = vsel %vm776_vm12, %v1146_v51, %v773_v0  ;;  %vm790_vm13 = vweird.f32 %v1148_v63 }
 0x36f   : > { %vm791_vm2 = vmor %vm789_vm1, %vm790_vm13  ;;  %v782_v12 = vsel %vm779_vm14, %v781_v9, %v777_v6 }
 0x370   : > { %v786_v4 = vsub.f32 1.0, %v785_v1  ;;  %v783_v15 = vmul.f32 %v1371_v21, %v782_v12  ;;  %v829_v21 = vld [vmem:[#allocation3 + $0x8] sm:$0xff] }
 0x372   : > { %v787_v7 = vmul.f32 %v1148_v63, %v786_v4 }
 0x374   : > { %v788_v10 = vadd.f32 %v1148_v63, %v787_v7 }
 0x376   : > { %v792_v13 = vsel %vm791_vm2, %v1148_v63, %v788_v10 }
 0x377   : > { %v797_v14 = vsel %vm794_vm3, %v796_v11, %v792_v13 }
 0x378   : > { %v798_v16 = vmul.f32 %v1375_v25, %v797_v14 }
 0x37a   : > { %v800_v17 = vpack.c.bf16 %v798_v16, %v783_v15 }
 0x37c   : > { %1056 = vmatmul.msk.bf16.gmra.mxu0 %vm567_vm15, %v800_v17 }
 0x3e9   : > { %v818_v18 = vpop.f32.mrf.mxu0 }
 0x3f1   : > { %v820_v19 = vpop.f32.mrf.mxu0 }
 0x3f2   : > { %v832_v20 = vpack.c.bf16 %v820_v19, %v818_v18 }
 0x3f4   : > { %1057 = vmatmul.msk.bf16.vlgmr.msrb.gmra.mxu1 %vm667_vm0, %v832_v20 }
 0x3f9   : > { %v823_v22 = vpop.f32.mrf.mxu0 }
 0x401   : > { %v825_v23 = vpop.f32.mrf.mxu0 }
 0x402   : > { %v833_v24 = vpack.c.bf16 %v825_v23, %v823_v22 }
 0x404   : > { %1058 = vmatmul.msk.bf16.gmra.mxu1 %vm667_vm0, %v833_v24 }
 0x471   : > { %v854_v27 = vpop.f32.mrf.mxu1 }
 0x472   : > { %v864_v28 = vadd.f32 %v854_v27, %v828_v26 }
 0x474   : > { %868 = vst.msk [vmem:[#allocation3] sm:$0xff] %vm567_vm15, %v864_v28 }
 0x479   : > { %v856_v25 = vpop.f32.mrf.mxu1 }
 0x47a   : > { %v865_v29 = vadd.f32 %v856_v25, %v829_v21 }
 0x47c   : > { %869 = vst.msk [vmem:[#allocation3 + $0x8] sm:$0xff] %vm567_vm15, %v865_v29 }
 0x481   : > { %v859_v31 = vpop.f32.mrf.mxu1 }
 0x482   : > { %v866_v32 = vadd.f32 %v859_v31, %v830_v30 }
 0x484   : > { %870 = vst.msk [vmem:[#allocation3 + $0x10] sm:$0xff] %vm567_vm15, %v866_v32 }
 0x488   : > { %875 = sbr.rel (%p1059_p8) target bundleno = 1173 (0x495), region = 60 }
 0x489   : > { %v861_v34 = vpop.f32.mrf.mxu1 }
 0x48a   : > { %v867_v36 = vadd.f32 %v861_v34, %v831_v33 }
 0x48c   : > { %871 = vst.msk [vmem:[#allocation3 + $0x18] sm:$0xff] %vm567_vm15, %v867_v36 }
 0x48d   : > { %v876_v37 = vld [vmem:[#allocation3] sm:$0xff]  ;;  %v877_v35 = vld [vmem:[#allocation3 + $0x8] sm:$0xff]  ;;  %v878_v38 = vld [vmem:[#allocation3 + $0x10] sm:$0xff] }
 0x48e   : > { %880 = vst.msk [vmem:[%s1295_s19] sm:$0xff] %vm567_vm15, %v876_v37 }
 0x48f   : > { %881 = vst.msk [vmem:[%s1295_s19 + $0x8] sm:$0xff] %vm567_vm15, %v877_v35 }
 0x490   : > { %882 = vst.msk [vmem:[%s1295_s19 + $0x10] sm:$0xff] %vm567_vm15, %v878_v38 }
 0x493   : > { %v879_v39 = vld [vmem:[#allocation3 + $0x18] sm:$0xff] }
 0x494   : > { %883 = vst.msk [vmem:[%s1295_s19 + $0x18] sm:$0xff] %vm567_vm15, %v879_v39 }
 0x495 PF: > { %s18_s9 = sadd.s32 1, %s1187_s9   ;;  %s1428_s16 = sld [smem:[#allocation4_spill]] }
 0x496   : > { %p15_p9 = scmp.ge.s32.totalorder %s18_s9, 10   ;;  %s1429_s27 = smov %s1179_s29 }
 0x497   : > { %s1430_s28 = smov %s1183_s30  ;;  %s1431_s29 = smov %s1434_s10 }
 0x498   :  { %17 = sbr.rel (!%p15_p9) target bundleno = 3 (0x3), region = 102 }
 0x49b   : > { %s1432_s30 = smov %s1428_s16 }

// kernel: spatio_temp_transformer_forward.5
= control target key start
LH: loop header
LB: loop body
LE: loop exit
PB: predicated region body
PF: predicated region fallthrough
CT: control target
= control target key end

     0   :  { %s1240_s17 = smov 0   ;;  %s1507_s0 = inlined_call_operand.vmem [shape: f32[64,32], index: 0, kind: input, shape index: {}]   ;;  %s1508_s1 = inlined_call_operand.vmem [shape: f32[1,32], index: 1, kind: input, shape index: {}]   ;;  %s1509_s2 = inlined_call_operand.vmem [shape: f32[1,32], index: 2, kind: input, shape index: {}]   ;;  %s1510_s3 = inlined_call_operand.vmem [shape: bf16[32,32], index: 3, kind: input, shape index: {}]   ;;  %s1511_s4 = inlined_call_operand.vmem [shape: f32[1,32], index: 4, kind: input, shape index: {}]   ;;  %s1512_s5 = inlined_call_operand.vmem [shape: f32[1,32], index: 5, kind: input, shape index: {}]   ;;  %s1513_s6 = inlined_call_operand.vmem [shape: f32[1,32], index: 6, kind: input, shape index: {}]   ;;  %s1514_s7 = inlined_call_operand.vmem [shape: bf16[32,128], index: 7, kind: input, shape index: {}]   ;;  %s1515_s8 = inlined_call_operand.vmem [shape: f32[1,128], index: 8, kind: input, shape index: {}]   ;;  %s1516_s9 = inlined_call_operand.vmem [shape: bf16[128,32], index: 9, kind: input, shape index: {}]   ;;  %s1517_s10 = inlined_call_operand.vmem [shape: f32[1,32], index: 10, kind: input, shape index: {}]   ;;  %s1518_s11 = inlined_call_operand.vmem [shape: f32[64,32], index: 11, kind: output, shape index: {}]  }
   0x1 LB: > { %s1042_s18 = sadd.s32 4294967295, %s1177_s17   ;;  %p1046_p0 = scmp.ge.s32.totalorder %s1177_s17, 1  ;;  %s1177_s17 = sphi %s1240_s17, %s21_s17  }
   0x2   : > { %p338_p1 = scmp.lt.s32.totalorder %s1177_s17, 3 }
   0x4   : > { %p339_p2 = pnand %p1046_p0, %p338_p1 }
   0x5   : > { %s1047_s19 = sshll.u32 (!%p339_p2), %s1042_s18, 2 }
   0x6   : > { %342 = sbr.rel (%p339_p2) target bundleno = 1052 (0x41c), region = 64  ;;  %p379_p3 = scmp.lt.s32.totalorder (!%p339_p2), %s1047_s19, 7 }
   0xb   : > { %s1520_s19 = smov (!%p379_p3, %s1047_s19), 7  ;;  %vm395_vm0 = vcmask 261120   ;;  %v1179_v8 = vmov 32.0   ;;  %v1110_v35 = vld [vmem:[%s1510_s3 + $0x8] sm:$0xff]  ;;  %v1109_v39 = vld [vmem:[%s1510_s3] sm:$0xff] }
   0xc   : > { %s1048_s20 = sshll.u32 %s1520_s19, 3  ;;  %1145 = vrcp.f32 %v1179_v8  ;;  %537 = vmatpush.bf16.msra.mxu0 %v1110_v35 }
   0xd   : > { %s382_s23 = scalar_lea.vmem %s1507_s0, %s1048_s20  ;;  %s388_s13 = scalar_lea.vmem %s1518_s11, %s1048_s20 }
   0xe   : > { %v1256_v0 = vld [vmem:[%s382_s23 + $0x10] sm:$0xff]  ;;  %v1258_v1 = vld [vmem:[%s382_s23] sm:$0xff]  ;;  %v1264_v4 = vld [vmem:[%s382_s23 + $0x18] sm:$0xff] }
   0xf   : > { %v402_v2 = vsel %vm395_vm0, %v1256_v0, 0.0  ;;  %v396_v3 = vsel %vm395_vm0, %v1258_v1, 0.0  ;;  %v1266_v5 = vld [vmem:[%s382_s23 + $0x8] sm:$0xff]  ;;  %v405_v6 = vsel %vm395_vm0, %v1264_v4, 0.0 }
  0x10   : > { %403 = vadd.xlane.f32.xlu1 %v402_v2  ;;  %397 = vadd.xlane.f32.xlu0 %v396_v3  ;;  %v399_v7 = vsel %vm395_vm0, %v1266_v5, 0.0 }
  0x11   : > { %538 = vmatpush.bf16.msra.mxu0 %v1109_v39 }
  0x12   : > { %v1146_v9 = vpop.eup %1145 }
  0x13   : > { %v409_v10 = vmul.f32 32.0, %v1146_v9  ;;  %vm413_vm1 = vweird.f32 %v1146_v9 }
  0x15   : > { %v410_v11 = vsub.f32 1.0, %v409_v10 }
  0x17   : > { %v411_v12 = vmul.f32 %v1146_v9, %v410_v11 }
  0x18   : > { %406 = vadd.xlane.f32.xlu1 %v405_v6  ;;  %400 = vadd.xlane.f32.xlu0 %v399_v7 }
  0x19   : > { %v412_v13 = vadd.f32 %v1146_v9, %v411_v12 }
  0x1b   : > { %v1272_v14 = vsel %vm413_vm1, %v1146_v9, %v412_v13  ;;  %v1138_v9 = vld [vmem:[%s1508_s1] ss:$0 sm:$0xff] }
  0x83   : > { %v404_v15 = vpop.xlane.xlu1 %403  ;;  %v398_v16 = vpop.xlane.xlu0 %397 }
  0x84   : > { %v417_v17 = vmul.f32 %v1272_v14, %v404_v15  ;;  %v415_v18 = vmul.f32 %v1272_v14, %v398_v16 }
  0x86   : > { %v1277_v19 = vsub.f32 %v1256_v0, %v417_v17  ;;  %v419_v20 = vsub.f32 %v1258_v1, %v415_v18  ;;  %v1139_v17 = vld [vmem:[%s1509_s2] ss:$0 sm:$0xff] }
  0x88   : > { %v425_v21 = vmul.f32 %v1277_v19, %v1277_v19  ;;  %v423_v22 = vmul.f32 %v419_v20, %v419_v20 }
  0x8a   : > { %v433_v23 = vsel %vm395_vm0, %v425_v21, 0.0  ;;  %v427_v24 = vsel %vm395_vm0, %v423_v22, 0.0 }
  0x8b   : > { %v407_v25 = vpop.xlane.xlu1 %406  ;;  %434 = vadd.xlane.f32.xlu0 %v433_v23  ;;  %428 = vadd.xlane.f32.xlu2 %v427_v24  ;;  %v401_v26 = vpop.xlane.xlu0 %400 }
  0x8c   : > { %v418_v27 = vmul.f32 %v1272_v14, %v407_v25  ;;  %v416_v28 = vmul.f32 %v1272_v14, %v401_v26 }
  0x8e   : > { %v1287_v29 = vsub.f32 %v1264_v4, %v418_v27  ;;  %v420_v30 = vsub.f32 %v1266_v5, %v416_v28 }
  0x90   : > { %v426_v31 = vmul.f32 %v1287_v29, %v1287_v29  ;;  %v424_v32 = vmul.f32 %v420_v30, %v420_v30 }
  0x92   : > { %v436_v33 = vsel %vm395_vm0, %v426_v31, 0.0  ;;  %v430_v34 = vsel %vm395_vm0, %v424_v32, 0.0 }
  0x93   : > { %437 = vadd.xlane.f32.xlu1 %v436_v33  ;;  %431 = vadd.xlane.f32.xlu2 %v430_v34 }
  0xfe   : > { %v429_v36 = vpop.xlane.xlu2 %428  ;;  %v435_v38 = vpop.xlane.xlu0 %434 }
  0xff   : > { %v439_v37 = vmul.f32 %v429_v36, %v1272_v14  ;;  %v441_v41 = vmul.f32 %v435_v38, %v1272_v14  ;;  %v1140_v36 = vld [vmem:[%s1511_s4] ss:$0 sm:$0xff] }
 0x101   : > { %v443_v40 = vadd.f32 1e-05, %v439_v37  ;;  %v445_v42 = vadd.f32 1e-05, %v441_v41 }
 0x103   : > { %1147 = vrsqrt.f32 %v443_v40  ;;  %vm453_vm3 = vweird.f32 %v443_v40  ;;  %vm473_vm10 = vweird.f32 %v445_v42 }
 0x104   : > { %1149 = vrsqrt.f32 %v445_v42 }
 0x106   : > { %v438_v43 = vpop.xlane.xlu1 %437  ;;  %v432_v44 = vpop.xlane.xlu2 %431 }
 0x107   : > { %v442_v45 = vmul.f32 %v438_v43, %v1272_v14  ;;  %v440_v46 = vmul.f32 %v432_v44, %v1272_v14 }
 0x109   : > { %v1148_v47 = vpop.eup %1147  ;;  %v446_v48 = vadd.f32 1e-05, %v442_v45  ;;  %v444_v49 = vadd.f32 1e-05, %v440_v46 }
 0x10a   : > { %v448_v50 = vmul.f32 %v1148_v47, %v443_v40  ;;  %v1150_v53 = vpop.eup %1149  ;;  %vm454_vm2 = vweird.f32 %v1148_v47 }
 0x10b   : > { %1151 = vrsqrt.f32 %v446_v48  ;;  %v468_v59 = vmul.f32 %v1150_v53, %v445_v42  ;;  %vm455_vm4 = vmor %vm453_vm3, %vm454_vm2  ;;  %vm463_vm6 = vweird.f32 %v444_v49  ;;  %vm483_vm8 = vweird.f32 %v446_v48 }
 0x10c   : > { %v449_v51 = vmul.f32 %v1148_v47, %v448_v50  ;;  %1153 = vrsqrt.f32 %v444_v49  ;;  %vm474_vm11 = vweird.f32 %v1150_v53 }
 0x10d   : > { %v469_v2 = vmul.f32 %v1150_v53, %v468_v59  ;;  %vm475_vm13 = vmor %vm473_vm10, %vm474_vm11 }
 0x10e   : > { %v450_v52 = vmul.f32 0.5, %v449_v51 }
 0x10f   : > { %v470_v10 = vmul.f32 0.5, %v469_v2 }
 0x110   : > { %v451_v54 = vsub.f32 1.5, %v450_v52 }
 0x111   : > { %v1152_v55 = vpop.eup %1151  ;;  %v471_v18 = vsub.f32 1.5, %v470_v10  ;;  %v1111_v10 = vld [vmem:[%s1514_s7] sm:$0xff] }
 0x112   : > { %v1154_v56 = vpop.eup %1153  ;;  %v478_v57 = vmul.f32 %v1152_v55, %v446_v48  ;;  %v452_v58 = vmul.f32 %v1148_v47, %v451_v54  ;;  %vm484_vm9 = vweird.f32 %v1152_v55 }
 0x113   : > { %v458_v60 = vmul.f32 %v1154_v56, %v444_v49  ;;  %vm464_vm5 = vweird.f32 %v1154_v56  ;;  %vm485_vm12 = vmor %vm483_vm8, %vm484_vm9  ;;  %v472_v24 = vmul.f32 %v1150_v53, %v471_v18 }
 0x114   : > { %v479_v61 = vmul.f32 %v1152_v55, %v478_v57  ;;  %v456_v63 = vsel %vm455_vm4, %v1148_v47, %v452_v58  ;;  %vm465_vm7 = vmor %vm463_vm6, %vm464_vm5 }
 0x115   : > { %v459_v62 = vmul.f32 %v1154_v56, %v458_v60  ;;  %v487_v8 = vmul.f32 %v456_v63, %v419_v20  ;;  %v476_v27 = vsel %vm475_vm13, %v1150_v53, %v472_v24 }
 0x116   : > { %v480_v6 = vmul.f32 0.5, %v479_v61 }
 0x117   : > { %v460_v3 = vmul.f32 0.5, %v459_v62  ;;  %v495_v16 = vmul.f32 %v1138_v9, %v487_v8 }
 0x118   : > { %v481_v12 = vsub.f32 1.5, %v480_v6 }
 0x119   : > { %v461_v7 = vsub.f32 1.5, %v460_v3  ;;  %v503_v22 = vadd.f32 %v1139_v17, %v495_v16 }
 0x11a   : > { %v482_v21 = vmul.f32 %v1152_v55, %v481_v12 }
 0x11b   : > { %v462_v11 = vmul.f32 %v1154_v56, %v461_v7  ;;  %v1112_v7 = vld [vmem:[%s1514_s7 + $0x8] sm:$0xff] }
 0x11c   : > { %v486_v26 = vsel %vm485_vm12, %v1152_v55, %v482_v21  ;;  %700 = vmatpush.bf16.msra.mxu1 %v1112_v7  ;;  %v1143_v7 = vld [vmem:[%s1515_s8] ss:$0 sm:$0xff] }
 0x11d   : > { %v466_v13 = vsel %vm465_vm7, %v1154_v56, %v462_v11  ;;  %v490_v28 = vmul.f32 %v486_v26, %v1287_v29 }
 0x11e   : > { %v488_v15 = vmul.f32 %v466_v13, %v420_v30  ;;  %v489_v30 = vmul.f32 %v476_v27, %v1277_v19 }
 0x11f   : > { %v498_v31 = vmul.f32 %v1138_v9, %v490_v28 }
 0x120   : > { %v496_v20 = vmul.f32 %v1138_v9, %v488_v15  ;;  %v497_v32 = vmul.f32 %v1138_v9, %v489_v30  ;;  %701 = vmatpush.bf16.msra.mxu1 %v1111_v10  ;;  %v1119_v10 = vld [vmem:[%s1516_s9 + $0x30] sm:$0xff] }
 0x121   : > { %v506_v33 = vadd.f32 %v1139_v17, %v498_v31 }
 0x122   : > { %v504_v23 = vadd.f32 %v1139_v17, %v496_v20  ;;  %v505_v34 = vadd.f32 %v1139_v17, %v497_v32 }
 0x124   : > { %v507_v25 = vpack.c.bf16 %v504_v23, %v503_v22  ;;  %v508_v35 = vpack.c.bf16 %v506_v33, %v505_v34 }
 0x126   : > { %1059 = vmatmul.msk.bf16.vlgmr.msra.gmra.mxu0 %vm395_vm0, %v507_v25 }
 0x136   : > { %1060 = vmatmul.msk.bf16.gmra.mxu0 %vm395_vm0, %v508_v35 }
 0x1a3   : > { %v540_v37 = vpop.f32.mrf.mxu0 }
 0x1a4   : > { %v550_v38 = vadd.f32 %v540_v37, %v1258_v1 }
 0x1a6   : > { %v1318_v39 = vadd.f32 %v1140_v36, %v550_v38  ;;  %v1141_v38 = vld [vmem:[%s1512_s5] ss:$0 sm:$0xff] }
 0x1a8   : > { %v562_v29 = vsel %vm395_vm0, %v1318_v39, 0.0 }
 0x1a9   : > { %563 = vadd.xlane.f32.xlu2 %v562_v29 }
 0x1ab   : > { %v542_v19 = vpop.f32.mrf.mxu0 }
 0x1ac   : > { %v551_v40 = vadd.f32 %v542_v19, %v1266_v5 }
 0x1ae   : > { %v1323_v41 = vadd.f32 %v1140_v36, %v551_v40 }
 0x1b0   : > { %v565_v42 = vsel %vm395_vm0, %v1323_v41, 0.0 }
 0x1b1   : > { %566 = vadd.xlane.f32.xlu0 %v565_v42 }
 0x1b3   : > { %v545_v43 = vpop.f32.mrf.mxu0 }
 0x1b4   : > { %v552_v44 = vadd.f32 %v545_v43, %v1256_v0 }
 0x1b6   : > { %v1328_v45 = vadd.f32 %v1140_v36, %v552_v44 }
 0x1b8   : > { %v568_v1 = vsel %vm395_vm0, %v1328_v45, 0.0 }
 0x1b9   : > { %569 = vadd.xlane.f32.xlu1 %v568_v1 }
 0x1bb   : > { %v547_v46 = vpop.f32.mrf.mxu0 }
 0x1bc   : > { %v553_v47 = vadd.f32 %v547_v46, %v1264_v4 }
 0x1be   : > { %v1333_v48 = vadd.f32 %v1140_v36, %v553_v47 }
 0x1c0   : > { %v571_v5 = vsel %vm395_vm0, %v1333_v48, 0.0 }
 0x1c1   : > { %572 = vadd.xlane.f32.xlu2 %v571_v5 }
 0x21c   : > { %v564_v49 = vpop.xlane.xlu2 %563 }
 0x21d   : > { %v574_v50 = vmul.f32 %v564_v49, %v1272_v14 }
 0x21f   : > { %v578_v0 = vsub.f32 %v1318_v39, %v574_v50 }
 0x221   : > { %v582_v51 = vmul.f32 %v578_v0, %v578_v0 }
 0x223   : > { %v586_v52 = vsel %vm395_vm0, %v582_v51, 0.0 }
 0x224   : > { %587 = vadd.xlane.f32.xlu0 %v586_v52  ;;  %v567_v53 = vpop.xlane.xlu0 %566 }
 0x225   : > { %v575_v54 = vmul.f32 %v567_v53, %v1272_v14 }
 0x227   : > { %v579_v4 = vsub.f32 %v1323_v41, %v575_v54 }
 0x229   : > { %v583_v55 = vmul.f32 %v579_v4, %v579_v4 }
 0x22b   : > { %v589_v56 = vsel %vm395_vm0, %v583_v55, 0.0 }
 0x22c   : > { %v570_v57 = vpop.xlane.xlu1 %569  ;;  %590 = vadd.xlane.f32.xlu1 %v589_v56 }
 0x22d   : > { %v576_v58 = vmul.f32 %v570_v57, %v1272_v14 }
 0x22f   : > { %v1345_v59 = vsub.f32 %v1328_v45, %v576_v58 }
 0x231   : > { %v584_v60 = vmul.f32 %v1345_v59, %v1345_v59 }
 0x233   : > { %v592_v61 = vsel %vm395_vm0, %v584_v60, 0.0 }
 0x234   : > { %593 = vadd.xlane.f32.xlu2 %v592_v61  ;;  %v573_v62 = vpop.xlane.xlu2 %572 }
 0x235   : > { %v577_v63 = vmul.f32 %v573_v62, %v1272_v14 }
 0x237   : > { %v1352_v2 = vsub.f32 %v1333_v48, %v577_v63 }
 0x239   : > { %v585_v3 = vmul.f32 %v1352_v2, %v1352_v2 }
 0x23b   : > { %v595_v6 = vsel %vm395_vm0, %v585_v3, 0.0 }
 0x23c   : > { %596 = vadd.xlane.f32.xlu0 %v595_v6 }
 0x297   : > { %v588_v8 = vpop.xlane.xlu0 %587 }
 0x298   : > { %v598_v9 = vmul.f32 %v588_v8, %v1272_v14 }
 0x29a   : > { %v602_v11 = vadd.f32 1e-05, %v598_v9 }
 0x29c   : > { %1155 = vrsqrt.f32 %v602_v11  ;;  %vm612_vm15 = vweird.f32 %v602_v11 }
 0x29f   : > { %v591_v12 = vpop.xlane.xlu1 %590 }
 0x2a0   : > { %v599_v13 = vmul.f32 %v591_v12, %v1272_v14 }
 0x2a2   : > { %v1156_v15 = vpop.eup %1155  ;;  %v603_v16 = vadd.f32 1e-05, %v599_v13 }
 0x2a3   : > { %v607_v17 = vmul.f32 %v1156_v15, %v602_v11  ;;  %vm613_vm14 = vweird.f32 %v1156_v15 }
 0x2a4   : > { %1157 = vrsqrt.f32 %v603_v16  ;;  %vm614_vm1 = vmor %vm612_vm15, %vm613_vm14  ;;  %vm622_vm3 = vweird.f32 %v603_v16 }
 0x2a5   : > { %v608_v18 = vmul.f32 %v1156_v15, %v607_v17 }
 0x2a7   : > { %v609_v20 = vmul.f32 0.5, %v608_v18  ;;  %v594_v21 = vpop.xlane.xlu2 %593 }
 0x2a8   : > { %v600_v22 = vmul.f32 %v594_v21, %v1272_v14 }
 0x2a9   : > { %v610_v23 = vsub.f32 1.5, %v609_v20 }
 0x2aa   : > { %v1158_v24 = vpop.eup %1157  ;;  %v604_v25 = vadd.f32 1e-05, %v600_v22  ;;  %v1117_v22 = vld [vmem:[%s1516_s9 + $0x20] sm:$0xff] }
 0x2ab   : > { %v611_v26 = vmul.f32 %v1156_v15, %v610_v23  ;;  %v617_v27 = vmul.f32 %v1158_v24, %v603_v16  ;;  %vm623_vm2 = vweird.f32 %v1158_v24 }
 0x2ac   : > { %1159 = vrsqrt.f32 %v604_v25  ;;  %vm624_vm4 = vmor %vm622_vm3, %vm623_vm2  ;;  %vm632_vm6 = vweird.f32 %v604_v25 }
 0x2ad   : > { %v618_v28 = vmul.f32 %v1158_v24, %v617_v27  ;;  %v615_v30 = vsel %vm614_vm1, %v1156_v15, %v611_v26  ;;  %v1118_v15 = vld [vmem:[%s1516_s9 + $0x28] sm:$0xff] }
 0x2ae   : > { %v646_v36 = vmul.f32 %v615_v30, %v578_v0  ;;  %v1116_v30 = vld [vmem:[%s1516_s9 + $0x18] sm:$0xff] }
 0x2af   : > { %v619_v31 = vmul.f32 0.5, %v618_v28  ;;  %v597_v32 = vpop.xlane.xlu0 %596 }
 0x2b0   : > { %v601_v33 = vmul.f32 %v597_v32, %v1272_v14  ;;  %v654_v44 = vmul.f32 %v1141_v38, %v646_v36  ;;  %v1142_v14 = vld [vmem:[%s1513_s6] ss:$0 sm:$0xff] }
 0x2b1   : > { %v620_v34 = vsub.f32 1.5, %v619_v31 }
 0x2b2   : > { %v1160_v35 = vpop.eup %1159  ;;  %v605_v37 = vadd.f32 1e-05, %v601_v33  ;;  %v662_v49 = vadd.f32 %v1142_v14, %v654_v44  ;;  %v1114_v44 = vld [vmem:[%s1516_s9 + $0x8] sm:$0xff] }
 0x2b3   : > { %v621_v29 = vmul.f32 %v1158_v24, %v620_v34  ;;  %v627_v19 = vmul.f32 %v1160_v35, %v604_v25  ;;  %vm633_vm5 = vweird.f32 %v1160_v35 }
 0x2b4   : > { %1161 = vrsqrt.f32 %v605_v37  ;;  %vm634_vm7 = vmor %vm632_vm6, %vm633_vm5  ;;  %vm642_vm9 = vweird.f32 %v605_v37 }
 0x2b5   : > { %v625_v40 = vsel %vm624_vm4, %v1158_v24, %v621_v29  ;;  %v628_v42 = vmul.f32 %v1160_v35, %v627_v19  ;;  %v1115_v29 = vld [vmem:[%s1516_s9 + $0x10] sm:$0xff] }
 0x2b6   : > { %v647_v43 = vmul.f32 %v625_v40, %v579_v4 }
 0x2b7   : > { %v629_v1 = vmul.f32 0.5, %v628_v42 }
 0x2b8   : > { %v655_v46 = vmul.f32 %v1141_v38, %v647_v43 }
 0x2b9   : > { %v630_v47 = vsub.f32 1.5, %v629_v1 }
 0x2ba   : > { %v1162_v5 = vpop.eup %1161  ;;  %v663_v50 = vadd.f32 %v1142_v14, %v655_v46 }
 0x2bb   : > { %v631_v0 = vmul.f32 %v1160_v35, %v630_v47  ;;  %v637_v51 = vmul.f32 %v1162_v5, %v605_v37  ;;  %vm643_vm8 = vweird.f32 %v1162_v5 }
 0x2bc   : > { %v666_v52 = vpack.c.bf16 %v663_v50, %v662_v49  ;;  %vm644_vm10 = vmor %vm642_vm9, %vm643_vm8 }
 0x2bd   : > { %v638_v53 = vmul.f32 %v1162_v5, %v637_v51  ;;  %v635_v54 = vsel %vm634_vm7, %v1160_v35, %v631_v0 }
 0x2be   : > { %1069 = vmatmul.msk.bf16.vlgmr.msra.gmra.mxu1 %vm395_vm0, %v666_v52  ;;  %v648_v56 = vmul.f32 %v635_v54, %v1345_v59  ;;  %v1120_v59 = vld [vmem:[%s1516_s9 + $0x38] sm:$0xff] }
 0x2bf   : > { %v639_v4 = vmul.f32 0.5, %v638_v53  ;;  %959 = vmatpush.bf16.msra.mxu2 %v1120_v59  ;;  %1121 = vmatpush.bf16.msra.mxu3 %v1120_v59  ;;  %v1113_v53 = vld [vmem:[%s1516_s9] sm:$0xff] }
 0x2c0   : > { %v656_v61 = vmul.f32 %v1141_v38, %v648_v56 }
 0x2c1   : > { %v640_v55 = vsub.f32 1.5, %v639_v4 }
 0x2c2   : > { %v664_v63 = vadd.f32 %v1142_v14, %v656_v61 }
 0x2c3   : > { %v641_v57 = vmul.f32 %v1162_v5, %v640_v55  ;;  %960 = vmatpush.bf16.msra.mxu2 %v1119_v10  ;;  %1122 = vmatpush.bf16.msra.mxu3 %v1119_v10 }
 0x2c5   : > { %v645_v58 = vsel %vm644_vm10, %v1162_v5, %v641_v57 }
 0x2c6   : > { %v649_v60 = vmul.f32 %v645_v58, %v1352_v2 }
 0x2c7   : > { %961 = vmatpush.bf16.msra.mxu2 %v1118_v15  ;;  %1123 = vmatpush.bf16.msra.mxu3 %v1118_v15 }
 0x2c8   : > { %v657_v62 = vmul.f32 %v1141_v38, %v649_v60 }
 0x2ca   : > { %v665_v3 = vadd.f32 %v1142_v14, %v657_v62 }
 0x2cb   : > { %962 = vmatpush.bf16.msra.mxu2 %v1117_v22  ;;  %1124 = vmatpush.bf16.msra.mxu3 %v1117_v22 }
 0x2cc   : > { %v667_v6 = vpack.c.bf16 %v665_v3, %v664_v63 }
 0x2ce   : > { %1070 = vmatmul.msk.bf16.gmra.mxu1 %vm395_vm0, %v667_v6 }
 0x2cf   : > { %963 = vmatpush.bf16.msra.mxu2 %v1116_v30  ;;  %1125 = vmatpush.bf16.msra.mxu3 %v1116_v30 }
 0x2d3   : > { %964 = vmatpush.bf16.msra.mxu2 %v1115_v29  ;;  %1126 = vmatpush.bf16.msra.mxu3 %v1115_v29 }
 0x2d7   : > { %965 = vmatpush.bf16.msra.mxu2 %v1114_v44  ;;  %1127 = vmatpush.bf16.msra.mxu3 %v1114_v44 }
 0x2db   : > { %966 = vmatpush.bf16.msra.mxu2 %v1113_v53  ;;  %1128 = vmatpush.bf16.msra.mxu3 %v1113_v53 }
 0x33b   : > { %v703_v8 = vpop.f32.mrf.mxu1 }
 0x33c   : > { %v1383_v9 = vadd.f32 %v1143_v7, %v703_v8 }
 0x33e   : > { %v1386_v2 = vmul.f32 0.70710677, %v1383_v9 }
 0x340   : > { %v721_v11 = vmul.f32 %v1386_v2, %v1386_v2 }
 0x342   : > { %v1393_v12 = vmin.f32 %v721_v11, 16.0 }
 0x343   : > { %v705_v13 = vpop.f32.mrf.mxu1 }
 0x344   : > { %v723_v16 = vmul.f32 2.1237322e-06, %v1393_v12  ;;  %v1399_v17 = vadd.f32 %v1143_v7, %v705_v13  ;;  %v734_v18 = vmul.f32 3.8918573e-05, %v1393_v12 }
 0x346   : > { %v724_v20 = vadd.f32 0.00028619796, %v723_v16  ;;  %v1403_v21 = vmul.f32 0.70710677, %v1399_v17  ;;  %v735_v23 = vadd.f32 0.001143296, %v734_v18 }
 0x348   : > { %v761_v24 = vmul.f32 %v1403_v21, %v1403_v21  ;;  %v736_v25 = vmul.f32 %v735_v23, %v1393_v12  ;;  %v725_v26 = vmul.f32 %v724_v20, %v1393_v12 }
 0x34a   : > { %v1412_v27 = vmin.f32 %v761_v24, 16.0  ;;  %v737_v31 = vadd.f32 0.014752088, %v736_v25  ;;  %v726_v36 = vadd.f32 0.0036580483, %v725_v26 }
 0x34b   : > { %v708_v28 = vpop.f32.mrf.mxu1 }
 0x34c   : > { %v763_v32 = vmul.f32 2.1237322e-06, %v1412_v27  ;;  %v1418_v33 = vadd.f32 %v1143_v7, %v708_v28  ;;  %v774_v34 = vmul.f32 3.8918573e-05, %v1412_v27  ;;  %v738_v35 = vmul.f32 %v737_v31, %v1393_v12 }
 0x34d   : > { %v727_v1 = vmul.f32 %v726_v36, %v1393_v12 }
 0x34e   : > { %v764_v37 = vadd.f32 0.00028619796, %v763_v32  ;;  %v1423_v38 = vmul.f32 0.70710677, %v1418_v33  ;;  %v739_v19 = vadd.f32 0.112945676, %v738_v35 }
 0x34f   : > { %v775_v42 = vadd.f32 0.001143296, %v774_v34  ;;  %v728_v55 = vadd.f32 0.05243302, %v727_v1 }
 0x350   : > { %v765_v40 = vmul.f32 %v764_v37, %v1412_v27  ;;  %v801_v43 = vmul.f32 %v1423_v38, %v1423_v38  ;;  %v740_v14 = vmul.f32 %v739_v19, %v1393_v12 }
 0x351   : > { %v776_v47 = vmul.f32 %v775_v42, %v1412_v27  ;;  %v729_v6 = vmul.f32 %v728_v55, %v1393_v12 }
 0x352   : > { %v766_v46 = vadd.f32 0.0036580483, %v765_v40  ;;  %v1437_v5 = vmin.f32 %v801_v43, 16.0  ;;  %v741_v50 = vadd.f32 0.4994258, %v740_v14 }
 0x353   : > { %v710_v49 = vpop.f32.mrf.mxu1  ;;  %v777_v51 = vadd.f32 0.014752088, %v776_v47  ;;  %v730_v20 = vadd.f32 0.18741608, %v729_v6 }
 0x354   : > { %v1439_v0 = vadd.f32 %v1143_v7, %v710_v49  ;;  %v803_v52 = vmul.f32 2.1237322e-06, %v1437_v5  ;;  %v742_v54 = vmul.f32 %v741_v50, %v1393_v12  ;;  %v814_v4 = vmul.f32 3.8918573e-05, %v1437_v5 }
 0x355   : > { %v767_v56 = vmul.f32 %v766_v46, %v1412_v27  ;;  %v778_v57 = vmul.f32 %v777_v51, %v1412_v27  ;;  %v731_v37 = vmul.f32 %v730_v20, %v1393_v12 }
 0x356   : > { %v804_v58 = vadd.f32 0.00028619796, %v803_v52  ;;  %v1450_v60 = vmul.f32 0.70710677, %v1439_v0  ;;  %v743_v61 = vadd.f32 1.0, %v742_v54 }
 0x357   : > { %v779_v62 = vadd.f32 0.112945676, %v778_v57  ;;  %v815_v63 = vadd.f32 0.001143296, %v814_v4  ;;  %v768_v7 = vadd.f32 0.05243302, %v767_v56 }
 0x358   : > { %v841_v3 = vmul.f32 %v1450_v60, %v1450_v60  ;;  %1163 = vrcp.f32 %v743_v61  ;;  %v805_v59 = vmul.f32 %v804_v58, %v1437_v5  ;;  %v755_v42 = vand.u32 2147483648, %v743_v61 }
 0x359   : > { %v780_v8 = vmul.f32 %v779_v62, %v1412_v27  ;;  %v816_v11 = vmul.f32 %v815_v63, %v1437_v5  ;;  %v769_v22 = vmul.f32 %v768_v7, %v1412_v27  ;;  %v753_v46 = vand.u32 2147483647, %v743_v61 }
 0x35a   : > { %v1457_v10 = vmin.f32 %v841_v3, 16.0  ;;  %v806_v25 = vadd.f32 0.0036580483, %v805_v59  ;;  %vm749_vm12 = vweird.f32 %v743_v61  ;;  %v732_v51 = vadd.f32 1.1283791, %v731_v37 }
 0x35b   : > { %v781_v13 = vadd.f32 0.4994258, %v780_v8  ;;  %v817_v16 = vadd.f32 0.014752088, %v816_v11  ;;  %v770_v19 = vadd.f32 0.18741608, %v769_v22 }
 0x35c   : > { %v843_v15 = vmul.f32 2.1237322e-06, %v1457_v10  ;;  %v854_v18 = vmul.f32 3.8918573e-05, %v1457_v10  ;;  %v807_v40 = vmul.f32 %v806_v25, %v1437_v5  ;;  %v756_v56 = vor.u32 1.1754944e-38, %v755_v42 }
 0x35d   : > { %v782_v23 = vmul.f32 %v781_v13, %v1412_v27  ;;  %v818_v28 = vmul.f32 %v817_v16, %v1437_v5  ;;  %v771_v12 = vmul.f32 %v770_v19, %v1412_v27  ;;  %vm754_vm14 = vcmp.eq.f32.partialorder %v753_v46, 8.507059e+37 }
 0x35e   : > { %v1164_v24 = vpop.eup %1163  ;;  %v844_v26 = vadd.f32 0.00028619796, %v843_v15  ;;  %v855_v30 = vadd.f32 0.001143296, %v854_v18  ;;  %v808_v52 = vadd.f32 0.05243302, %v807_v40  ;;  %v733_v3 = vmul.f32 %v732_v51, %v1386_v2 }
 0x35f   : > { %v745_v31 = vmul.f32 %v1164_v24, %v743_v61  ;;  %v783_v32 = vadd.f32 1.0, %v782_v23  ;;  %v819_v35 = vadd.f32 0.112945676, %v818_v28  ;;  %vm750_vm11 = vweird.f32 %v1164_v24 }
 0x360   : > { %v845_v34 = vmul.f32 %v844_v26, %v1457_v10  ;;  %v856_v36 = vmul.f32 %v855_v30, %v1457_v10  ;;  %vm751_vm13 = vmor %vm749_vm12, %vm750_vm11  ;;  %v772_v6 = vadd.f32 1.1283791, %v771_v12  ;;  %v809_v27 = vmul.f32 %v808_v52, %v1437_v5 }
 0x361   : > { %v746_v29 = vsub.f32 1.0, %v745_v31  ;;  %1165 = vrcp.f32 %v783_v32  ;;  %v820_v43 = vmul.f32 %v819_v35, %v1437_v5  ;;  %v793_v59 = vand.u32 2147483647, %v783_v32 }
 0x362   : > { %v846_v44 = vadd.f32 0.0036580483, %v845_v34  ;;  %v857_v1 = vadd.f32 0.014752088, %v856_v36  ;;  %v795_v11 = vand.u32 2147483648, %v783_v32  ;;  %vm789_vm1 = vweird.f32 %v783_v32 }
 0x363   : > { %v747_v14 = vmul.f32 %v1164_v24, %v746_v29  ;;  %v821_v47 = vadd.f32 0.4994258, %v820_v43  ;;  %v773_v22 = vmul.f32 %v772_v6, %v1403_v21  ;;  %v810_v23 = vadd.f32 0.18741608, %v809_v27 }
 0x364   : > { %v858_v50 = vmul.f32 %v857_v1, %v1457_v10  ;;  %v847_v4 = vmul.f32 %v846_v44, %v1457_v10  ;;  %vm794_vm3 = vcmp.eq.f32.partialorder %v793_v59, 8.507059e+37  ;;  %v796_v2 = vor.u32 1.1754944e-38, %v795_v11 }
 0x365   : > { %v748_v49 = vadd.f32 %v1164_v24, %v747_v14  ;;  %v822_v53 = vmul.f32 %v821_v47, %v1437_v5  ;;  %v713_v19 = vmul.f32 0.5, %v1383_v9  ;;  %v714_v40 = vmul.f32 0.5, %v1399_v17 }
 0x366   : > { %v859_v57 = vadd.f32 0.112945676, %v858_v50  ;;  %v848_v8 = vadd.f32 0.05243302, %v847_v4  ;;  %v716_v59 = vmul.f32 0.5, %v1439_v0 }
 0x367   : > { %v1166_v54 = vpop.eup %1165  ;;  %v752_v55 = vsel %vm751_vm13, %v1164_v24, %v748_v49  ;;  %v823_v63 = vadd.f32 1.0, %v822_v53 }
 0x368   : > { %v785_v58 = vmul.f32 %v1166_v54, %v783_v32  ;;  %v757_v62 = vsel %vm754_vm14, %v756_v56, %v752_v55  ;;  %v860_v61 = vmul.f32 %v859_v57, %v1457_v10  ;;  %vm790_vm15 = vweird.f32 %v1166_v54 }
 0x369   : > { %1167 = vrcp.f32 %v823_v63  ;;  %v758_v13 = vmul.f32 %v757_v62, %v733_v3  ;;  %vm791_vm2 = vmor %vm789_vm1, %vm790_vm15  ;;  %v849_v24 = vmul.f32 %v848_v8, %v1457_v10  ;;  %v811_v32 = vmul.f32 %v810_v23, %v1437_v5 }
 0x36a   : > { %v786_v7 = vsub.f32 1.0, %v785_v58  ;;  %v861_v16 = vadd.f32 0.4994258, %v860_v61  ;;  %v835_v42 = vand.u32 2147483648, %v823_v63  ;;  %v833_v14 = vand.u32 2147483647, %v823_v63 }
 0x36b   : > { %v1071_v25 = vclamps-f32 %v758_v13, 1.0  ;;  %v850_v36 = vadd.f32 0.18741608, %v849_v24  ;;  %v812_v1 = vadd.f32 1.1283791, %v811_v32  ;;  %vm829_vm5 = vweird.f32 %v823_v63 }
 0x36c   : > { %v787_v15 = vmul.f32 %v1166_v54, %v786_v7  ;;  %v862_v20 = vmul.f32 %v861_v16, %v1457_v10  ;;  %v836_v51 = vor.u32 1.1754944e-38, %v835_v42  ;;  %vm834_vm7 = vcmp.eq.f32.partialorder %v833_v14, 8.507059e+37 }
 0x36d   : > { %v881_v29 = vadd.f32 1.0, %v1071_v25  ;;  %v851_v47 = vmul.f32 %v850_v36, %v1457_v10  ;;  %v813_v17 = vmul.f32 %v812_v1, %v1423_v38  ;;  %v715_v8 = vmul.f32 0.5, %v1418_v33 }
 0x36e   : > { %v788_v18 = vadd.f32 %v1166_v54, %v787_v15  ;;  %v863_v28 = vadd.f32 1.0, %v862_v20 }
 0x36f   : > { %v1168_v30 = vpop.eup %1167  ;;  %v885_v49 = vmul.f32 %v881_v29, %v713_v19  ;;  %v852_v4 = vadd.f32 1.1283791, %v851_v47 }
 0x370   : > { %v792_v26 = vsel %vm791_vm2, %v1166_v54, %v788_v18  ;;  %v825_v35 = vmul.f32 %v1168_v30, %v823_v63  ;;  %1169 = vrcp.f32 %v863_v28  ;;  %vm830_vm4 = vweird.f32 %v1168_v30 }
 0x371   : > { %v797_v31 = vsel %vm794_vm3, %v796_v2, %v792_v26  ;;  %vm831_vm6 = vmor %vm829_vm5, %vm830_vm4  ;;  %v875_v55 = vand.u32 2147483648, %v863_v28  ;;  %v873_v10 = vand.u32 2147483647, %v863_v28  ;;  %vm869_vm9 = vweird.f32 %v863_v28 }
 0x372   : > { %v798_v34 = vmul.f32 %v797_v31, %v773_v22  ;;  %v826_v21 = vsub.f32 1.0, %v825_v35  ;;  %v853_v63 = vmul.f32 %v852_v4, %v1450_v60  ;;  %v1144_v60 = vld [vmem:[%s1517_s10] ss:$0 sm:$0xff] }
 0x373   : > { %v876_v62 = vor.u32 1.1754944e-38, %v875_v55  ;;  %vm874_vm11 = vcmp.eq.f32.partialorder %v873_v10, 8.507059e+37 }
 0x374   : > { %v1072_v37 = vclamps-f32 %v798_v34, 1.0  ;;  %v827_v44 = vmul.f32 %v1168_v30, %v826_v21 }
 0x376   : > { %v882_v43 = vadd.f32 1.0, %v1072_v37  ;;  %v1170_v46 = vpop.eup %1169  ;;  %v828_v50 = vadd.f32 %v1168_v30, %v827_v44 }
 0x377   : > { %v865_v12 = vmul.f32 %v1170_v46, %v863_v28  ;;  %vm870_vm8 = vweird.f32 %v1170_v46 }
 0x378   : > { %v886_v5 = vmul.f32 %v882_v43, %v714_v40  ;;  %v832_v9 = vsel %vm831_vm6, %v1168_v30, %v828_v50  ;;  %vm871_vm10 = vmor %vm869_vm9, %vm870_vm8 }
 0x379   : > { %v837_v53 = vsel %vm834_vm7, %v836_v51, %v832_v9  ;;  %v866_v54 = vsub.f32 1.0, %v865_v12 }
 0x37a   : > { %v889_v52 = vpack.c.bf16 %v886_v5, %v885_v49  ;;  %v838_v56 = vmul.f32 %v837_v53, %v813_v17 }
 0x37b   : > { %v867_v57 = vmul.f32 %v1170_v46, %v866_v54 }
 0x37c   : > { %967 = vmatmul.bf16.vlgmr.msra.gmra.mxu2 %v889_v52  ;;  %v1073_v61 = vclamps-f32 %v838_v56, 1.0 }
 0x37d   : > { %v868_v58 = vadd.f32 %v1170_v46, %v867_v57 }
 0x37e   : > { %v883_v7 = vadd.f32 1.0, %v1073_v61 }
 0x37f   : > { %v872_v3 = vsel %vm871_vm10, %v1170_v46, %v868_v58 }
 0x380   : > { %v877_v38 = vsel %vm874_vm11, %v876_v62, %v872_v3  ;;  %v887_v13 = vmul.f32 %v883_v7, %v715_v8 }
 0x381   : > { %v878_v6 = vmul.f32 %v877_v38, %v853_v63 }
 0x383   : > { %v1074_v27 = vclamps-f32 %v878_v6, 1.0 }
 0x385   : > { %v884_v11 = vadd.f32 1.0, %v1074_v27 }
 0x387   : > { %v888_v15 = vmul.f32 %v884_v11, %v716_v59 }
 0x389   : > { %v890_v16 = vpack.c.bf16 %v888_v15, %v887_v13 }
 0x38b   : > { %972 = vmatmul.bf16.vlgmr.msra.gmra.mxu3 %v890_v16 }
 0x3ff   : > { %v968_v18 = vpop.f32.mrf.mxu2 }
 0x400   : > { %v969_v20 = vadd.f32 %v1144_v60, %v968_v18 }
 0x402   : > { %v978_v33 = vadd.f32 %v969_v20, %v1318_v39 }
 0x404   : > { %982 = vst.msk [vmem:[%s388_s13] sm:$0xff] %vm395_vm0, %v978_v33 }
 0x407   : > { %v970_v0 = vpop.f32.mrf.mxu2 }
 0x408   : > { %v971_v22 = vadd.f32 %v1144_v60, %v970_v0 }
 0x40a   : > { %v979_v23 = vadd.f32 %v971_v22, %v1323_v41 }
 0x40c   : > { %983 = vst.msk [vmem:[%s388_s13 + $0x8] sm:$0xff] %vm395_vm0, %v979_v23 }
 0x40e   : > { %v973_v2 = vpop.f32.mrf.mxu3 }
 0x40f   : > { %v974_v24 = vadd.f32 %v1144_v60, %v973_v2 }
 0x411   : > { %v980_v25 = vadd.f32 %v974_v24, %v1328_v45 }
 0x413   : > { %984 = vst.msk [vmem:[%s388_s13 + $0x10] sm:$0xff] %vm395_vm0, %v980_v25 }
 0x416   : > { %v975_v26 = vpop.f32.mrf.mxu3 }
 0x417   : > { %v976_v28 = vadd.f32 %v1144_v60, %v975_v26 }
 0x419   : > { %v981_v30 = vadd.f32 %v976_v28, %v1333_v48 }
 0x41b   : > { %985 = vst.msk [vmem:[%s388_s13 + $0x18] sm:$0xff] %vm395_vm0, %v981_v30 }
 0x41c PF: > { %s21_s17 = sadd.s32 1, %s1177_s17  }
 0x41d   : > { %p18_p4 = scmp.ge.s32.totalorder %s21_s17, 4  }
 0x41f   :  { %20 = sbr.rel (!%p18_p4) target bundleno = 1 (0x1), region = 94 }

// kernel: spatio_temp_transformer_forward.3
= control target key start
LH: loop header
LB: loop body
LE: loop exit
PB: predicated region body
PF: predicated region fallthrough
CT: control target
= control target key end

     0   :  { %s1077_s12 = smov 0   ;;  %s1651_s0 = inlined_call_operand.vmem [shape: f32[2,2,4,4,32], index: 0, kind: input, shape index: {}]   ;;  %s1652_s1 = inlined_call_operand.vmem [shape: f32[27,32], index: 1, kind: input, shape index: {}]   ;;  %s1653_s2 = inlined_call_operand.vmem [shape: f32[1,32], index: 2, kind: input, shape index: {}]   ;;  %s1654_s3 = inlined_call_operand.vmem [shape: f32[2,2,4,4,32], index: 3, kind: output, shape index: {}]  }
   0x1 LB: > { %s998_s13 = sadd.s32 4294967295, %s1054_s12   ;;  %p1002_p0 = scmp.ge.s32.totalorder %s1054_s12, 1  ;;  %s1054_s12 = sphi %s1077_s12, %s13_s12  }
   0x2   : > { %p137_p1 = scmp.lt.s32.totalorder %s1054_s12, 3 }
   0x4   : > { %p138_p2 = pnand %p1002_p0, %p137_p1 }
   0x5   : > { %p161_p3 = scmp.lt.s32.totalorder (!%p138_p2), %s998_s13, 1 }
   0x6   : > { %141 = sbr.rel (%p138_p2) target bundleno = 150 (0x96), region = 32 }
   0xb   : > { %vm179_vm0 = vcmask 259072   ;;  %v1056_v0 = vmov 0.0   ;;  %s1656_s13 = smov (!%p161_p3, %s998_s13), 1  ;;  %v1094_v1 = vld [vmem:[%s1653_s2] ss:$0 sm:$0xff]  ;;  %vm205_vm1 = vcmask 257024  }
   0xc   : > { %180 = vst.msk [vmem:[#allocation2] sm:$0x3f] %vm179_vm0, %v1056_v0  ;;  %v1101_v2 = vld [vmem:[%s1652_s1] ss:$0 sm:$0xff]  ;;  %s1009_s18 = sshll.u32 %s1656_s13, 5 }
   0xd   : > { %181 = vst.msk [vmem:[#allocation2 + $0x8] sm:$0x3f] %vm179_vm0, %v1056_v0  ;;  %s1113_s21 = scalar_lea.vmem %s1651_s0, %s1009_s18  ;;  %v1118_v3 = vld [vmem:[%s1652_s1 + $0x1] ss:$0 sm:$0xff]  ;;  %v1129_v6 = vld [vmem:[%s1652_s1 + $0x2] ss:$0 sm:$0xff]  ;;  %s1548_s28 = scalar_lea.vmem %s1654_s3, %s1009_s18 }
   0xe   : > { %182 = vst.msk [vmem:[#allocation2 + $0x10] sm:$0x3f] %vm179_vm0, %v1056_v0  ;;  %v171_v4 = vld [vmem:[%s1113_s21] sm:$0xf]  ;;  %v1155_v18 = vld [vmem:[%s1652_s1 + $0x4] ss:$0 sm:$0xff] }
   0xf   : > { %183 = vst.msk [vmem:[#allocation2 + $0x18] sm:$0x3f] %vm179_vm0, %v1056_v0  ;;  %v218_v5 = vadd.f32 %v1094_v1, %v171_v4  ;;  %v1140_v12 = vld [vmem:[%s1652_s1 + $0x3] ss:$0 sm:$0xff]  ;;  %v1164_v21 = vld [vmem:[%s1652_s1 + $0x5] ss:$0 sm:$0xff] }
  0x10   : > { %184 = vst.msk [vmem:[#allocation2 + $0x20] sm:$0x3f] %vm179_vm0, %v1056_v0  ;;  %v1174_v25 = vld [vmem:[%s1652_s1 + $0x6] ss:$0 sm:$0xff]  ;;  %v1184_v29 = vld [vmem:[%s1652_s1 + $0x7] ss:$0 sm:$0xff] }
  0x11   : > { %185 = vst.msk [vmem:[#allocation2 + $0x28] sm:$0x3f] %vm179_vm0, %v1056_v0  ;;  %v1199_v36 = vld [vmem:[%s1652_s1 + $0x8] ss:$0 sm:$0xff]  ;;  %v172_v37 = vld [vmem:[%s1113_s21 + $0x4] sm:$0xf] }
  0x12   : > { %186 = vst.msk [vmem:[#allocation2 + $0x30] sm:$0x3f] %vm179_vm0, %v1056_v0  ;;  %v219_v38 = vadd.f32 %v1094_v1, %v172_v37  ;;  %v1213_v49 = vld [vmem:[%s1652_s1 + $0x9] ss:$0 sm:$0xff]  ;;  %v1224_v63 = vld [vmem:[%s1652_s1 + $0xa] ss:$0 sm:$0xff] }
  0x13   : > { %187 = vst.msk [vmem:[#allocation2 + $0x38] sm:$0x3f] %vm179_vm0, %v1056_v0  ;;  %v226_v7 = vld [vmem:[#allocation2] sm:$0xf]  ;;  %v173_v53 = vld [vmem:[%s1113_s21 + $0x8] sm:$0xf] }
  0x14   : > { %v252_v8 = vld [vmem:[#allocation2 + $0x1] sm:$0xf]  ;;  %188 = vst.msk [vmem:[#allocation2 + $0x40] sm:$0x3f] %vm179_vm0, %v1056_v0  ;;  %v236_v9 = vmul.f32 %v1101_v2, %v226_v7  ;;  %v305_v13 = vld [vmem:[#allocation2 + $0x8] sm:$0xf]  ;;  %v220_v59 = vadd.f32 %v1094_v1, %v173_v53 }
  0x15   : > { %v262_v10 = vmul.f32 %v1118_v3, %v252_v8  ;;  %v278_v11 = vld [vmem:[#allocation2 + $0x2] sm:$0xf]  ;;  %189 = vst.msk [vmem:[#allocation2 + $0x48] sm:$0x3f] %vm179_vm0, %v1056_v0  ;;  %v315_v17 = vmul.f32 %v1140_v12, %v305_v13  ;;  %v331_v19 = vld [vmem:[#allocation2 + $0x9] sm:$0xf] }
  0x16   : > { %190 = vst.msk [vmem:[#allocation2 + $0x50] sm:$0x3f] %vm179_vm0, %v1056_v0  ;;  %v244_v14 = vadd.f32 %v236_v9, %v218_v5  ;;  %v288_v15 = vmul.f32 %v1129_v6, %v278_v11  ;;  %v357_v22 = vld [vmem:[#allocation2 + $0xa] sm:$0xf]  ;;  %v341_v24 = vmul.f32 %v1155_v18, %v331_v19  ;;  %v384_v26 = vld [vmem:[#allocation2 + $0x10] sm:$0xf] }
  0x17   : > { %191 = vst.msk [vmem:[#allocation2 + $0x58] sm:$0x3f] %vm179_vm0, %v1056_v0  ;;  %v367_v28 = vmul.f32 %v1164_v21, %v357_v22  ;;  %v410_v30 = vld [vmem:[#allocation2 + $0x11] sm:$0xf]  ;;  %v394_v32 = vmul.f32 %v1174_v25, %v384_v26  ;;  %v227_v39 = vld [vmem:[#allocation2 + $0x8] sm:$0xf] }
  0x18   : > { %192 = vst.msk [vmem:[#allocation2 + $0x60] sm:$0x3f] %vm179_vm0, %v1056_v0  ;;  %v270_v16 = vadd.f32 %v262_v10, %v244_v14  ;;  %v436_v33 = vld [vmem:[#allocation2 + $0x12] sm:$0xf]  ;;  %v420_v35 = vmul.f32 %v1184_v29, %v410_v30  ;;  %v253_v40 = vld [vmem:[#allocation2 + $0x9] sm:$0xf]  ;;  %v237_v42 = vmul.f32 %v1101_v2, %v227_v39 }
  0x19   : > { %193 = vst.msk [vmem:[#allocation2 + $0x68] sm:$0x3f] %vm179_vm0, %v1056_v0  ;;  %v263_v43 = vmul.f32 %v1118_v3, %v253_v40  ;;  %v279_v44 = vld [vmem:[#allocation2 + $0xa] sm:$0xf]  ;;  %v306_v45 = vld [vmem:[#allocation2 + $0x10] sm:$0xf]  ;;  %v446_v47 = vmul.f32 %v1199_v36, %v436_v33 }
  0x1a   : > { %194 = vst.msk [vmem:[#allocation2 + $0x70] sm:$0x3f] %vm179_vm0, %v1056_v0  ;;  %v296_v20 = vadd.f32 %v288_v15, %v270_v16  ;;  %v387_v46 = vld [vmem:[#allocation2 + $0x28] sm:$0xf]  ;;  %v463_v48 = vld [vmem:[#allocation2 + $0x30] sm:$0xf]  ;;  %v245_v50 = vadd.f32 %v237_v42, %v219_v38  ;;  %v289_v51 = vmul.f32 %v1129_v6, %v279_v44  ;;  %v316_v52 = vmul.f32 %v1140_v12, %v306_v45 }
  0x1b   : > { %195 = vst.msk [vmem:[#allocation2 + $0x78] sm:$0x3f] %vm179_vm0, %v1056_v0  ;;  %v228_v54 = vld [vmem:[#allocation2 + $0x10] sm:$0xf]  ;;  %v413_v56 = vld [vmem:[#allocation2 + $0x29] sm:$0xf]  ;;  %v473_v5 = vmul.f32 %v1213_v49, %v463_v48  ;;  %v1234_v14 = vmul.f32 %v1174_v25, %v387_v46 }
  0x1c   : > { %196 = vst.msk [vmem:[#allocation2 + $0x80] sm:$0x3f] %vm179_vm0, %v1056_v0  ;;  %v323_v23 = vadd.f32 %v315_v17, %v296_v20  ;;  %v254_v55 = vld [vmem:[#allocation2 + $0x11] sm:$0xf]  ;;  %v271_v58 = vadd.f32 %v263_v43, %v245_v50  ;;  %v238_v60 = vmul.f32 %v1101_v2, %v228_v54  ;;  %v439_v62 = vld [vmem:[#allocation2 + $0x2a] sm:$0xf]  ;;  %v1238_v20 = vmul.f32 %v1184_v29, %v413_v56 }
  0x1d   : > { %197 = vst.msk [vmem:[#allocation2 + $0x88] sm:$0x3f] %vm179_vm0, %v1056_v0  ;;  %v280_v61 = vld [vmem:[#allocation2 + $0x12] sm:$0xf]  ;;  %v1231_v8 = vld [vmem:[%s1652_s1 + $0xb] ss:$0 sm:$0xff] }
  0x1e   : > { %198 = vst.msk [vmem:[#allocation2 + $0x90] sm:$0x3f] %vm179_vm0, %v1056_v0  ;;  %v349_v27 = vadd.f32 %v341_v24, %v323_v23  ;;  %v489_v7 = vld [vmem:[#allocation2 + $0x31] sm:$0xf]  ;;  %v297_v9 = vadd.f32 %v289_v51, %v271_v58  ;;  %v246_v10 = vadd.f32 %v238_v60, %v220_v59  ;;  %v307_v11 = vld [vmem:[#allocation2 + $0x18] sm:$0xf]  ;;  %v290_v17 = vmul.f32 %v1129_v6, %v280_v61 }
  0x1f   : > { %199 = vst.msk [vmem:[#allocation2 + $0x98] sm:$0x3f] %vm179_vm0, %v1056_v0  ;;  %v515_v13 = vld [vmem:[#allocation2 + $0x32] sm:$0xf]  ;;  %v385_v16 = vld [vmem:[#allocation2 + $0x18] sm:$0xf] }
  0x20   : > { %200 = vst.msk [vmem:[#allocation2 + $0xa0] sm:$0x3f] %vm179_vm0, %v1056_v0  ;;  %v375_v31 = vadd.f32 %v367_v28, %v349_v27  ;;  %v358_v15 = vld [vmem:[#allocation2 + $0x12] sm:$0xf]  ;;  %v324_v22 = vadd.f32 %v316_v52, %v297_v9  ;;  %v411_v24 = vld [vmem:[#allocation2 + $0x19] sm:$0xf]  ;;  %v499_v27 = vmul.f32 %v1224_v63, %v489_v7  ;;  %v1244_v28 = vmul.f32 %v1199_v36, %v439_v62 }
  0x21   : > { %201 = vst.msk [vmem:[#allocation2 + $0xa8] sm:$0x3f] %vm179_vm0, %v1056_v0  ;;  %v174_v26 = vld [vmem:[%s1113_s21 + $0xc] sm:$0xf]  ;;  %v437_v30 = vld [vmem:[#allocation2 + $0x1a] sm:$0xf]  ;;  %v395_v38 = vmul.f32 %v1174_v25, %v385_v16 }
  0x22   : > { %202 = vst.msk [vmem:[#allocation2 + $0xb0] sm:$0x3f] %vm179_vm0, %v1056_v0  ;;  %v402_v34 = vadd.f32 %v394_v32, %v375_v31  ;;  %v317_v32 = vmul.f32 %v1140_v12, %v307_v11  ;;  %v333_v33 = vld [vmem:[#allocation2 + $0x19] sm:$0xf]  ;;  %v386_v43 = vld [vmem:[#allocation2 + $0x20] sm:$0xf]  ;;  %v221_v45 = vadd.f32 %v1094_v1, %v174_v26  ;;  %v447_v51 = vmul.f32 %v1199_v36, %v437_v30 }
  0x23   : > { %203 = vst.msk [vmem:[#allocation2 + $0xb8] sm:$0x3f] %vm179_vm0, %v1056_v0  ;;  %v332_v0 = vld [vmem:[#allocation2 + $0x11] sm:$0xf]  ;;  %v359_v39 = vld [vmem:[#allocation2 + $0x1a] sm:$0xf]  ;;  %v343_v52 = vmul.f32 %v1155_v18, %v333_v33 }
  0x24   : > { %206 = vst.msk [vmem:[#allocation2 + $0x39] sm:$0xf] %vm205_vm1, %v171_v4  ;;  %v428_v41 = vadd.f32 %v420_v35, %v402_v34  ;;  %v264_v4 = vmul.f32 %v1118_v3, %v254_v55  ;;  %v342_v23 = vmul.f32 %v1155_v18, %v332_v0  ;;  %v525_v34 = vmul.f32 %v1231_v8, %v515_v13  ;;  %v229_v40 = vld [vmem:[#allocation2 + $0x18] sm:$0xf]  ;;  %v412_v44 = vld [vmem:[#allocation2 + $0x21] sm:$0xf] }
  0x25   : > { %207 = vst.msk [vmem:[#allocation2 + $0x41] sm:$0xf] %vm205_vm1, %v172_v37  ;;  %v368_v37 = vmul.f32 %v1164_v21, %v358_v15  ;;  %v239_v46 = vmul.f32 %v1101_v2, %v229_v40  ;;  %v1257_v48 = vld [vmem:[%s1652_s1 + $0xc] ss:$0 sm:$0xff]  ;;  %v255_v54 = vld [vmem:[#allocation2 + $0x19] sm:$0xf]  ;;  %v396_v0 = vmul.f32 %v1174_v25, %v386_v43 }
  0x26   : > { %v454_v57 = vadd.f32 %v446_v47, %v428_v41  ;;  %208 = vst.msk [vmem:[#allocation2 + $0x49] sm:$0xf] %vm205_vm1, %v173_v53  ;;  %v272_v31 = vadd.f32 %v264_v4, %v246_v10  ;;  %v350_v35 = vadd.f32 %v342_v23, %v324_v22  ;;  %v421_v41 = vmul.f32 %v1184_v29, %v411_v24  ;;  %v438_v53 = vld [vmem:[#allocation2 + $0x22] sm:$0xf]  ;;  %v281_v60 = vld [vmem:[#allocation2 + $0x1a] sm:$0xf] }
  0x27   : > { %209 = vst.msk [vmem:[#allocation2 + $0x51] sm:$0xf] %vm205_vm1, %v174_v26  ;;  %v247_v58 = vadd.f32 %v239_v46, %v221_v45  ;;  %v265_v59 = vmul.f32 %v1118_v3, %v255_v54  ;;  %v308_v61 = vld [vmem:[#allocation2 + $0x20] sm:$0xf]  ;;  %v422_v4 = vmul.f32 %v1184_v29, %v412_v44  ;;  %v175_v9 = vld [vmem:[%s1113_s21 + $0x10] sm:$0xf]  ;;  %v448_v26 = vmul.f32 %v1199_v36, %v438_v53 }
  0x28   : > { %v481_v19 = vadd.f32 %v473_v5, %v454_v57  ;;  %v298_v42 = vadd.f32 %v290_v17, %v272_v31  ;;  %v376_v50 = vadd.f32 %v368_v37, %v350_v35  ;;  %v369_v57 = vmul.f32 %v1164_v21, %v359_v39  ;;  %v334_v7 = vld [vmem:[#allocation2 + $0x21] sm:$0xf]  ;;  %v230_v10 = vld [vmem:[#allocation2 + $0x30] sm:$0xf]  ;;  %210 = vst.msk [vmem:[#allocation2 + $0x69] sm:$0xf] %vm205_vm1, %v175_v9 }
  0x29   : > { %v291_v5 = vmul.f32 %v1129_v6, %v281_v60  ;;  %v273_v13 = vadd.f32 %v265_v59, %v247_v58  ;;  %v318_v15 = vmul.f32 %v1140_v12, %v308_v61  ;;  %v222_v16 = vadd.f32 %v1094_v1, %v175_v9  ;;  %v256_v17 = vld [vmem:[#allocation2 + $0x31] sm:$0xf]  ;;  %v360_v43 = vld [vmem:[#allocation2 + $0x22] sm:$0xf] }
  0x2a   : > { %v507_v47 = vadd.f32 %v499_v27, %v481_v19  ;;  %v325_v56 = vadd.f32 %v317_v32, %v298_v42  ;;  %v403_v62 = vadd.f32 %v395_v38, %v376_v50  ;;  %v282_v19 = vld [vmem:[#allocation2 + $0x32] sm:$0xf]  ;;  %v240_v27 = vmul.f32 %v1101_v2, %v230_v10 }
  0x2b   : > { %v541_v55 = vld [vmem:[#allocation2 + $0x38] sm:$0xf]  ;;  %v266_v30 = vmul.f32 %v1118_v3, %v256_v17  ;;  %v299_v37 = vadd.f32 %v291_v5, %v273_v13  ;;  %v344_v38 = vmul.f32 %v1155_v18, %v334_v7  ;;  %v292_v45 = vmul.f32 %v1129_v6, %v282_v19  ;;  %v176_v54 = vld [vmem:[%s1113_s21 + $0x14] sm:$0xf] }
  0x2c   : > { %v351_v11 = vadd.f32 %v343_v52, %v325_v56  ;;  %v429_v22 = vadd.f32 %v421_v41, %v403_v62  ;;  %v464_v23 = vld [vmem:[#allocation2 + $0x38] sm:$0xf]  ;;  %v533_v31 = vadd.f32 %v525_v34, %v507_v47  ;;  %v542_v33 = vld [vmem:[#allocation2 + $0x40] sm:$0xf]  ;;  %v551_v40 = vmul.f32 %v1257_v48, %v541_v55  ;;  %211 = vst.msk [vmem:[#allocation2 + $0x71] sm:$0xf] %vm205_vm1, %v176_v54 }
  0x2d   : > { %v490_v24 = vld [vmem:[#allocation2 + $0x39] sm:$0xf]  ;;  %v465_v42 = vld [vmem:[#allocation2 + $0x40] sm:$0xf]  ;;  %v248_v44 = vadd.f32 %v240_v27, %v222_v16  ;;  %v474_v46 = vmul.f32 %v1213_v49, %v464_v23  ;;  %v326_v53 = vadd.f32 %v318_v15, %v299_v37  ;;  %v466_v9 = vld [vmem:[#allocation2 + $0x48] sm:$0xf]  ;;  %v223_v13 = vadd.f32 %v1094_v1, %v176_v54 }
  0x2e   : > { %v516_v32 = vld [vmem:[#allocation2 + $0x3a] sm:$0xf]  ;;  %v377_v35 = vadd.f32 %v369_v57, %v351_v11  ;;  %v455_v41 = vadd.f32 %v447_v51, %v429_v22  ;;  %v500_v34 = vmul.f32 %v1224_v63, %v490_v24  ;;  %v491_v50 = vld [vmem:[#allocation2 + $0x41] sm:$0xf]  ;;  %v1281_v57 = vmul.f32 %v1257_v48, %v542_v33  ;;  %v492_v10 = vld [vmem:[#allocation2 + $0x49] sm:$0xf] }
  0x2f   : > { %v309_v39 = vld [vmem:[#allocation2 + $0x38] sm:$0xf]  ;;  %v517_v52 = vld [vmem:[#allocation2 + $0x42] sm:$0xf]  ;;  %v526_v56 = vmul.f32 %v1231_v8, %v516_v32  ;;  %v274_v51 = vadd.f32 %v266_v30, %v248_v44  ;;  %v352_v62 = vadd.f32 %v344_v38, %v326_v53  ;;  %v1286_v7 = vadd.f32 %v551_v40, %v533_v31  ;;  %v518_v19 = vld [vmem:[#allocation2 + $0x4a] sm:$0xf] }
  0x30   : > { %v404_v47 = vadd.f32 %v396_v0, %v377_v35  ;;  %v319_v55 = vmul.f32 %v1140_v12, %v309_v39  ;;  %v335_v58 = vld [vmem:[#allocation2 + $0x39] sm:$0xf]  ;;  %v482_v60 = vadd.f32 %v474_v46, %v455_v41  ;;  %v370_v0 = vmul.f32 %v1164_v21, %v360_v43  ;;  %v543_v30 = vld [vmem:[#allocation2 + $0x48] sm:$0xf]  ;;  %v544_v31 = vld [vmem:[#allocation2 + $0x50] sm:$0xf] }
  0x31   : > { %v231_v59 = vld [vmem:[#allocation2 + $0x38] sm:$0xf]  ;;  %v300_v11 = vadd.f32 %v292_v45, %v274_v51  ;;  %v475_v16 = vmul.f32 %v1213_v49, %v465_v42  ;;  %v501_v17 = vmul.f32 %v1224_v63, %v491_v50  ;;  %v345_v22 = vmul.f32 %v1155_v18, %v335_v58  ;;  %v388_v33 = vld [vmem:[#allocation2 + $0x40] sm:$0xf] }
  0x32   : > { %v430_v61 = vadd.f32 %v422_v4, %v404_v47  ;;  %v257_v5 = vld [vmem:[#allocation2 + $0x39] sm:$0xf]  ;;  %v241_v15 = vmul.f32 %v1101_v2, %v231_v59  ;;  %v1293_v4 = vmul.f32 %v1231_v8, %v517_v52  ;;  %v508_v38 = vadd.f32 %v500_v34, %v482_v60  ;;  %v310_v42 = vld [vmem:[#allocation2 + $0x40] sm:$0xf] }
  0x33   : > { %v361_v23 = vld [vmem:[#allocation2 + $0x3a] sm:$0xf]  ;;  %v327_v32 = vadd.f32 %v319_v55, %v300_v11  ;;  %v267_v37 = vmul.f32 %v1118_v3, %v257_v5  ;;  %v1298_v39 = vmul.f32 %v1213_v49, %v466_v9  ;;  %v1301_v40 = vmul.f32 %v1224_v63, %v492_v10  ;;  %v414_v45 = vld [vmem:[#allocation2 + $0x41] sm:$0xf] }
  0x34   : > { %v283_v24 = vld [vmem:[#allocation2 + $0x3a] sm:$0xf]  ;;  %v456_v27 = vadd.f32 %v448_v26, %v430_v61  ;;  %v249_v35 = vadd.f32 %v241_v15, %v223_v13  ;;  %v378_v41 = vadd.f32 %v370_v0, %v352_v62  ;;  %v371_v26 = vmul.f32 %v1164_v21, %v361_v23  ;;  %v440_v46 = vld [vmem:[#allocation2 + $0x42] sm:$0xf] }
  0x35   : > { %v177_v43 = vld [vmem:[%s1113_s21 + $0x18] sm:$0xf]  ;;  %v353_v44 = vadd.f32 %v345_v22, %v327_v32  ;;  %v293_v50 = vmul.f32 %v1129_v6, %v283_v24  ;;  %v1308_v34 = vmul.f32 %v1231_v8, %v518_v19  ;;  %v1311_v52 = vmul.f32 %v1257_v48, %v543_v30  ;;  %v467_v51 = vld [vmem:[#allocation2 + $0x60] sm:$0xf]  ;;  %v545_v22 = vld [vmem:[#allocation2 + $0x68] sm:$0xf] }
  0x36   : > { %v275_v47 = vadd.f32 %v267_v37, %v249_v35  ;;  %212 = vst.msk [vmem:[#allocation2 + $0x79] sm:$0xf] %vm205_vm1, %v177_v43  ;;  %v1314_v53 = vmul.f32 %v1257_v48, %v544_v31  ;;  %v398_v54 = vmul.f32 %v1174_v25, %v388_v33  ;;  %v336_v55 = vld [vmem:[#allocation2 + $0x41] sm:$0xf]  ;;  %v483_v58 = vadd.f32 %v475_v16, %v456_v27  ;;  %v178_v30 = vld [vmem:[%s1113_s21 + $0x1c] sm:$0xf] }
  0x37   : > { %v379_v59 = vadd.f32 %v371_v26, %v353_v44  ;;  %v493_v60 = vld [vmem:[#allocation2 + $0x61] sm:$0xf]  ;;  %v320_v0 = vmul.f32 %v1140_v12, %v310_v42  ;;  %v534_v9 = vadd.f32 %v526_v56, %v508_v38  ;;  %v405_v10 = vadd.f32 %v1234_v14, %v378_v41  ;;  %v389_v32 = vld [vmem:[#allocation2 + $0x48] sm:$0xf]  ;;  %213 = vst.msk [vmem:[#allocation2 + $0x81] sm:$0xf] %vm205_vm1, %v178_v30 }
  0x38   : > { %v519_v61 = vld [vmem:[#allocation2 + $0x62] sm:$0xf]  ;;  %v301_v62 = vadd.f32 %v293_v50, %v275_v47  ;;  %v424_v11 = vmul.f32 %v1184_v29, %v414_v45  ;;  %v450_v13 = vmul.f32 %v1199_v36, %v440_v46  ;;  %v346_v16 = vmul.f32 %v1155_v18, %v336_v55  ;;  %v415_v42 = vld [vmem:[#allocation2 + $0x49] sm:$0xf] }
  0x39   : > { %v232_v5 = vld [vmem:[#allocation2 + $0x40] sm:$0xf]  ;;  %v406_v19 = vadd.f32 %v398_v54, %v379_v59  ;;  %v224_v24 = vadd.f32 %v1094_v1, %v177_v43  ;;  %v477_v31 = vmul.f32 %v1213_v49, %v467_v51  ;;  %v1326_v56 = vmul.f32 %v1224_v63, %v493_v60  ;;  %v441_v43 = vld [vmem:[#allocation2 + $0x4a] sm:$0xf] }
  0x3a   : > { %v362_v15 = vld [vmem:[#allocation2 + $0x42] sm:$0xf]  ;;  %v328_v23 = vadd.f32 %v320_v0, %v301_v62  ;;  %v1329_v14 = vmul.f32 %v1231_v8, %v519_v61  ;;  %v242_v33 = vmul.f32 %v1101_v2, %v232_v5  ;;  %v509_v35 = vadd.f32 %v501_v17, %v483_v58  ;;  %v468_v46 = vld [vmem:[#allocation2 + $0x68] sm:$0xf]  ;;  %v546_v0 = vld [vmem:[#allocation2 + $0x70] sm:$0xf] }
  0x3b   : > { %v258_v27 = vld [vmem:[#allocation2 + $0x41] sm:$0xf]  ;;  %v432_v37 = vadd.f32 %v424_v11, %v406_v19  ;;  %v372_v41 = vmul.f32 %v1164_v21, %v362_v15  ;;  %v431_v26 = vadd.f32 %v1238_v20, %v405_v10  ;;  %v1336_v45 = vmul.f32 %v1257_v48, %v545_v22  ;;  %v494_v47 = vld [vmem:[#allocation2 + $0x69] sm:$0xf] }
  0x3c   : > { %v354_v38 = vadd.f32 %v346_v16, %v328_v23  ;;  %v284_v44 = vld [vmem:[#allocation2 + $0x42] sm:$0xf]  ;;  %v250_v50 = vadd.f32 %v242_v33, %v224_v24  ;;  %v268_v54 = vmul.f32 %v1118_v3, %v258_v27  ;;  %v1340_v51 = vadd.f32 %v1281_v57, %v534_v9  ;;  %v520_v59 = vld [vmem:[#allocation2 + $0x6a] sm:$0xf]  ;;  %v390_v27 = vld [vmem:[#allocation2 + $0x50] sm:$0xf] }
  0x3d   : > { %v458_v17 = vadd.f32 %v450_v13, %v432_v37  ;;  %v399_v58 = vmul.f32 %v1174_v25, %v389_v32  ;;  %v311_v60 = vld [vmem:[#allocation2 + $0x48] sm:$0xf]  ;;  %v425_v20 = vmul.f32 %v1184_v29, %v415_v42  ;;  %v451_v62 = vmul.f32 %v1199_v36, %v441_v43  ;;  %v416_v32 = vld [vmem:[#allocation2 + $0x51] sm:$0xf]  ;;  %v567_v37 = vld [vmem:[#allocation2 + $0x39] sm:$0xf] }
  0x3e   : > { %v380_v55 = vadd.f32 %v372_v41, %v354_v38  ;;  %v233_v61 = vld [vmem:[#allocation2 + $0x48] sm:$0xf]  ;;  %v276_v5 = vadd.f32 %v268_v54, %v250_v50  ;;  %v294_v10 = vmul.f32 %v1129_v6, %v284_v44  ;;  %v535_v15 = vadd.f32 %v1293_v4, %v509_v35  ;;  %v312_v42 = vld [vmem:[#allocation2 + $0x50] sm:$0xf] }
  0x3f   : > { %v337_v11 = vld [vmem:[#allocation2 + $0x49] sm:$0xf]  ;;  %v478_v9 = vmul.f32 %v1213_v49, %v468_v46  ;;  %v225_v19 = vadd.f32 %v1094_v1, %v178_v30  ;;  %v457_v23 = vadd.f32 %v1244_v28, %v431_v26  ;;  %v321_v24 = vmul.f32 %v1140_v12, %v311_v60  ;;  %v442_v1 = vld [vmem:[#allocation2 + $0x52] sm:$0xf] }
  0x40   : > { %v407_v57 = vadd.f32 %v399_v58, %v380_v55  ;;  %v363_v13 = vld [vmem:[#allocation2 + $0x4a] sm:$0xf]  ;;  %v302_v16 = vadd.f32 %v294_v10, %v276_v5  ;;  %v243_v33 = vmul.f32 %v1101_v2, %v233_v61  ;;  %v485_v38 = vadd.f32 %v477_v31, %v458_v17  ;;  %v469_v44 = vld [vmem:[#allocation2 + $0x70] sm:$0xf] }
  0x41   : > { %v259_v22 = vld [vmem:[#allocation2 + $0x49] sm:$0xf]  ;;  %v1353_v4 = vmul.f32 %v1224_v63, %v494_v47  ;;  %v1356_v35 = vmul.f32 %v1231_v8, %v520_v59  ;;  %v347_v43 = vmul.f32 %v1155_v18, %v337_v11  ;;  %v1363_v2 = vld [vmem:[%s1652_s1 + $0xd] ss:$0 sm:$0xff]  ;;  %v1366_v31 = vadd.f32 %v1311_v52, %v535_v15  ;;  %v495_v17 = vld [vmem:[#allocation2 + $0x71] sm:$0xf] }
  0x42   : > { %v433_v41 = vadd.f32 %v425_v20, %v407_v57  ;;  %v285_v30 = vld [vmem:[#allocation2 + $0x4a] sm:$0xf]  ;;  %v329_v28 = vadd.f32 %v321_v24, %v302_v16  ;;  %v251_v26 = vadd.f32 %v243_v33, %v225_v19  ;;  %v269_v46 = vmul.f32 %v1118_v3, %v259_v22  ;;  %v338_v55 = vld [vmem:[#allocation2 + $0x51] sm:$0xf]  ;;  %v1377_v52 = vld [vmem:[%s1652_s1 + $0xe] ss:$0 sm:$0xff] }
  0x43   : > { %v1369_v50 = vmul.f32 %v1257_v48, %v546_v0  ;;  %v373_v54 = vmul.f32 %v1164_v21, %v363_v13  ;;  %v521_v59 = vld [vmem:[#allocation2 + $0x72] sm:$0xf]  ;;  %v295_v3 = vmul.f32 %v1129_v6, %v285_v30  ;;  %v322_v61 = vmul.f32 %v1140_v12, %v312_v42  ;;  %v391_v11 = vld [vmem:[#allocation2 + $0x58] sm:$0xf]  ;;  %v568_v6 = vld [vmem:[#allocation2 + $0x41] sm:$0xf] }
  0x44   : > { %v459_v47 = vadd.f32 %v451_v62, %v433_v41  ;;  %v355_v58 = vadd.f32 %v347_v43, %v329_v28  ;;  %v277_v60 = vadd.f32 %v269_v46, %v251_v26  ;;  %v364_v20 = vld [vmem:[#allocation2 + $0x52] sm:$0xf]  ;;  %v1380_v62 = vadd.f32 %v1298_v39, %v457_v23  ;;  %v593_v15 = vld [vmem:[#allocation2 + $0x3a] sm:$0xf]  ;;  %v1390_v39 = vld [vmem:[%s1652_s1 + $0xf] ss:$0 sm:$0xff] }
  0x45   : > { %v511_v0 = vadd.f32 %v1326_v56, %v485_v38  ;;  %v400_v5 = vmul.f32 %v1174_v25, %v390_v27  ;;  %v426_v10 = vmul.f32 %v1184_v29, %v416_v32  ;;  %v452_v12 = vmul.f32 %v1199_v36, %v442_v1  ;;  %v547_v13 = vld [vmem:[#allocation2 + $0x78] sm:$0xf]  ;;  %v620_v33 = vld [vmem:[#allocation2 + $0x40] sm:$0xf] }
  0x46   : > { %v381_v57 = vadd.f32 %v373_v54, %v355_v58  ;;  %v303_v19 = vadd.f32 %v295_v3, %v277_v60  ;;  %v417_v22 = vld [vmem:[#allocation2 + $0x59] sm:$0xf]  ;;  %v577_v16 = vmul.f32 %v1363_v2, %v567_v37  ;;  %v486_v56 = vadd.f32 %v478_v9, %v459_v47  ;;  %v1404_v9 = vld [vmem:[%s1652_s1 + $0x10] ss:$0 sm:$0xff]  ;;  %v646_v26 = vld [vmem:[#allocation2 + $0x41] sm:$0xf] }
  0x47   : > { %v1393_v23 = vmul.f32 %v1213_v49, %v469_v44  ;;  %v1396_v24 = vmul.f32 %v1224_v63, %v495_v17  ;;  %v348_v27 = vmul.f32 %v1155_v18, %v338_v55  ;;  %v443_v32 = vld [vmem:[#allocation2 + $0x5a] sm:$0xf]  ;;  %v603_v30 = vmul.f32 %v1377_v52, %v593_v15  ;;  %v548_v54 = vld [vmem:[#allocation2 + $0x80] sm:$0xf]  ;;  %v1426_v3 = vld [vmem:[%s1652_s1 + $0x12] ss:$0 sm:$0xff] }
  0x48   : > { %v408_v38 = vadd.f32 %v400_v5, %v381_v57  ;;  %v330_v41 = vadd.f32 %v322_v61, %v303_v19  ;;  %v470_v1 = vld [vmem:[#allocation2 + $0x78] sm:$0xf]  ;;  %v585_v37 = vadd.f32 %v577_v16, %v1286_v7  ;;  %v537_v42 = vadd.f32 %v1329_v14, %v511_v0  ;;  %v672_v58 = vld [vmem:[#allocation2 + $0x42] sm:$0xf]  ;;  %v1416_v14 = vld [vmem:[%s1652_s1 + $0x11] ss:$0 sm:$0xff] }
  0x49   : > { %v1408_v28 = vmul.f32 %v1231_v8, %v521_v59  ;;  %v374_v18 = vmul.f32 %v1164_v21, %v364_v20  ;;  %v401_v43 = vmul.f32 %v1174_v25, %v391_v11  ;;  %v496_v44 = vld [vmem:[#allocation2 + $0x79] sm:$0xf]  ;;  %v630_v55 = vmul.f32 %v1390_v39, %v620_v33  ;;  %v699_v60 = vld [vmem:[#allocation2 + $0x60] sm:$0xf]  ;;  %v569_v20 = vld [vmem:[#allocation2 + $0x49] sm:$0xf] }
  0x4a   : > { %v434_v46 = vadd.f32 %v426_v10, %v408_v38  ;;  %v356_v7 = vadd.f32 %v348_v27, %v330_v41  ;;  %v522_v47 = vld [vmem:[#allocation2 + $0x7a] sm:$0xf]  ;;  %v611_v17 = vadd.f32 %v603_v30, %v585_v37  ;;  %v512_v59 = vadd.f32 %v1353_v4, %v486_v56  ;;  %v725_v11 = vld [vmem:[#allocation2 + $0x61] sm:$0xf]  ;;  %v778_v38 = vld [vmem:[#allocation2 + $0x68] sm:$0xf] }
  0x4b   : > { %v1420_v21 = vmul.f32 %v1257_v48, %v547_v13  ;;  %v427_v25 = vmul.f32 %v1184_v29, %v417_v22  ;;  %v578_v61 = vmul.f32 %v1363_v2, %v568_v6  ;;  %v453_v5 = vmul.f32 %v1199_v36, %v443_v32  ;;  %v1434_v29 = vld [vmem:[%s1652_s1 + $0x13] ss:$0 sm:$0xff]  ;;  %v751_v13 = vld [vmem:[#allocation2 + $0x62] sm:$0xf]  ;;  %v1448_v36 = vld [vmem:[%s1652_s1 + $0x14] ss:$0 sm:$0xff] }
  0x4c   : > { %v382_v0 = vadd.f32 %v374_v18, %v356_v7  ;;  %v638_v10 = vadd.f32 %v630_v55, %v611_v17  ;;  %v656_v4 = vmul.f32 %v1404_v9, %v646_v26  ;;  %v1437_v15 = vadd.f32 %v1336_v45, %v537_v42  ;;  %v594_v22 = vld [vmem:[#allocation2 + $0x42] sm:$0xf]  ;;  %v621_v32 = vld [vmem:[#allocation2 + $0x48] sm:$0xf]  ;;  %v857_v26 = vld [vmem:[#allocation2 + $0x70] sm:$0xf] }
  0x4d   : > { %v1440_v57 = vmul.f32 %v1213_v49, %v470_v1  ;;  %v1443_v6 = vmul.f32 %v1224_v63, %v496_v44  ;;  %v586_v19 = vadd.f32 %v578_v61, %v1340_v51  ;;  %v460_v16 = vadd.f32 %v452_v12, %v434_v46  ;;  %v1455_v49 = vld [vmem:[%s1652_s1 + $0x15] ss:$0 sm:$0xff]  ;;  %v1460_v63 = vld [vmem:[%s1652_s1 + $0x16] ss:$0 sm:$0xff]  ;;  %v804_v41 = vld [vmem:[#allocation2 + $0x69] sm:$0xf] }
  0x4e   : > { %v409_v56 = vadd.f32 %v401_v43, %v382_v0  ;;  %v664_v27 = vadd.f32 %v656_v4, %v638_v10  ;;  %v682_v45 = vmul.f32 %v1416_v14, %v672_v58  ;;  %v538_v33 = vadd.f32 %v1356_v35, %v512_v59  ;;  %v830_v1 = vld [vmem:[#allocation2 + $0x6a] sm:$0xf]  ;;  %v1475_v35 = vld [vmem:[%s1652_s1 + $0x17] ss:$0 sm:$0xff]  ;;  %v883_v46 = vld [vmem:[#allocation2 + $0x71] sm:$0xf] }
  0x4f   : > { %v1464_v51 = vmul.f32 %v1231_v8, %v522_v47  ;;  %v1467_v12 = vmul.f32 %v1257_v48, %v548_v54  ;;  %v604_v37 = vmul.f32 %v1377_v52, %v594_v22  ;;  %v709_v18 = vmul.f32 %v1426_v3, %v699_v60  ;;  %v1480_v8 = vld [vmem:[%s1652_s1 + $0x18] ss:$0 sm:$0xff]  ;;  %v647_v48 = vld [vmem:[#allocation2 + $0x49] sm:$0xf]  ;;  %v1486_v7 = vld [vmem:[%s1652_s1 + $0x19] ss:$0 sm:$0xff] }
  0x50   : > { %v435_v30 = vadd.f32 %v427_v25, %v409_v56  ;;  %v690_v42 = vadd.f32 %v682_v45, %v664_v27  ;;  %v735_v43 = vmul.f32 %v1434_v29, %v725_v11  ;;  %v761_v44 = vmul.f32 %v1448_v36, %v751_v13  ;;  %v1496_v60 = vld [vmem:[%s1652_s1 + $0x1a] ss:$0 sm:$0xff]  ;;  %v673_v61 = vld [vmem:[#allocation2 + $0x4a] sm:$0xf]  ;;  %v909_v4 = vld [vmem:[#allocation2 + $0x72] sm:$0xf] }
  0x51   : > { %v612_v47 = vadd.f32 %v604_v37, %v586_v19  ;;  %v631_v54 = vmul.f32 %v1390_v39, %v621_v32  ;;  %v579_v17 = vmul.f32 %v1363_v2, %v569_v20  ;;  %v487_v55 = vadd.f32 %v1393_v23, %v460_v16  ;;  %v595_v0 = vld [vmem:[#allocation2 + $0x4a] sm:$0xf]  ;;  %v622_v27 = vld [vmem:[#allocation2 + $0x50] sm:$0xf] }
  0x52   : > { %v717_v58 = vadd.f32 %v709_v18, %v690_v42  ;;  %v788_v59 = vmul.f32 %v1455_v49, %v778_v38  ;;  %v814_v25 = vmul.f32 %v1460_v63, %v804_v41  ;;  %v1499_v10 = vadd.f32 %v1369_v50, %v538_v33  ;;  %v700_v56 = vld [vmem:[#allocation2 + $0x68] sm:$0xf] }
  0x53   : > { %v639_v11 = vadd.f32 %v631_v54, %v612_v47  ;;  %v657_v20 = vmul.f32 %v1404_v9, %v647_v48  ;;  %v587_v23 = vadd.f32 %v579_v17, %v1366_v31  ;;  %v461_v13 = vadd.f32 %v453_v5, %v435_v30  ;;  %v726_v33 = vld [vmem:[#allocation2 + $0x69] sm:$0xf]  ;;  %v648_v30 = vld [vmem:[#allocation2 + $0x51] sm:$0xf] }
  0x54   : > { %v743_v19 = vadd.f32 %v735_v43, %v717_v58  ;;  %v840_v22 = vmul.f32 %v1475_v35, %v830_v1  ;;  %v867_v16 = vmul.f32 %v1480_v8, %v857_v26  ;;  %v1506_v45 = vmul.f32 %v1486_v7, %v883_v46  ;;  %v752_v38 = vld [vmem:[#allocation2 + $0x6a] sm:$0xf]  ;;  %v779_v1 = vld [vmem:[#allocation2 + $0x70] sm:$0xf] }
  0x55   : > { %v665_v32 = vadd.f32 %v657_v20, %v639_v11  ;;  %v683_v50 = vmul.f32 %v1416_v14, %v673_v61  ;;  %v605_v41 = vmul.f32 %v1377_v52, %v595_v0  ;;  %v513_v31 = vadd.f32 %v1396_v24, %v487_v55  ;;  %v805_v48 = vld [vmem:[#allocation2 + $0x71] sm:$0xf] }
  0x56   : > { %v769_v5 = vadd.f32 %v761_v44, %v743_v19  ;;  %v1512_v37 = vmul.f32 %v1496_v60, %v909_v4  ;;  %v510_v42 = vadd.f32 %v1301_v40, %v1380_v62  ;;  %v710_v43 = vmul.f32 %v1426_v3, %v700_v56  ;;  %v831_v26 = vld [vmem:[#allocation2 + $0x72] sm:$0xf]  ;;  %v858_v40 = vld [vmem:[#allocation2 + $0x78] sm:$0xf] }
  0x57   : > { %v691_v18 = vadd.f32 %v683_v50, %v665_v32  ;;  %v613_v46 = vadd.f32 %v605_v41, %v587_v23  ;;  %v632_v47 = vmul.f32 %v1390_v39, %v622_v27  ;;  %v488_v54 = vadd.f32 %v1440_v57, %v461_v13  ;;  %v674_v55 = vld [vmem:[#allocation2 + $0x52] sm:$0xf]  ;;  %v884_v19 = vld [vmem:[#allocation2 + $0x79] sm:$0xf] }
  0x58   : > { %v796_v24 = vadd.f32 %v788_v59, %v769_v5  ;;  %v736_v44 = vmul.f32 %v1434_v29, %v726_v33  ;;  %v762_v17 = vmul.f32 %v1448_v36, %v752_v38  ;;  %v789_v61 = vmul.f32 %v1455_v49, %v779_v1  ;;  %v701_v4 = vld [vmem:[#allocation2 + $0x70] sm:$0xf]  ;;  %v910_v5 = vld [vmem:[#allocation2 + $0x7a] sm:$0xf] }
  0x59   : > { %v718_v58 = vadd.f32 %v710_v43, %v691_v18  ;;  %v640_v62 = vadd.f32 %v632_v47, %v613_v46  ;;  %v658_v0 = vmul.f32 %v1404_v9, %v648_v30  ;;  %v570_v11 = vld [vmem:[#allocation2 + $0x51] sm:$0xf]  ;;  %v539_v20 = vadd.f32 %v1408_v28, %v513_v31 }
  0x5a   : > { %v822_v23 = vadd.f32 %v814_v25, %v796_v24  ;;  %v815_v57 = vmul.f32 %v1460_v63, %v805_v48  ;;  %v841_v59 = vmul.f32 %v1475_v35, %v831_v26  ;;  %v684_v27 = vmul.f32 %v1416_v14, %v674_v55  ;;  %v727_v32 = vld [vmem:[#allocation2 + $0x71] sm:$0xf]  ;;  %v571_v26 = vld [vmem:[#allocation2 + $0x69] sm:$0xf]  ;;  %v806_v24 = vld [vmem:[#allocation2 + $0x79] sm:$0xf] }
  0x5b   : > { %v744_v13 = vadd.f32 %v736_v44, %v718_v58  ;;  %v666_v56 = vadd.f32 %v658_v0, %v640_v62  ;;  %v536_v50 = vadd.f32 %v1308_v34, %v510_v42  ;;  %v514_v33 = vadd.f32 %v1443_v6, %v488_v54  ;;  %v596_v25 = vld [vmem:[#allocation2 + $0x52] sm:$0xf]  ;;  %v623_v42 = vld [vmem:[#allocation2 + $0x58] sm:$0xf]  ;;  %v859_v0 = vld [vmem:[#allocation2 + $0x80] sm:$0xf] }
  0x5c   : > { %v848_v38 = vadd.f32 %v840_v22, %v822_v23  ;;  %v868_v41 = vmul.f32 %v1480_v8, %v858_v40  ;;  %v711_v28 = vmul.f32 %v1426_v3, %v701_v4  ;;  %v753_v30 = vld [vmem:[#allocation2 + $0x72] sm:$0xf]  ;;  %v580_v43 = vmul.f32 %v1363_v2, %v570_v11  ;;  %v780_v54 = vld [vmem:[#allocation2 + $0x78] sm:$0xf] }
  0x5d   : > { %v770_v31 = vadd.f32 %v762_v17, %v744_v13  ;;  %v692_v1 = vadd.f32 %v684_v27, %v666_v56  ;;  %v562_v18 = vadd.f32 %v1314_v53, %v536_v50  ;;  %v1534_v48 = vadd.f32 %v1420_v21, %v539_v20  ;;  %v649_v58 = vld [vmem:[#allocation2 + $0x59] sm:$0xf] }
  0x5e   : > { %v875_v34 = vadd.f32 %v867_v16, %v848_v38  ;;  %v894_v6 = vmul.f32 %v1486_v7, %v884_v19  ;;  %v737_v22 = vmul.f32 %v1434_v29, %v727_v32  ;;  %v606_v53 = vmul.f32 %v1377_v52, %v596_v25  ;;  %v832_v62 = vld [vmem:[#allocation2 + $0x7a] sm:$0xf] }
  0x5f   : > { %v797_v46 = vadd.f32 %v789_v61, %v770_v31  ;;  %v719_v47 = vadd.f32 %v711_v28, %v692_v1  ;;  %v588_v44 = vadd.f32 %v580_v43, %v562_v18  ;;  %v540_v17 = vadd.f32 %v1464_v51, %v514_v33  ;;  %v675_v13 = vld [vmem:[#allocation2 + $0x5a] sm:$0xf]  ;;  %v624_v33 = vld [vmem:[#allocation2 + $0x70] sm:$0xf] }
  0x60   : > { %v901_v21 = vadd.f32 %v1506_v45, %v875_v34  ;;  %v920_v16 = vmul.f32 %v1496_v60, %v910_v5  ;;  %v763_v55 = vmul.f32 %v1448_v36, %v753_v30  ;;  %v633_v51 = vmul.f32 %v1390_v39, %v623_v42  ;;  %v597_v45 = vld [vmem:[#allocation2 + $0x6a] sm:$0xf]  ;;  %v702_v28 = vld [vmem:[#allocation2 + $0x78] sm:$0xf]  ;;  %v650_v34 = vld [vmem:[#allocation2 + $0x71] sm:$0xf] }
  0x61   : > { %v823_v61 = vadd.f32 %v815_v57, %v797_v46  ;;  %v745_v40 = vadd.f32 %v737_v22, %v719_v47  ;;  %v614_v4 = vadd.f32 %v606_v53, %v588_v44  ;;  %v790_v20 = vmul.f32 %v1455_v49, %v780_v54  ;;  %v885_v57 = vld [vmem:[#allocation2 + $0x81] sm:$0xf]  ;;  %v728_v43 = vld [vmem:[#allocation2 + $0x79] sm:$0xf]  ;;  %v572_v22 = vld [vmem:[#allocation2 + $0x71] sm:$0xf] }
  0x62   : > { %v927_v11 = vadd.f32 %v1512_v37, %v901_v21  ;;  %v816_v23 = vmul.f32 %v1460_v63, %v806_v24  ;;  %v581_v19 = vmul.f32 %v1363_v2, %v571_v26  ;;  %v659_v50 = vmul.f32 %v1404_v9, %v649_v58  ;;  %v754_v44 = vld [vmem:[#allocation2 + $0x7a] sm:$0xf]  ;;  %v676_v53 = vld [vmem:[#allocation2 + $0x72] sm:$0xf] }
  0x63   : > { %v849_v56 = vadd.f32 %v841_v59, %v823_v61  ;;  %v771_v27 = vadd.f32 %v763_v55, %v745_v40  ;;  %v641_v32 = vadd.f32 %v633_v51, %v614_v4  ;;  %v842_v38 = vmul.f32 %v1475_v35, %v832_v62  ;;  %v911_v59 = vld [vmem:[#allocation2 + $0x82] sm:$0xf]  ;;  %v703_v21 = vld [vmem:[#allocation2 + $0x90] sm:$0xf] }
  0x64   : > { %935 = vst.msk [vmem:[%s1548_s28] sm:$0xf] %vm205_vm1, %v927_v11  ;;  %v869_v37 = vmul.f32 %v1480_v8, %v859_v0  ;;  %v589_v25 = vadd.f32 %v581_v19, %v1437_v15  ;;  %v607_v31 = vmul.f32 %v1377_v52, %v597_v45  ;;  %v685_v18 = vmul.f32 %v1416_v14, %v675_v13  ;;  %v807_v4 = vld [vmem:[#allocation2 + $0x81] sm:$0xf]  ;;  %v729_v51 = vld [vmem:[#allocation2 + $0x91] sm:$0xf] }
  0x65   : > { %v876_v5 = vadd.f32 %v868_v41, %v849_v56  ;;  %v798_v1 = vadd.f32 %v790_v20, %v771_v27  ;;  %v667_v30 = vadd.f32 %v659_v50, %v641_v32  ;;  %v1564_v42 = vadd.f32 %v1467_v12, %v540_v17  ;;  %v598_v17 = vld [vmem:[#allocation2 + $0x72] sm:$0xf]  ;;  %v833_v20 = vld [vmem:[#allocation2 + $0x82] sm:$0xf]  ;;  %v625_v56 = vld [vmem:[#allocation2 + $0x78] sm:$0xf] }
  0x66   : > { %v895_v26 = vmul.f32 %v1486_v7, %v885_v57  ;;  %v615_v46 = vadd.f32 %v607_v31, %v589_v25  ;;  %v634_v47 = vmul.f32 %v1390_v39, %v624_v33  ;;  %v712_v41 = vmul.f32 %v1426_v3, %v702_v28  ;;  %v860_v57 = vld [vmem:[#allocation2 + $0x88] sm:$0xf]  ;;  %v755_v32 = vld [vmem:[#allocation2 + $0x92] sm:$0xf] }
  0x67   : > { %v902_v15 = vadd.f32 %v894_v6, %v876_v5  ;;  %v824_v54 = vadd.f32 %v816_v23, %v798_v1  ;;  %v693_v24 = vadd.f32 %v685_v18, %v667_v30  ;;  %v921_v55 = vmul.f32 %v1496_v60, %v911_v59  ;;  %v781_v6 = vld [vmem:[#allocation2 + $0x80] sm:$0xf]  ;;  %v651_v5 = vld [vmem:[#allocation2 + $0x79] sm:$0xf]  ;;  %v886_v18 = vld [vmem:[#allocation2 + $0x89] sm:$0xf] }
  0x68   : > { %v738_v58 = vmul.f32 %v1434_v29, %v728_v43  ;;  %v642_v61 = vadd.f32 %v634_v47, %v615_v46  ;;  %v660_v12 = vmul.f32 %v1404_v9, %v650_v34  ;;  %v582_v45 = vmul.f32 %v1363_v2, %v572_v22  ;;  %v573_v1 = vld [vmem:[#allocation2 + $0x79] sm:$0xf] }
  0x69   : > { %v928_v40 = vadd.f32 %v920_v16, %v902_v15  ;;  %v850_v62 = vadd.f32 %v842_v38, %v824_v54  ;;  %v720_v0 = vadd.f32 %v712_v41, %v693_v24  ;;  %v764_v11 = vmul.f32 %v1448_v36, %v754_v44  ;;  %v677_v15 = vld [vmem:[#allocation2 + $0x7a] sm:$0xf]  ;;  %v912_v44 = vld [vmem:[#allocation2 + $0x8a] sm:$0xf] }
  0x6a   : > { %v668_v23 = vadd.f32 %v660_v12, %v642_v61  ;;  %v686_v13 = vmul.f32 %v1416_v14, %v676_v53  ;;  %v713_v19 = vmul.f32 %v1426_v3, %v703_v21  ;;  %v590_v50 = vadd.f32 %v582_v45, %v1499_v10  ;;  %v704_v54 = vld [vmem:[#allocation2 + $0x98] sm:$0xf]  ;;  %v626_v45 = vld [vmem:[#allocation2 + $0x80] sm:$0xf] }
  0x6b   : > { %936 = vst.msk [vmem:[%s1548_s28 + $0x4] sm:$0xf] %vm205_vm1, %v928_v40  ;;  %v877_v27 = vadd.f32 %v869_v37, %v850_v62  ;;  %v746_v16 = vadd.f32 %v738_v58, %v720_v0  ;;  %v608_v33 = vmul.f32 %v1377_v52, %v598_v17  ;;  %v791_v38 = vmul.f32 %v1455_v49, %v781_v6  ;;  %v782_v37 = vld [vmem:[#allocation2 + $0x98] sm:$0xf]  ;;  %v861_v6 = vld [vmem:[#allocation2 + $0xa0] sm:$0xf] }
  0x6c   : > { %v817_v28 = vmul.f32 %v1460_v63, %v807_v4  ;;  %v694_v25 = vadd.f32 %v686_v13, %v668_v23  ;;  %v739_v31 = vmul.f32 %v1434_v29, %v729_v51  ;;  %v635_v34 = vmul.f32 %v1390_v39, %v625_v56  ;;  %v599_v21 = vld [vmem:[#allocation2 + $0x7a] sm:$0xf] }
  0x6d   : > { %v903_v59 = vadd.f32 %v895_v26, %v877_v27  ;;  %v772_v30 = vadd.f32 %v764_v11, %v746_v16  ;;  %v616_v43 = vadd.f32 %v608_v33, %v590_v50  ;;  %v843_v10 = vmul.f32 %v1475_v35, %v833_v20  ;;  %v808_v17 = vld [vmem:[#allocation2 + $0x99] sm:$0xf]  ;;  %v783_v50 = vld [vmem:[#allocation2 + $0xa0] sm:$0xf] }
  0x6e   : > { %v870_v22 = vmul.f32 %v1480_v8, %v860_v57  ;;  %v721_v46 = vadd.f32 %v713_v19, %v694_v25  ;;  %v765_v47 = vmul.f32 %v1448_v36, %v755_v32  ;;  %v661_v53 = vmul.f32 %v1404_v9, %v651_v5  ;;  %v834_v40 = vld [vmem:[#allocation2 + $0x9a] sm:$0xf]  ;;  %v652_v33 = vld [vmem:[#allocation2 + $0x81] sm:$0xf] }
  0x6f   : > { %v929_v24 = vadd.f32 %v921_v55, %v903_v59  ;;  %v799_v41 = vadd.f32 %v791_v38, %v772_v30  ;;  %v643_v26 = vadd.f32 %v635_v34, %v616_v43  ;;  %v896_v58 = vmul.f32 %v1486_v7, %v886_v18  ;;  %v730_v23 = vld [vmem:[#allocation2 + $0x99] sm:$0xf]  ;;  %v574_v38 = vld [vmem:[#allocation2 + $0x81] sm:$0xf] }
  0x70   : > { %v747_v61 = vadd.f32 %v739_v31, %v721_v46  ;;  %v792_v12 = vmul.f32 %v1455_v49, %v782_v37  ;;  %v583_v62 = vmul.f32 %v1363_v2, %v573_v1  ;;  %v687_v4 = vmul.f32 %v1416_v14, %v677_v15  ;;  %v756_v13 = vld [vmem:[#allocation2 + $0x9a] sm:$0xf]  ;;  %v678_v1 = vld [vmem:[#allocation2 + $0x82] sm:$0xf]  ;;  %v627_v15 = vld [vmem:[#allocation2 + $0x88] sm:$0xf] }
  0x71   : > { %937 = vst.msk [vmem:[%s1548_s28 + $0x8] sm:$0xf] %vm205_vm1, %v929_v24  ;;  %v825_v0 = vadd.f32 %v817_v28, %v799_v41  ;;  %v669_v55 = vadd.f32 %v661_v53, %v643_v26  ;;  %v714_v51 = vmul.f32 %v1426_v3, %v704_v54  ;;  %v922_v11 = vmul.f32 %v1496_v60, %v912_v44  ;;  %v705_v37 = vld [vmem:[#allocation2 + $0xa0] sm:$0xf] }
  0x72   : > { %v773_v20 = vadd.f32 %v765_v47, %v747_v61  ;;  %v591_v19 = vadd.f32 %v583_v62, %v1534_v48  ;;  %v609_v56 = vmul.f32 %v1377_v52, %v599_v21  ;;  %v818_v16 = vmul.f32 %v1460_v63, %v808_v17  ;;  %v600_v43 = vld [vmem:[#allocation2 + $0x82] sm:$0xf] }
  0x73   : > { %v851_v27 = vadd.f32 %v843_v10, %v825_v0  ;;  %v844_v57 = vmul.f32 %v1475_v35, %v834_v40  ;;  %v695_v32 = vadd.f32 %v687_v4, %v669_v55  ;;  %v871_v25 = vmul.f32 %v1480_v8, %v861_v6  ;;  %v887_v24 = vld [vmem:[#allocation2 + $0xa1] sm:$0xf] }
  0x74   : > { %v800_v28 = vadd.f32 %v792_v12, %v773_v20  ;;  %v617_v31 = vadd.f32 %v609_v56, %v591_v19  ;;  %v636_v5 = vmul.f32 %v1390_v39, %v626_v45  ;;  %v740_v30 = vmul.f32 %v1434_v29, %v730_v23  ;;  %v809_v53 = vld [vmem:[#allocation2 + $0xa1] sm:$0xf]  ;;  %v653_v45 = vld [vmem:[#allocation2 + $0x89] sm:$0xf] }
  0x75   : > { %v878_v59 = vadd.f32 %v870_v22, %v851_v27  ;;  %v722_v48 = vadd.f32 %v714_v51, %v695_v32  ;;  %v766_v18 = vmul.f32 %v1448_v36, %v756_v13  ;;  %v793_v10 = vmul.f32 %v1455_v49, %v783_v50  ;;  %v913_v40 = vld [vmem:[#allocation2 + $0xa2] sm:$0xf]  ;;  %v679_v27 = vld [vmem:[#allocation2 + $0x8a] sm:$0xf] }
  0x76   : > { %v826_v34 = vadd.f32 %v818_v16, %v800_v28  ;;  %v644_v46 = vadd.f32 %v636_v5, %v617_v31  ;;  %v662_v47 = vmul.f32 %v1404_v9, %v652_v33  ;;  %v688_v44 = vmul.f32 %v1416_v14, %v678_v1  ;;  %v731_v0 = vld [vmem:[#allocation2 + $0xa1] sm:$0xf]  ;;  %v706_v16 = vld [vmem:[#allocation2 + $0xa8] sm:$0xf] }
  0x77   : > { %v904_v54 = vadd.f32 %v896_v58, %v878_v59  ;;  %v748_v41 = vadd.f32 %v740_v30, %v722_v48  ;;  %v584_v22 = vmul.f32 %v1363_v2, %v574_v38  ;;  %v715_v61 = vmul.f32 %v1426_v3, %v705_v37  ;;  %v835_v2 = vld [vmem:[#allocation2 + $0xa2] sm:$0xf]  ;;  %v784_v50 = vld [vmem:[#allocation2 + $0xa8] sm:$0xf] }
  0x78   : > { %v852_v26 = vadd.f32 %v844_v57, %v826_v34  ;;  %v670_v21 = vadd.f32 %v662_v47, %v644_v46  ;;  %v610_v12 = vmul.f32 %v1377_v52, %v600_v43  ;;  %v637_v6 = vmul.f32 %v1390_v39, %v627_v15  ;;  %v862_v52 = vld [vmem:[#allocation2 + $0xa8] sm:$0xf] }
  0x79   : > { %v930_v17 = vadd.f32 %v922_v11, %v904_v54  ;;  %v774_v62 = vadd.f32 %v766_v18, %v748_v41  ;;  %v592_v58 = vadd.f32 %v584_v22, %v1564_v42  ;;  %v897_v4 = vmul.f32 %v1486_v7, %v887_v24  ;;  %v757_v11 = vld [vmem:[#allocation2 + $0xa2] sm:$0xf]  ;;  %v888_v31 = vld [vmem:[#allocation2 + $0xa9] sm:$0xf]  ;;  %v785_v22 = vld [vmem:[#allocation2 + $0xb0] sm:$0xf] }
  0x7a   : > { %v879_v55 = vadd.f32 %v871_v25, %v852_v26  ;;  %v696_v51 = vadd.f32 %v688_v44, %v670_v21  ;;  %v819_v23 = vmul.f32 %v1460_v63, %v809_v53  ;;  %v923_v56 = vmul.f32 %v1496_v60, %v913_v40  ;;  %v810_v48 = vld [vmem:[#allocation2 + $0xa9] sm:$0xf]  ;;  %v863_v26 = vld [vmem:[#allocation2 + $0xb0] sm:$0xf] }
  0x7b   : > { %938 = vst.msk [vmem:[%s1548_s28 + $0xc] sm:$0xf] %vm205_vm1, %v930_v17  ;;  %v801_v20 = vadd.f32 %v793_v10, %v774_v62  ;;  %v618_v13 = vadd.f32 %v610_v12, %v592_v58  ;;  %v741_v39 = vmul.f32 %v1434_v29, %v731_v0  ;;  %v845_v32 = vmul.f32 %v1475_v35, %v835_v2  ;;  %v914_v43 = vld [vmem:[#allocation2 + $0xaa] sm:$0xf]  ;;  %v889_v40 = vld [vmem:[#allocation2 + $0xb1] sm:$0xf] }
  0x7c   : > { %v905_v19 = vadd.f32 %v897_v4, %v879_v55  ;;  %v723_v42 = vadd.f32 %v715_v61, %v696_v51  ;;  %v663_v38 = vmul.f32 %v1404_v9, %v653_v45  ;;  %v872_v25 = vmul.f32 %v1480_v8, %v862_v52  ;;  %v732_v10 = vld [vmem:[#allocation2 + $0xa9] sm:$0xf]  ;;  %v811_v4 = vld [vmem:[#allocation2 + $0xb1] sm:$0xf] }
  0x7d   : > { %v827_v57 = vadd.f32 %v819_v23, %v801_v20  ;;  %v645_v33 = vadd.f32 %v637_v6, %v618_v13  ;;  %v767_v1 = vmul.f32 %v1448_v36, %v757_v11  ;;  %v689_v18 = vmul.f32 %v1416_v14, %v679_v27  ;;  %v836_v15 = vld [vmem:[#allocation2 + $0xaa] sm:$0xf]  ;;  %v915_v2 = vld [vmem:[#allocation2 + $0xb2] sm:$0xf]  ;;  %v864_v23 = vld [vmem:[#allocation2 + $0xb8] sm:$0xf] }
  0x7e   : > { %v931_v28 = vadd.f32 %v923_v56, %v905_v19  ;;  %v749_v5 = vadd.f32 %v741_v39, %v723_v42  ;;  %v716_v37 = vmul.f32 %v1426_v3, %v706_v16  ;;  %v794_v9 = vmul.f32 %v1455_v49, %v784_v50  ;;  %v758_v44 = vld [vmem:[#allocation2 + $0xaa] sm:$0xf]  ;;  %v837_v20 = vld [vmem:[#allocation2 + $0xb2] sm:$0xf]  ;;  %v890_v39 = vld [vmem:[#allocation2 + $0xb9] sm:$0xf] }
  0x7f   : > { %v853_v59 = vadd.f32 %v845_v32, %v827_v57  ;;  %v671_v30 = vadd.f32 %v663_v38, %v645_v33  ;;  %v898_v47 = vmul.f32 %v1486_v7, %v888_v31  ;;  %v820_v41 = vmul.f32 %v1460_v63, %v810_v48  ;;  %v916_v16 = vld [vmem:[#allocation2 + $0xba] sm:$0xf] }
  0x80   : > { %939 = vst.msk [vmem:[%s1548_s28 + $0x10] sm:$0xf] %vm205_vm1, %v931_v28  ;;  %v775_v34 = vadd.f32 %v767_v1, %v749_v5  ;;  %v924_v3 = vmul.f32 %v1496_v60, %v914_v43  ;;  %v742_v21 = vmul.f32 %v1434_v29, %v732_v10  ;;  %v846_v12 = vmul.f32 %v1475_v35, %v836_v15 }
  0x81   : > { %v880_v46 = vadd.f32 %v872_v25, %v853_v59  ;;  %v697_v54 = vadd.f32 %v689_v18, %v671_v30  ;;  %v768_v0 = vmul.f32 %v1448_v36, %v758_v44  ;;  %v795_v58 = vmul.f32 %v1455_v49, %v785_v22 }
  0x82   : > { %v802_v24 = vadd.f32 %v794_v9, %v775_v34  ;;  %v873_v55 = vmul.f32 %v1480_v8, %v863_v26  ;;  %v899_v45 = vmul.f32 %v1486_v7, %v889_v40  ;;  %v821_v11 = vmul.f32 %v1460_v63, %v811_v4 }
  0x83   : > { %v906_v14 = vadd.f32 %v898_v47, %v880_v46  ;;  %v724_v53 = vadd.f32 %v716_v37, %v697_v54  ;;  %v925_v49 = vmul.f32 %v1496_v60, %v915_v2  ;;  %v847_v19 = vmul.f32 %v1475_v35, %v837_v20 }
  0x84   : > { %v828_v61 = vadd.f32 %v820_v41, %v802_v24  ;;  %v874_v56 = vmul.f32 %v1480_v8, %v864_v23  ;;  %v900_v32 = vmul.f32 %v1486_v7, %v890_v39  ;;  %v926_v63 = vmul.f32 %v1496_v60, %v916_v16 }
  0x85   : > { %v932_v17 = vadd.f32 %v924_v3, %v906_v14  ;;  %v750_v62 = vadd.f32 %v742_v21, %v724_v53 }
  0x86   : > { %v854_v6 = vadd.f32 %v846_v12, %v828_v61 }
  0x87   : > { %940 = vst.msk [vmem:[%s1548_s28 + $0x14] sm:$0xf] %vm205_vm1, %v932_v17  ;;  %v776_v51 = vadd.f32 %v768_v0, %v750_v62 }
  0x88   : > { %v881_v29 = vadd.f32 %v873_v55, %v854_v6 }
  0x89   : > { %v803_v52 = vadd.f32 %v795_v58, %v776_v51 }
  0x8a   : > { %v907_v36 = vadd.f32 %v899_v45, %v881_v29 }
  0x8b   : > { %v829_v13 = vadd.f32 %v821_v11, %v803_v52 }
  0x8c   : > { %v933_v42 = vadd.f32 %v925_v49, %v907_v36 }
  0x8d   : > { %v855_v27 = vadd.f32 %v847_v19, %v829_v13 }
  0x8e   : > { %941 = vst.msk [vmem:[%s1548_s28 + $0x18] sm:$0xf] %vm205_vm1, %v933_v42 }
  0x8f   : > { %v882_v57 = vadd.f32 %v874_v56, %v855_v27 }
  0x91   : > { %v908_v50 = vadd.f32 %v900_v32, %v882_v57 }
  0x93   : > { %v934_v33 = vadd.f32 %v926_v63, %v908_v50 }
  0x95   : > { %942 = vst.msk [vmem:[%s1548_s28 + $0x1c] sm:$0xf] %vm205_vm1, %v934_v33 }
  0x96 PF: > { %s13_s12 = sadd.s32 1, %s1054_s12  }
  0x97   : > { %p10_p4 = scmp.ge.s32.totalorder %s13_s12, 4  }
  0x99   :  { %12 = sbr.rel (!%p10_p4) target bundleno = 1 (0x1), region = 70 }

</bundles_post_ra>
